<compile_context>
chip_gen: v5e
topology: v5e:2x2
jax: 0.10.0
libtpu: 0.0.40
codegen_flags: <defaults>
</compile_context>

<pallas_src>
import math

import jax
import jax.numpy as jnp
from jax import lax
from jax.experimental import pallas as pl
from jax.experimental.pallas import tpu as pltpu

# ---- module hyper-parameters (PyTorch defaults) -----------------------------
D_MODEL = 128
NHEAD = 4
HEAD_DIM = D_MODEL // NHEAD
DIM_FF = 256
NUM_LAYERS = 2
LN_EPS = 1e-5

TARGET_ROWS = 2048                    # residual-stream rows (TB*S) per grid step
VMEM_LIMIT_BYTES = 48 * 1024 * 1024   # fits every TPU generation's VMEM


def _ceil_div(a, b):
    return -(-a // b)


def _tpu_vmem_bytes():
    try:
        return int(pltpu.get_tpu_info().vmem_capacity_bytes)
    except Exception:
        return 64 * 1024 * 1024       # conservative fallback (v7x-sized)


# ---- kernel -----------------------------------------------------------------
def _transformer_attention_kernel(
    x_ref,                    # [TB, S, D]  f32
    wqkv_t_ref,               # [L, D, 3D]  bf16 (pre-transposed)
    bqkv_ref,                 # [L, 3D]     f32
    wo_t_ref,                 # [L, D, D]   bf16
    bo_ref,                   # [L, D]      f32
    w1_t_ref,                 # [L, D, FF]  bf16
    b1_ref,                   # [L, FF]     f32
    w2_t_ref,                 # [L, FF, D]  bf16
    b2_ref,                   # [L, D]      f32
    ln1g_ref, ln1b_ref,       # [L, D]      f32
    ln2g_ref, ln2b_ref,       # [L, D]      f32
    attn_w_ref,               # [1, 1, D]   f32
    attn_b_ref,               # [1, 1]      f32
    out_ref,                  # [TB, D]     f32
):
    TB, S, D = x_ref.shape
    N = TB * S
    x = x_ref[...].astype(jnp.float32).reshape(N, D)       # [N, D]
    scale = 1.0 / math.sqrt(HEAD_DIM)

    def bf16(v):
        return v.astype(jnp.bfloat16)

    def layer_norm(v, g, b):
        # E[x^2] - E[x]^2 : the two cross-lane reductions are independent.
        mu = jnp.mean(v, axis=-1, keepdims=True)
        ms = jnp.mean(v * v, axis=-1, keepdims=True)
        var = jnp.maximum(ms - mu * mu, 0.0)
        return (v - mu) * lax.rsqrt(var + LN_EPS) * g + b

    for l in range(NUM_LAYERS):
        # ---- fused QKV projection (full-width MXU matmul) --------------------
        qkv = jnp.dot(bf16(x), wqkv_t_ref[l],
                      preferred_element_type=jnp.float32) + bqkv_ref[l]   # [N, 3D]
        qkv_b = bf16(qkv)

        # Gather heads into the *batch* dimension: [NHEAD*TB, S, HEAD_DIM].
        def heads(base):
            return jnp.concatenate(
                [qkv_b[:, base + h * HEAD_DIM: base + (h + 1) * HEAD_DIM]
                 .reshape(TB, S, HEAD_DIM) for h in range(NHEAD)],
                axis=0)

        qh = heads(0)
        kh = heads(D)
        vh = heads(2 * D)

        # All heads at once: 2 batched matmuls + 1 softmax pass.
        s = jnp.einsum('bqd,bkd->bqk', qh, kh,
                       preferred_element_type=jnp.float32) * scale       # [H*TB, S, S]
        s = s - jnp.max(s, axis=-1, keepdims=True)
        p = jnp.exp(s)                                                   # f32 softmax
        p = p * pl.reciprocal(jnp.sum(p, axis=-1, keepdims=True), approx=True)
        ctx = jnp.einsum('bqk,bkd->bqd', bf16(p), vh,
                         preferred_element_type=jnp.float32)             # [H*TB, S, hd]

        # Re-pack heads along lanes once for the full-K (128) out-projection.
        ctx_full = jnp.concatenate(
            [ctx[h * TB:(h + 1) * TB].reshape(N, HEAD_DIM) for h in range(NHEAD)],
            axis=-1)                                                     # [N, D]

        attn_out = jnp.dot(bf16(ctx_full), wo_t_ref[l],
                           preferred_element_type=jnp.float32) + bo_ref[l]
        x = layer_norm(x + attn_out, ln1g_ref[l], ln1b_ref[l])

        # ---- feed-forward ----------------------------------------------------
        h1 = jnp.dot(bf16(x), w1_t_ref[l],
                     preferred_element_type=jnp.float32) + b1_ref[l]
        h1 = jnp.maximum(h1, 0.0)                                        # relu
        ff = jnp.dot(bf16(h1), w2_t_ref[l],
                     preferred_element_type=jnp.float32) + b2_ref[l]
        x = layer_norm(x + ff, ln2g_ref[l], ln2b_ref[l])

    # ---- attention pooling head (softmax over seq, per batch element) --------
    # (kept as multiply+reduce; the [TB,S,D] temp is negligible vs the matmuls)
    x3 = x.reshape(TB, S, D)
    scores = jnp.sum(x3 * attn_w_ref[...], axis=-1, keepdims=True) + attn_b_ref[0, 0]
    scores = scores - jnp.max(scores, axis=1, keepdims=True)             # [TB, S, 1]
    w = jnp.exp(scores)
    w = w * pl.reciprocal(jnp.sum(w, axis=1, keepdims=True), approx=True)
    out_ref[...] = jnp.sum(x3 * w, axis=1).astype(out_ref.dtype)         # [TB, D]


# ---- one-time parameter preparation (hoisted out of the call path) -----------
def prepare_kernel_params(p):
    bf = jnp.bfloat16
    return {
        "wqkv_t": jnp.transpose(p["wqkv"], (0, 2, 1)).astype(bf),   # [L, D, 3D]
        "bqkv":   p["bqkv"].astype(jnp.float32),
        "wo_t":   jnp.transpose(p["wo"], (0, 2, 1)).astype(bf),     # [L, D, D]
        "bo":     p["bo"].astype(jnp.float32),
        "w1_t":   jnp.transpose(p["w1"], (0, 2, 1)).astype(bf),     # [L, D, FF]
        "b1":     p["b1"].astype(jnp.float32),
        "w2_t":   jnp.transpose(p["w2"], (0, 2, 1)).astype(bf),     # [L, FF, D]
        "b2":     p["b2"].astype(jnp.float32),
        "ln1g": p["ln1g"], "ln1b": p["ln1b"],
        "ln2g": p["ln2g"], "ln2b": p["ln2b"],
        "attn_w3": p["attn_w"].reshape(1, 1, D_MODEL).astype(jnp.float32),
        "attn_b2": p["attn_b"].reshape(1, 1).astype(jnp.float32),
    }


# ---- tiling heuristic ---------------------------------------------------------
def _choose_tiling(B, S):
    tb_max = max(1, TARGET_ROWS // S)
    # Small VMEM (~64 MiB) is the proxy for v7x, which has 2 TensorCores.
    dual_core_hint = _tpu_vmem_bytes() < 100 * 1024 * 1024

    if B <= tb_max:
        tb, grid = B, 1                      # block == full batch -> no padding
        # On dual-TC chips split mid-size batches across both cores.
        if dual_core_hint and B >= 16 and (B // 2) * S >= 64:
            tb = _ceil_div(_ceil_div(B, 2), 8) * 8
            grid = _ceil_div(B, tb)
    else:
        grid = _ceil_div(B, tb_max)
        tb = _ceil_div(_ceil_div(B, grid), 8) * 8   # balanced & sublane-aligned
        grid = _ceil_div(B, tb)
    return tb, grid


# ---- wrapper ----------------------------------------------------------------
@jax.jit
def transformer_attention_block(features, kp):
    B, S, D = features.shape
    assert D == D_MODEL
    tb, grid = _choose_tiling(B, S)
    b_pad = grid * tb

    x = features.astype(jnp.float32)
    if b_pad != B:
        # Only reached when grid > 1 and B % tb != 0; padding is <= tb-1 rows.
        x = jnp.pad(x, ((0, b_pad - B), (0, 0), (0, 0)))

    inputs = (
        x,
        kp["wqkv_t"], kp["bqkv"], kp["wo_t"], kp["bo"],
        kp["w1_t"], kp["b1"], kp["w2_t"], kp["b2"],
        kp["ln1g"], kp["ln1b"], kp["ln2g"], kp["ln2b"],
        kp["attn_w3"], kp["attn_b2"],
    )

    def full_spec(a):
        nd = a.ndim
        return pl.BlockSpec(a.shape, lambda i, _nd=nd: (0,) * _nd)

    in_specs = [pl.BlockSpec((tb, S, D), lambda i: (i, 0, 0))]
    in_specs += [full_spec(a) for a in inputs[1:]]

    out = pl.pallas_call(
        _transformer_attention_kernel,
        out_shape=jax.ShapeDtypeStruct((b_pad, D), jnp.float32),
        grid_spec=pltpu.PrefetchScalarGridSpec(
            num_scalar_prefetch=0,
            grid=(grid,),
            in_specs=in_specs,
            out_specs=pl.BlockSpec((tb, D), lambda i: (i, 0)),
        ),
        compiler_params=pltpu.CompilerParams(
            dimension_semantics=("parallel",),
            vmem_limit_bytes=VMEM_LIMIT_BYTES),
    )(*inputs)
    return out[:B]


# ---- pure-JAX reference (PyTorch eval-mode semantics, f32) --------------------
def reference(features, p):
    x = features.astype(jnp.float32)
    B, S, D = x.shape

    def ln(v, g, b):
        mu = jnp.mean(v, axis=-1, keepdims=True)
        var = jnp.mean((v - mu) ** 2, axis=-1, keepdims=True)
        return (v - mu) / jnp.sqrt(var + LN_EPS) * g + b

    for l in range(NUM_LAYERS):
        qkv = x @ p["wqkv"][l].T + p["bqkv"][l]                  # [B, S, 3D]
        q, k, v = jnp.split(qkv, 3, axis=-1)
        q = q.reshape(B, S, NHEAD, HEAD_DIM)
        k = k.reshape(B, S, NHEAD, HEAD_DIM)
        v = v.reshape(B, S, NHEAD, HEAD_DIM)
        s = jnp.einsum("bqhd,bkhd->bhqk", q, k) / math.sqrt(HEAD_DIM)
        a = jax.nn.softmax(s, axis=-1)
        ctx = jnp.einsum("bhqk,bkhd->bqhd", a, v).reshape(B, S, D)
        attn_out = ctx @ p["wo"][l].T + p["bo"][l]
        x = ln(x + attn_out, p["ln1g"][l], p["ln1b"][l])
        h1 = jax.nn.relu(x @ p["w1"][l].T + p["b1"][l])
        ff = h1 @ p["w2"][l].T + p["b2"][l]
        x = ln(x + ff, p["ln2g"][l], p["ln2b"][l])

    scores = x @ p["attn_w"].T + p["attn_b"]                     # [B, S, 1]
    w = jax.nn.softmax(scores, axis=1)
    return jnp.sum(x * w, axis=1)


# ---- deterministic parameter construction ------------------------------------
def make_params(key):
    keys = jax.random.split(key, 12)
    L, D, FF = NUM_LAYERS, D_MODEL, DIM_FF
    s = 0.05
    return {
        "wqkv": jax.random.normal(keys[0], (L, 3 * D, D), jnp.float32) * s,
        "bqkv": jax.random.normal(keys[1], (L, 3 * D), jnp.float32) * s,
        "wo":   jax.random.normal(keys[2], (L, D, D), jnp.float32) * s,
        "bo":   jax.random.normal(keys[3], (L, D), jnp.float32) * s,
        "w1":   jax.random.normal(keys[4], (L, FF, D), jnp.float32) * s,
        "b1":   jax.random.normal(keys[5], (L, FF), jnp.float32) * s,
        "w2":   jax.random.normal(keys[6], (L, D, FF), jnp.float32) * s,
        "b2":   jax.random.normal(keys[7], (L, D), jnp.float32) * s,
        "ln1g": jnp.ones((L, D), jnp.float32),
        "ln1b": jnp.zeros((L, D), jnp.float32),
        "ln2g": jnp.ones((L, D), jnp.float32),
        "ln2b": jnp.zeros((L, D), jnp.float32),
        "attn_w": jax.random.normal(keys[8], (1, D), jnp.float32) * s,
        "attn_b": jax.random.normal(keys[9], (1,), jnp.float32) * s,
    }


if __name__ == "__main__":
    key = jax.random.PRNGKey(0)
    k_feat, k_param = jax.random.split(key)

    B, S = 2, 8
    features = jax.random.normal(k_feat, (B, S, D_MODEL), jnp.float32)
    params = make_params(k_param)
    kparams = prepare_kernel_params(params)    # one-time layout/dtype prep

    out = transformer_attention_block(features, kparams)
    out = jax.block_until_ready(out)

    ref = jax.block_until_ready(reference(features, params))
    assert out.shape == (B, D_MODEL)
    # bf16 matmul operands with f32 accumulation -> slightly looser tolerance.
    assert jnp.allclose(out, ref, atol=2e-2, rtol=2e-2), (
        float(jnp.max(jnp.abs(out - ref))))

    print("KERNEL_OK")
</pallas_src>

<mosaic_0001>
module attributes {stable_mosaic.version = 11 : i64} {
  func.func @_transformer_attention_kernel(%arg0: i32, %arg1: memref<2x8x128xf32, #tpu.memory_space<vmem>>, %arg2: memref<2x128x384xbf16, #tpu.memory_space<vmem>>, %arg3: memref<2x384xf32, #tpu.memory_space<vmem>>, %arg4: memref<2x128x128xbf16, #tpu.memory_space<vmem>>, %arg5: memref<2x128xf32, #tpu.memory_space<vmem>>, %arg6: memref<2x128x256xbf16, #tpu.memory_space<vmem>>, %arg7: memref<2x256xf32, #tpu.memory_space<vmem>>, %arg8: memref<2x256x128xbf16, #tpu.memory_space<vmem>>, %arg9: memref<2x128xf32, #tpu.memory_space<vmem>>, %arg10: memref<2x128xf32, #tpu.memory_space<vmem>>, %arg11: memref<2x128xf32, #tpu.memory_space<vmem>>, %arg12: memref<2x128xf32, #tpu.memory_space<vmem>>, %arg13: memref<2x128xf32, #tpu.memory_space<vmem>>, %arg14: memref<1x1x128xf32, #tpu.memory_space<vmem>>, %arg15: memref<1x1xf32, #tpu.memory_space<vmem>>, %arg16: memref<2x128xf32, #tpu.memory_space<vmem>>) attributes {dimension_semantics = [#tpu.dimension_semantics<parallel>], iteration_bounds = array<i64: 1>, scalar_prefetch = 0 : i64, scratch_operands = 0 : i64, tpu.core_type = #tpu.core_type<tc>, window_params = [{transform_indices = @transform_0, window_bounds = array<i64: 2, 8, 128>}, {pipeline_mode = #tpu.pipeline_mode<synchronous>, transform_indices = @transform_1, window_bounds = array<i64: 2, 128, 384>}, {pipeline_mode = #tpu.pipeline_mode<synchronous>, transform_indices = @transform_2, window_bounds = array<i64: 2, 384>}, {pipeline_mode = #tpu.pipeline_mode<synchronous>, transform_indices = @transform_3, window_bounds = array<i64: 2, 128, 128>}, {pipeline_mode = #tpu.pipeline_mode<synchronous>, transform_indices = @transform_4, window_bounds = array<i64: 2, 128>}, {pipeline_mode = #tpu.pipeline_mode<synchronous>, transform_indices = @transform_5, window_bounds = array<i64: 2, 128, 256>}, {pipeline_mode = #tpu.pipeline_mode<synchronous>, transform_indices = @transform_6, window_bounds = array<i64: 2, 256>}, {pipeline_mode = #tpu.pipeline_mode<synchronous>, transform_indices = @transform_7, window_bounds = array<i64: 2, 256, 128>}, {pipeline_mode = #tpu.pipeline_mode<synchronous>, transform_indices = @transform_8, window_bounds = array<i64: 2, 128>}, {pipeline_mode = #tpu.pipeline_mode<synchronous>, transform_indices = @transform_9, window_bounds = array<i64: 2, 128>}, {pipeline_mode = #tpu.pipeline_mode<synchronous>, transform_indices = @transform_10, window_bounds = array<i64: 2, 128>}, {pipeline_mode = #tpu.pipeline_mode<synchronous>, transform_indices = @transform_11, window_bounds = array<i64: 2, 128>}, {pipeline_mode = #tpu.pipeline_mode<synchronous>, transform_indices = @transform_12, window_bounds = array<i64: 2, 128>}, {pipeline_mode = #tpu.pipeline_mode<synchronous>, transform_indices = @transform_13, window_bounds = array<i64: 1, 1, 128>}, {pipeline_mode = #tpu.pipeline_mode<synchronous>, transform_indices = @transform_14, window_bounds = array<i64: 1, 1>}, {transform_indices = @transform_15, window_bounds = array<i64: 2, 128>}]} {
    %c0 = arith.constant 0 : index
    %c0_0 = arith.constant 0 : index
    %c0_1 = arith.constant 0 : index
    %0 = vector.load %arg1[%c0, %c0_0, %c0_1] : memref<2x8x128xf32, #tpu.memory_space<vmem>>, vector<2x8x128xf32>
    %1 = vector.shape_cast %0 : vector<2x8x128xf32> to vector<16x128xf32>
    %2 = arith.truncf %1 : vector<16x128xf32> to vector<16x128xbf16>
    %c0_2 = arith.constant 0 : index
    %c0_3 = arith.constant 0 : index
    %c0_4 = arith.constant 0 : index
    %3 = vector.load %arg2[%c0_2, %c0_3, %c0_4] : memref<2x128x384xbf16, #tpu.memory_space<vmem>>, vector<1x128x384xbf16>
    %4 = vector.shape_cast %3 : vector<1x128x384xbf16> to vector<128x384xbf16>
    %cst = arith.constant dense<0.000000e+00> : vector<16x384xf32>
    %5 = tpu.matmul %2, %4, %cst {dimension_numbers = #tpu.dot_dimension_numbers<[1], [0], [0], [1], [0, 0, 1, 1], [], []>} : vector<16x128xbf16>, vector<128x384xbf16>, vector<16x384xf32> -> vector<16x384xf32>
    %c0_5 = arith.constant 0 : index
    %c0_6 = arith.constant 0 : index
    %6 = vector.load %arg3[%c0_5, %c0_6] : memref<2x384xf32, #tpu.memory_space<vmem>>, vector<1x384xf32>
    %7 = vector.shape_cast %6 : vector<1x384xf32> to vector<384xf32>
    %8 = vector.shape_cast %7 : vector<384xf32> to vector<1x384xf32>
    %9 = vector.broadcast %8 : vector<1x384xf32> to vector<16x384xf32>
    %10 = arith.addf %5, %9 : vector<16x384xf32>
    %11 = arith.truncf %10 : vector<16x384xf32> to vector<16x384xbf16>
    %12 = vector.extract_strided_slice %11 {offsets = [0, 0], sizes = [16, 32], strides = [1, 1]} : vector<16x384xbf16> to vector<16x32xbf16>
    %13 = vector.shape_cast %12 : vector<16x32xbf16> to vector<2x8x32xbf16>
    %14 = vector.extract_strided_slice %11 {offsets = [0, 32], sizes = [16, 32], strides = [1, 1]} : vector<16x384xbf16> to vector<16x32xbf16>
    %15 = vector.shape_cast %14 : vector<16x32xbf16> to vector<2x8x32xbf16>
    %16 = vector.extract_strided_slice %11 {offsets = [0, 64], sizes = [16, 32], strides = [1, 1]} : vector<16x384xbf16> to vector<16x32xbf16>
    %17 = vector.shape_cast %16 : vector<16x32xbf16> to vector<2x8x32xbf16>
    %18 = vector.extract_strided_slice %11 {offsets = [0, 96], sizes = [16, 32], strides = [1, 1]} : vector<16x384xbf16> to vector<16x32xbf16>
    %19 = vector.shape_cast %18 : vector<16x32xbf16> to vector<2x8x32xbf16>
    %20 = tpu.concatenate %13, %15, %17, %19 in 0 : vector<2x8x32xbf16>, vector<2x8x32xbf16>, vector<2x8x32xbf16>, vector<2x8x32xbf16> -> vector<8x8x32xbf16>
    %21 = vector.extract_strided_slice %11 {offsets = [0, 128], sizes = [16, 32], strides = [1, 1]} : vector<16x384xbf16> to vector<16x32xbf16>
    %22 = vector.shape_cast %21 : vector<16x32xbf16> to vector<2x8x32xbf16>
    %23 = vector.extract_strided_slice %11 {offsets = [0, 160], sizes = [16, 32], strides = [1, 1]} : vector<16x384xbf16> to vector<16x32xbf16>
    %24 = vector.shape_cast %23 : vector<16x32xbf16> to vector<2x8x32xbf16>
    %25 = vector.extract_strided_slice %11 {offsets = [0, 192], sizes = [16, 32], strides = [1, 1]} : vector<16x384xbf16> to vector<16x32xbf16>
    %26 = vector.shape_cast %25 : vector<16x32xbf16> to vector<2x8x32xbf16>
    %27 = vector.extract_strided_slice %11 {offsets = [0, 224], sizes = [16, 32], strides = [1, 1]} : vector<16x384xbf16> to vector<16x32xbf16>
    %28 = vector.shape_cast %27 : vector<16x32xbf16> to vector<2x8x32xbf16>
    %29 = tpu.concatenate %22, %24, %26, %28 in 0 : vector<2x8x32xbf16>, vector<2x8x32xbf16>, vector<2x8x32xbf16>, vector<2x8x32xbf16> -> vector<8x8x32xbf16>
    %30 = vector.extract_strided_slice %11 {offsets = [0, 256], sizes = [16, 32], strides = [1, 1]} : vector<16x384xbf16> to vector<16x32xbf16>
    %31 = vector.shape_cast %30 : vector<16x32xbf16> to vector<2x8x32xbf16>
    %32 = vector.extract_strided_slice %11 {offsets = [0, 288], sizes = [16, 32], strides = [1, 1]} : vector<16x384xbf16> to vector<16x32xbf16>
    %33 = vector.shape_cast %32 : vector<16x32xbf16> to vector<2x8x32xbf16>
    %34 = vector.extract_strided_slice %11 {offsets = [0, 320], sizes = [16, 32], strides = [1, 1]} : vector<16x384xbf16> to vector<16x32xbf16>
    %35 = vector.shape_cast %34 : vector<16x32xbf16> to vector<2x8x32xbf16>
    %36 = vector.extract_strided_slice %11 {offsets = [0, 352], sizes = [16, 32], strides = [1, 1]} : vector<16x384xbf16> to vector<16x32xbf16>
    %37 = vector.shape_cast %36 : vector<16x32xbf16> to vector<2x8x32xbf16>
    %38 = tpu.concatenate %31, %33, %35, %37 in 0 : vector<2x8x32xbf16>, vector<2x8x32xbf16>, vector<2x8x32xbf16>, vector<2x8x32xbf16> -> vector<8x8x32xbf16>
    "tpu.trace_start"() <{level = 10 : i32, message = "bqd,bkd->bqk"}> : () -> ()
    %cst_7 = arith.constant dense<0.000000e+00> : vector<8x8x8xf32>
    %39 = tpu.matmul %20, %29, %cst_7 {dimension_numbers = #tpu.dot_dimension_numbers<[2], [2], [1], [1], [0, 0, 0, 1, 1, 1], [0], [0]>} : vector<8x8x32xbf16>, vector<8x8x32xbf16>, vector<8x8x8xf32> -> vector<8x8x8xf32>
    "tpu.trace_stop"() : () -> ()
    %cst_8 = arith.constant 0.176776692 : f32
    %40 = vector.broadcast %cst_8 : f32 to vector<8x8x8xf32>
    %41 = arith.mulf %39, %40 : vector<8x8x8xf32>
    %cst_9 = arith.constant dense<0xFF800000> : vector<8x8xf32>
    %42 = vector.multi_reduction <maximumf>, %41, %cst_9 [2] : vector<8x8x8xf32> to vector<8x8xf32>
    %43 = vector.shape_cast %42 : vector<8x8xf32> to vector<8x8x1xf32>
    %44 = vector.broadcast %43 : vector<8x8x1xf32> to vector<8x8x8xf32>
    %45 = arith.subf %41, %44 : vector<8x8x8xf32>
    %46 = math.exp %45 : vector<8x8x8xf32>
    %cst_10 = arith.constant dense<0.000000e+00> : vector<8x8xf32>
    %47 = vector.multi_reduction <add>, %46, %cst_10 [2] : vector<8x8x8xf32> to vector<8x8xf32>
    %48 = vector.shape_cast %47 : vector<8x8xf32> to vector<8x8x1xf32>
    %49 = tpu.reciprocal %48 {approx = true} : vector<8x8x1xf32> -> vector<8x8x1xf32>
    %50 = vector.broadcast %49 : vector<8x8x1xf32> to vector<8x8x8xf32>
    %51 = arith.mulf %46, %50 : vector<8x8x8xf32>
    %52 = arith.truncf %51 : vector<8x8x8xf32> to vector<8x8x8xbf16>
    "tpu.trace_start"() <{level = 10 : i32, message = "bqk,bkd->bqd"}> : () -> ()
    %cst_11 = arith.constant dense<0.000000e+00> : vector<8x8x32xf32>
    %53 = tpu.matmul %52, %38, %cst_11 {dimension_numbers = #tpu.dot_dimension_numbers<[2], [1], [1], [2], [0, 0, 0, 1, 1, 2], [0], [0]>} : vector<8x8x8xbf16>, vector<8x8x32xbf16>, vector<8x8x32xf32> -> vector<8x8x32xf32>
    "tpu.trace_stop"() : () -> ()
    %54 = vector.extract_strided_slice %53 {offsets = [0, 0, 0], sizes = [2, 8, 32], strides = [1, 1, 1]} : vector<8x8x32xf32> to vector<2x8x32xf32>
    %55 = vector.shape_cast %54 : vector<2x8x32xf32> to vector<16x32xf32>
    %56 = vector.extract_strided_slice %53 {offsets = [2, 0, 0], sizes = [2, 8, 32], strides = [1, 1, 1]} : vector<8x8x32xf32> to vector<2x8x32xf32>
    %57 = vector.shape_cast %56 : vector<2x8x32xf32> to vector<16x32xf32>
    %58 = vector.extract_strided_slice %53 {offsets = [4, 0, 0], sizes = [2, 8, 32], strides = [1, 1, 1]} : vector<8x8x32xf32> to vector<2x8x32xf32>
    %59 = vector.shape_cast %58 : vector<2x8x32xf32> to vector<16x32xf32>
    %60 = vector.extract_strided_slice %53 {offsets = [6, 0, 0], sizes = [2, 8, 32], strides = [1, 1, 1]} : vector<8x8x32xf32> to vector<2x8x32xf32>
    %61 = vector.shape_cast %60 : vector<2x8x32xf32> to vector<16x32xf32>
    %62 = tpu.concatenate %55, %57, %59, %61 in 1 : vector<16x32xf32>, vector<16x32xf32>, vector<16x32xf32>, vector<16x32xf32> -> vector<16x128xf32>
    %63 = arith.truncf %62 : vector<16x128xf32> to vector<16x128xbf16>
    %c0_12 = arith.constant 0 : index
    %c0_13 = arith.constant 0 : index
    %c0_14 = arith.constant 0 : index
    %64 = vector.load %arg4[%c0_12, %c0_13, %c0_14] : memref<2x128x128xbf16, #tpu.memory_space<vmem>>, vector<1x128x128xbf16>
    %65 = vector.shape_cast %64 : vector<1x128x128xbf16> to vector<128x128xbf16>
    %cst_15 = arith.constant dense<0.000000e+00> : vector<16x128xf32>
    %66 = tpu.matmul %63, %65, %cst_15 {dimension_numbers = #tpu.dot_dimension_numbers<[1], [0], [0], [1], [0, 0, 1, 1], [], []>} : vector<16x128xbf16>, vector<128x128xbf16>, vector<16x128xf32> -> vector<16x128xf32>
    %c0_16 = arith.constant 0 : index
    %c0_17 = arith.constant 0 : index
    %67 = vector.load %arg5[%c0_16, %c0_17] : memref<2x128xf32, #tpu.memory_space<vmem>>, vector<1x128xf32>
    %68 = vector.shape_cast %67 : vector<1x128xf32> to vector<128xf32>
    %69 = vector.shape_cast %68 : vector<128xf32> to vector<1x128xf32>
    %70 = vector.broadcast %69 : vector<1x128xf32> to vector<16x128xf32>
    %71 = arith.addf %66, %70 : vector<16x128xf32>
    %72 = arith.addf %1, %71 : vector<16x128xf32>
    %c0_18 = arith.constant 0 : index
    %c0_19 = arith.constant 0 : index
    %73 = vector.load %arg10[%c0_18, %c0_19] : memref<2x128xf32, #tpu.memory_space<vmem>>, vector<1x128xf32>
    %74 = vector.shape_cast %73 : vector<1x128xf32> to vector<128xf32>
    %c0_20 = arith.constant 0 : index
    %c0_21 = arith.constant 0 : index
    %75 = vector.load %arg11[%c0_20, %c0_21] : memref<2x128xf32, #tpu.memory_space<vmem>>, vector<1x128xf32>
    %76 = vector.shape_cast %75 : vector<1x128xf32> to vector<128xf32>
    %cst_22 = arith.constant dense<0.000000e+00> : vector<16xf32>
    %77 = vector.multi_reduction <add>, %72, %cst_22 [1] : vector<16x128xf32> to vector<16xf32>
    %78 = vector.shape_cast %77 : vector<16xf32> to vector<16x1xf32>
    %cst_23 = arith.constant 1.280000e+02 : f32
    %79 = vector.broadcast %cst_23 : f32 to vector<16x1xf32>
    %80 = arith.divf %78, %79 : vector<16x1xf32>
    %81 = arith.mulf %72, %72 : vector<16x128xf32>
    %cst_24 = arith.constant dense<0.000000e+00> : vector<16xf32>
    %82 = vector.multi_reduction <add>, %81, %cst_24 [1] : vector<16x128xf32> to vector<16xf32>
    %83 = vector.shape_cast %82 : vector<16xf32> to vector<16x1xf32>
    %cst_25 = arith.constant 1.280000e+02 : f32
    %84 = vector.broadcast %cst_25 : f32 to vector<16x1xf32>
    %85 = arith.divf %83, %84 : vector<16x1xf32>
    %86 = arith.mulf %80, %80 : vector<16x1xf32>
    %87 = arith.subf %85, %86 : vector<16x1xf32>
    %cst_26 = arith.constant 0.000000e+00 : f32
    %88 = vector.broadcast %cst_26 : f32 to vector<16x1xf32>
    %89 = arith.maximumf %87, %88 : vector<16x1xf32>
    %90 = vector.broadcast %80 : vector<16x1xf32> to vector<16x128xf32>
    %91 = arith.subf %72, %90 : vector<16x128xf32>
    %cst_27 = arith.constant 9.99999974E-6 : f32
    %92 = vector.broadcast %cst_27 : f32 to vector<16x1xf32>
    %93 = arith.addf %89, %92 : vector<16x1xf32>
    %94 = math.rsqrt %93 : vector<16x1xf32>
    %95 = vector.broadcast %94 : vector<16x1xf32> to vector<16x128xf32>
    %96 = arith.mulf %91, %95 : vector<16x128xf32>
    %97 = vector.shape_cast %74 : vector<128xf32> to vector<1x128xf32>
    %98 = vector.broadcast %97 : vector<1x128xf32> to vector<16x128xf32>
    %99 = arith.mulf %96, %98 : vector<16x128xf32>
    %100 = vector.shape_cast %76 : vector<128xf32> to vector<1x128xf32>
    %101 = vector.broadcast %100 : vector<1x128xf32> to vector<16x128xf32>
    %102 = arith.addf %99, %101 : vector<16x128xf32>
    %103 = arith.truncf %102 : vector<16x128xf32> to vector<16x128xbf16>
    %c0_28 = arith.constant 0 : index
    %c0_29 = arith.constant 0 : index
    %c0_30 = arith.constant 0 : index
    %104 = vector.load %arg6[%c0_28, %c0_29, %c0_30] : memref<2x128x256xbf16, #tpu.memory_space<vmem>>, vector<1x128x256xbf16>
    %105 = vector.shape_cast %104 : vector<1x128x256xbf16> to vector<128x256xbf16>
    %cst_31 = arith.constant dense<0.000000e+00> : vector<16x256xf32>
    %106 = tpu.matmul %103, %105, %cst_31 {dimension_numbers = #tpu.dot_dimension_numbers<[1], [0], [0], [1], [0, 0, 1, 1], [], []>} : vector<16x128xbf16>, vector<128x256xbf16>, vector<16x256xf32> -> vector<16x256xf32>
    %c0_32 = arith.constant 0 : index
    %c0_33 = arith.constant 0 : index
    %107 = vector.load %arg7[%c0_32, %c0_33] : memref<2x256xf32, #tpu.memory_space<vmem>>, vector<1x256xf32>
    %108 = vector.shape_cast %107 : vector<1x256xf32> to vector<256xf32>
    %109 = vector.shape_cast %108 : vector<256xf32> to vector<1x256xf32>
    %110 = vector.broadcast %109 : vector<1x256xf32> to vector<16x256xf32>
    %111 = arith.addf %106, %110 : vector<16x256xf32>
    %cst_34 = arith.constant 0.000000e+00 : f32
    %112 = vector.broadcast %cst_34 : f32 to vector<16x256xf32>
    %113 = arith.maximumf %111, %112 : vector<16x256xf32>
    %114 = arith.truncf %113 : vector<16x256xf32> to vector<16x256xbf16>
    %c0_35 = arith.constant 0 : index
    %c0_36 = arith.constant 0 : index
    %c0_37 = arith.constant 0 : index
    %115 = vector.load %arg8[%c0_35, %c0_36, %c0_37] : memref<2x256x128xbf16, #tpu.memory_space<vmem>>, vector<1x256x128xbf16>
    %116 = vector.shape_cast %115 : vector<1x256x128xbf16> to vector<256x128xbf16>
    %cst_38 = arith.constant dense<0.000000e+00> : vector<16x128xf32>
    %117 = tpu.matmul %114, %116, %cst_38 {dimension_numbers = #tpu.dot_dimension_numbers<[1], [0], [0], [1], [0, 0, 1, 1], [], []>} : vector<16x256xbf16>, vector<256x128xbf16>, vector<16x128xf32> -> vector<16x128xf32>
    %c0_39 = arith.constant 0 : index
    %c0_40 = arith.constant 0 : index
    %118 = vector.load %arg9[%c0_39, %c0_40] : memref<2x128xf32, #tpu.memory_space<vmem>>, vector<1x128xf32>
    %119 = vector.shape_cast %118 : vector<1x128xf32> to vector<128xf32>
    %120 = vector.shape_cast %119 : vector<128xf32> to vector<1x128xf32>
    %121 = vector.broadcast %120 : vector<1x128xf32> to vector<16x128xf32>
    %122 = arith.addf %117, %121 : vector<16x128xf32>
    %123 = arith.addf %102, %122 : vector<16x128xf32>
    %c0_41 = arith.constant 0 : index
    %c0_42 = arith.constant 0 : index
    %124 = vector.load %arg12[%c0_41, %c0_42] : memref<2x128xf32, #tpu.memory_space<vmem>>, vector<1x128xf32>
    %125 = vector.shape_cast %124 : vector<1x128xf32> to vector<128xf32>
    %c0_43 = arith.constant 0 : index
    %c0_44 = arith.constant 0 : index
    %126 = vector.load %arg13[%c0_43, %c0_44] : memref<2x128xf32, #tpu.memory_space<vmem>>, vector<1x128xf32>
    %127 = vector.shape_cast %126 : vector<1x128xf32> to vector<128xf32>
    %cst_45 = arith.constant dense<0.000000e+00> : vector<16xf32>
    %128 = vector.multi_reduction <add>, %123, %cst_45 [1] : vector<16x128xf32> to vector<16xf32>
    %129 = vector.shape_cast %128 : vector<16xf32> to vector<16x1xf32>
    %cst_46 = arith.constant 1.280000e+02 : f32
    %130 = vector.broadcast %cst_46 : f32 to vector<16x1xf32>
    %131 = arith.divf %129, %130 : vector<16x1xf32>
    %132 = arith.mulf %123, %123 : vector<16x128xf32>
    %cst_47 = arith.constant dense<0.000000e+00> : vector<16xf32>
    %133 = vector.multi_reduction <add>, %132, %cst_47 [1] : vector<16x128xf32> to vector<16xf32>
    %134 = vector.shape_cast %133 : vector<16xf32> to vector<16x1xf32>
    %cst_48 = arith.constant 1.280000e+02 : f32
    %135 = vector.broadcast %cst_48 : f32 to vector<16x1xf32>
    %136 = arith.divf %134, %135 : vector<16x1xf32>
    %137 = arith.mulf %131, %131 : vector<16x1xf32>
    %138 = arith.subf %136, %137 : vector<16x1xf32>
    %cst_49 = arith.constant 0.000000e+00 : f32
    %139 = vector.broadcast %cst_49 : f32 to vector<16x1xf32>
    %140 = arith.maximumf %138, %139 : vector<16x1xf32>
    %141 = vector.broadcast %131 : vector<16x1xf32> to vector<16x128xf32>
    %142 = arith.subf %123, %141 : vector<16x128xf32>
    %cst_50 = arith.constant 9.99999974E-6 : f32
    %143 = vector.broadcast %cst_50 : f32 to vector<16x1xf32>
    %144 = arith.addf %140, %143 : vector<16x1xf32>
    %145 = math.rsqrt %144 : vector<16x1xf32>
    %146 = vector.broadcast %145 : vector<16x1xf32> to vector<16x128xf32>
    %147 = arith.mulf %142, %146 : vector<16x128xf32>
    %148 = vector.shape_cast %125 : vector<128xf32> to vector<1x128xf32>
    %149 = vector.broadcast %148 : vector<1x128xf32> to vector<16x128xf32>
    %150 = arith.mulf %147, %149 : vector<16x128xf32>
    %151 = vector.shape_cast %127 : vector<128xf32> to vector<1x128xf32>
    %152 = vector.broadcast %151 : vector<1x128xf32> to vector<16x128xf32>
    %153 = arith.addf %150, %152 : vector<16x128xf32>
    %154 = arith.truncf %153 : vector<16x128xf32> to vector<16x128xbf16>
    %c1 = arith.constant 1 : index
    %c0_51 = arith.constant 0 : index
    %c0_52 = arith.constant 0 : index
    %155 = vector.load %arg2[%c1, %c0_51, %c0_52] : memref<2x128x384xbf16, #tpu.memory_space<vmem>>, vector<1x128x384xbf16>
    %156 = vector.shape_cast %155 : vector<1x128x384xbf16> to vector<128x384xbf16>
    %cst_53 = arith.constant dense<0.000000e+00> : vector<16x384xf32>
    %157 = tpu.matmul %154, %156, %cst_53 {dimension_numbers = #tpu.dot_dimension_numbers<[1], [0], [0], [1], [0, 0, 1, 1], [], []>} : vector<16x128xbf16>, vector<128x384xbf16>, vector<16x384xf32> -> vector<16x384xf32>
    %c1_54 = arith.constant 1 : index
    %c0_55 = arith.constant 0 : index
    %158 = vector.load %arg3[%c1_54, %c0_55] : memref<2x384xf32, #tpu.memory_space<vmem>>, vector<1x384xf32>
    %159 = vector.shape_cast %158 : vector<1x384xf32> to vector<384xf32>
    %160 = vector.shape_cast %159 : vector<384xf32> to vector<1x384xf32>
    %161 = vector.broadcast %160 : vector<1x384xf32> to vector<16x384xf32>
    %162 = arith.addf %157, %161 : vector<16x384xf32>
    %163 = arith.truncf %162 : vector<16x384xf32> to vector<16x384xbf16>
    %164 = vector.extract_strided_slice %163 {offsets = [0, 0], sizes = [16, 32], strides = [1, 1]} : vector<16x384xbf16> to vector<16x32xbf16>
    %165 = vector.shape_cast %164 : vector<16x32xbf16> to vector<2x8x32xbf16>
    %166 = vector.extract_strided_slice %163 {offsets = [0, 32], sizes = [16, 32], strides = [1, 1]} : vector<16x384xbf16> to vector<16x32xbf16>
    %167 = vector.shape_cast %166 : vector<16x32xbf16> to vector<2x8x32xbf16>
    %168 = vector.extract_strided_slice %163 {offsets = [0, 64], sizes = [16, 32], strides = [1, 1]} : vector<16x384xbf16> to vector<16x32xbf16>
    %169 = vector.shape_cast %168 : vector<16x32xbf16> to vector<2x8x32xbf16>
    %170 = vector.extract_strided_slice %163 {offsets = [0, 96], sizes = [16, 32], strides = [1, 1]} : vector<16x384xbf16> to vector<16x32xbf16>
    %171 = vector.shape_cast %170 : vector<16x32xbf16> to vector<2x8x32xbf16>
    %172 = tpu.concatenate %165, %167, %169, %171 in 0 : vector<2x8x32xbf16>, vector<2x8x32xbf16>, vector<2x8x32xbf16>, vector<2x8x32xbf16> -> vector<8x8x32xbf16>
    %173 = vector.extract_strided_slice %163 {offsets = [0, 128], sizes = [16, 32], strides = [1, 1]} : vector<16x384xbf16> to vector<16x32xbf16>
    %174 = vector.shape_cast %173 : vector<16x32xbf16> to vector<2x8x32xbf16>
    %175 = vector.extract_strided_slice %163 {offsets = [0, 160], sizes = [16, 32], strides = [1, 1]} : vector<16x384xbf16> to vector<16x32xbf16>
    %176 = vector.shape_cast %175 : vector<16x32xbf16> to vector<2x8x32xbf16>
    %177 = vector.extract_strided_slice %163 {offsets = [0, 192], sizes = [16, 32], strides = [1, 1]} : vector<16x384xbf16> to vector<16x32xbf16>
    %178 = vector.shape_cast %177 : vector<16x32xbf16> to vector<2x8x32xbf16>
    %179 = vector.extract_strided_slice %163 {offsets = [0, 224], sizes = [16, 32], strides = [1, 1]} : vector<16x384xbf16> to vector<16x32xbf16>
    %180 = vector.shape_cast %179 : vector<16x32xbf16> to vector<2x8x32xbf16>
    %181 = tpu.concatenate %174, %176, %178, %180 in 0 : vector<2x8x32xbf16>, vector<2x8x32xbf16>, vector<2x8x32xbf16>, vector<2x8x32xbf16> -> vector<8x8x32xbf16>
    %182 = vector.extract_strided_slice %163 {offsets = [0, 256], sizes = [16, 32], strides = [1, 1]} : vector<16x384xbf16> to vector<16x32xbf16>
    %183 = vector.shape_cast %182 : vector<16x32xbf16> to vector<2x8x32xbf16>
    %184 = vector.extract_strided_slice %163 {offsets = [0, 288], sizes = [16, 32], strides = [1, 1]} : vector<16x384xbf16> to vector<16x32xbf16>
    %185 = vector.shape_cast %184 : vector<16x32xbf16> to vector<2x8x32xbf16>
    %186 = vector.extract_strided_slice %163 {offsets = [0, 320], sizes = [16, 32], strides = [1, 1]} : vector<16x384xbf16> to vector<16x32xbf16>
    %187 = vector.shape_cast %186 : vector<16x32xbf16> to vector<2x8x32xbf16>
    %188 = vector.extract_strided_slice %163 {offsets = [0, 352], sizes = [16, 32], strides = [1, 1]} : vector<16x384xbf16> to vector<16x32xbf16>
    %189 = vector.shape_cast %188 : vector<16x32xbf16> to vector<2x8x32xbf16>
    %190 = tpu.concatenate %183, %185, %187, %189 in 0 : vector<2x8x32xbf16>, vector<2x8x32xbf16>, vector<2x8x32xbf16>, vector<2x8x32xbf16> -> vector<8x8x32xbf16>
    "tpu.trace_start"() <{level = 10 : i32, message = "bqd,bkd->bqk"}> : () -> ()
    %cst_56 = arith.constant dense<0.000000e+00> : vector<8x8x8xf32>
    %191 = tpu.matmul %172, %181, %cst_56 {dimension_numbers = #tpu.dot_dimension_numbers<[2], [2], [1], [1], [0, 0, 0, 1, 1, 1], [0], [0]>} : vector<8x8x32xbf16>, vector<8x8x32xbf16>, vector<8x8x8xf32> -> vector<8x8x8xf32>
    "tpu.trace_stop"() : () -> ()
    %cst_57 = arith.constant 0.176776692 : f32
    %192 = vector.broadcast %cst_57 : f32 to vector<8x8x8xf32>
    %193 = arith.mulf %191, %192 : vector<8x8x8xf32>
    %cst_58 = arith.constant dense<0xFF800000> : vector<8x8xf32>
    %194 = vector.multi_reduction <maximumf>, %193, %cst_58 [2] : vector<8x8x8xf32> to vector<8x8xf32>
    %195 = vector.shape_cast %194 : vector<8x8xf32> to vector<8x8x1xf32>
    %196 = vector.broadcast %195 : vector<8x8x1xf32> to vector<8x8x8xf32>
    %197 = arith.subf %193, %196 : vector<8x8x8xf32>
    %198 = math.exp %197 : vector<8x8x8xf32>
    %cst_59 = arith.constant dense<0.000000e+00> : vector<8x8xf32>
    %199 = vector.multi_reduction <add>, %198, %cst_59 [2] : vector<8x8x8xf32> to vector<8x8xf32>
    %200 = vector.shape_cast %199 : vector<8x8xf32> to vector<8x8x1xf32>
    %201 = tpu.reciprocal %200 {approx = true} : vector<8x8x1xf32> -> vector<8x8x1xf32>
    %202 = vector.broadcast %201 : vector<8x8x1xf32> to vector<8x8x8xf32>
    %203 = arith.mulf %198, %202 : vector<8x8x8xf32>
    %204 = arith.truncf %203 : vector<8x8x8xf32> to vector<8x8x8xbf16>
    "tpu.trace_start"() <{level = 10 : i32, message = "bqk,bkd->bqd"}> : () -> ()
    %cst_60 = arith.constant dense<0.000000e+00> : vector<8x8x32xf32>
    %205 = tpu.matmul %204, %190, %cst_60 {dimension_numbers = #tpu.dot_dimension_numbers<[2], [1], [1], [2], [0, 0, 0, 1, 1, 2], [0], [0]>} : vector<8x8x8xbf16>, vector<8x8x32xbf16>, vector<8x8x32xf32> -> vector<8x8x32xf32>
    "tpu.trace_stop"() : () -> ()
    %206 = vector.extract_strided_slice %205 {offsets = [0, 0, 0], sizes = [2, 8, 32], strides = [1, 1, 1]} : vector<8x8x32xf32> to vector<2x8x32xf32>
    %207 = vector.shape_cast %206 : vector<2x8x32xf32> to vector<16x32xf32>
    %208 = vector.extract_strided_slice %205 {offsets = [2, 0, 0], sizes = [2, 8, 32], strides = [1, 1, 1]} : vector<8x8x32xf32> to vector<2x8x32xf32>
    %209 = vector.shape_cast %208 : vector<2x8x32xf32> to vector<16x32xf32>
    %210 = vector.extract_strided_slice %205 {offsets = [4, 0, 0], sizes = [2, 8, 32], strides = [1, 1, 1]} : vector<8x8x32xf32> to vector<2x8x32xf32>
    %211 = vector.shape_cast %210 : vector<2x8x32xf32> to vector<16x32xf32>
    %212 = vector.extract_strided_slice %205 {offsets = [6, 0, 0], sizes = [2, 8, 32], strides = [1, 1, 1]} : vector<8x8x32xf32> to vector<2x8x32xf32>
    %213 = vector.shape_cast %212 : vector<2x8x32xf32> to vector<16x32xf32>
    %214 = tpu.concatenate %207, %209, %211, %213 in 1 : vector<16x32xf32>, vector<16x32xf32>, vector<16x32xf32>, vector<16x32xf32> -> vector<16x128xf32>
    %215 = arith.truncf %214 : vector<16x128xf32> to vector<16x128xbf16>
    %c1_61 = arith.constant 1 : index
    %c0_62 = arith.constant 0 : index
    %c0_63 = arith.constant 0 : index
    %216 = vector.load %arg4[%c1_61, %c0_62, %c0_63] : memref<2x128x128xbf16, #tpu.memory_space<vmem>>, vector<1x128x128xbf16>
    %217 = vector.shape_cast %216 : vector<1x128x128xbf16> to vector<128x128xbf16>
    %cst_64 = arith.constant dense<0.000000e+00> : vector<16x128xf32>
    %218 = tpu.matmul %215, %217, %cst_64 {dimension_numbers = #tpu.dot_dimension_numbers<[1], [0], [0], [1], [0, 0, 1, 1], [], []>} : vector<16x128xbf16>, vector<128x128xbf16>, vector<16x128xf32> -> vector<16x128xf32>
    %c1_65 = arith.constant 1 : index
    %c0_66 = arith.constant 0 : index
    %219 = vector.load %arg5[%c1_65, %c0_66] : memref<2x128xf32, #tpu.memory_space<vmem>>, vector<1x128xf32>
    %220 = vector.shape_cast %219 : vector<1x128xf32> to vector<128xf32>
    %221 = vector.shape_cast %220 : vector<128xf32> to vector<1x128xf32>
    %222 = vector.broadcast %221 : vector<1x128xf32> to vector<16x128xf32>
    %223 = arith.addf %218, %222 : vector<16x128xf32>
    %224 = arith.addf %153, %223 : vector<16x128xf32>
    %c1_67 = arith.constant 1 : index
    %c0_68 = arith.constant 0 : index
    %225 = vector.load %arg10[%c1_67, %c0_68] : memref<2x128xf32, #tpu.memory_space<vmem>>, vector<1x128xf32>
    %226 = vector.shape_cast %225 : vector<1x128xf32> to vector<128xf32>
    %c1_69 = arith.constant 1 : index
    %c0_70 = arith.constant 0 : index
    %227 = vector.load %arg11[%c1_69, %c0_70] : memref<2x128xf32, #tpu.memory_space<vmem>>, vector<1x128xf32>
    %228 = vector.shape_cast %227 : vector<1x128xf32> to vector<128xf32>
    %cst_71 = arith.constant dense<0.000000e+00> : vector<16xf32>
    %229 = vector.multi_reduction <add>, %224, %cst_71 [1] : vector<16x128xf32> to vector<16xf32>
    %230 = vector.shape_cast %229 : vector<16xf32> to vector<16x1xf32>
    %cst_72 = arith.constant 1.280000e+02 : f32
    %231 = vector.broadcast %cst_72 : f32 to vector<16x1xf32>
    %232 = arith.divf %230, %231 : vector<16x1xf32>
    %233 = arith.mulf %224, %224 : vector<16x128xf32>
    %cst_73 = arith.constant dense<0.000000e+00> : vector<16xf32>
    %234 = vector.multi_reduction <add>, %233, %cst_73 [1] : vector<16x128xf32> to vector<16xf32>
    %235 = vector.shape_cast %234 : vector<16xf32> to vector<16x1xf32>
    %cst_74 = arith.constant 1.280000e+02 : f32
    %236 = vector.broadcast %cst_74 : f32 to vector<16x1xf32>
    %237 = arith.divf %235, %236 : vector<16x1xf32>
    %238 = arith.mulf %232, %232 : vector<16x1xf32>
    %239 = arith.subf %237, %238 : vector<16x1xf32>
    %cst_75 = arith.constant 0.000000e+00 : f32
    %240 = vector.broadcast %cst_75 : f32 to vector<16x1xf32>
    %241 = arith.maximumf %239, %240 : vector<16x1xf32>
    %242 = vector.broadcast %232 : vector<16x1xf32> to vector<16x128xf32>
    %243 = arith.subf %224, %242 : vector<16x128xf32>
    %cst_76 = arith.constant 9.99999974E-6 : f32
    %244 = vector.broadcast %cst_76 : f32 to vector<16x1xf32>
    %245 = arith.addf %241, %244 : vector<16x1xf32>
    %246 = math.rsqrt %245 : vector<16x1xf32>
    %247 = vector.broadcast %246 : vector<16x1xf32> to vector<16x128xf32>
    %248 = arith.mulf %243, %247 : vector<16x128xf32>
    %249 = vector.shape_cast %226 : vector<128xf32> to vector<1x128xf32>
    %250 = vector.broadcast %249 : vector<1x128xf32> to vector<16x128xf32>
    %251 = arith.mulf %248, %250 : vector<16x128xf32>
    %252 = vector.shape_cast %228 : vector<128xf32> to vector<1x128xf32>
    %253 = vector.broadcast %252 : vector<1x128xf32> to vector<16x128xf32>
    %254 = arith.addf %251, %253 : vector<16x128xf32>
    %255 = arith.truncf %254 : vector<16x128xf32> to vector<16x128xbf16>
    %c1_77 = arith.constant 1 : index
    %c0_78 = arith.constant 0 : index
    %c0_79 = arith.constant 0 : index
    %256 = vector.load %arg6[%c1_77, %c0_78, %c0_79] : memref<2x128x256xbf16, #tpu.memory_space<vmem>>, vector<1x128x256xbf16>
    %257 = vector.shape_cast %256 : vector<1x128x256xbf16> to vector<128x256xbf16>
    %cst_80 = arith.constant dense<0.000000e+00> : vector<16x256xf32>
    %258 = tpu.matmul %255, %257, %cst_80 {dimension_numbers = #tpu.dot_dimension_numbers<[1], [0], [0], [1], [0, 0, 1, 1], [], []>} : vector<16x128xbf16>, vector<128x256xbf16>, vector<16x256xf32> -> vector<16x256xf32>
    %c1_81 = arith.constant 1 : index
    %c0_82 = arith.constant 0 : index
    %259 = vector.load %arg7[%c1_81, %c0_82] : memref<2x256xf32, #tpu.memory_space<vmem>>, vector<1x256xf32>
    %260 = vector.shape_cast %259 : vector<1x256xf32> to vector<256xf32>
    %261 = vector.shape_cast %260 : vector<256xf32> to vector<1x256xf32>
    %262 = vector.broadcast %261 : vector<1x256xf32> to vector<16x256xf32>
    %263 = arith.addf %258, %262 : vector<16x256xf32>
    %cst_83 = arith.constant 0.000000e+00 : f32
    %264 = vector.broadcast %cst_83 : f32 to vector<16x256xf32>
    %265 = arith.maximumf %263, %264 : vector<16x256xf32>
    %266 = arith.truncf %265 : vector<16x256xf32> to vector<16x256xbf16>
    %c1_84 = arith.constant 1 : index
    %c0_85 = arith.constant 0 : index
    %c0_86 = arith.constant 0 : index
    %267 = vector.load %arg8[%c1_84, %c0_85, %c0_86] : memref<2x256x128xbf16, #tpu.memory_space<vmem>>, vector<1x256x128xbf16>
    %268 = vector.shape_cast %267 : vector<1x256x128xbf16> to vector<256x128xbf16>
    %cst_87 = arith.constant dense<0.000000e+00> : vector<16x128xf32>
    %269 = tpu.matmul %266, %268, %cst_87 {dimension_numbers = #tpu.dot_dimension_numbers<[1], [0], [0], [1], [0, 0, 1, 1], [], []>} : vector<16x256xbf16>, vector<256x128xbf16>, vector<16x128xf32> -> vector<16x128xf32>
    %c1_88 = arith.constant 1 : index
    %c0_89 = arith.constant 0 : index
    %270 = vector.load %arg9[%c1_88, %c0_89] : memref<2x128xf32, #tpu.memory_space<vmem>>, vector<1x128xf32>
    %271 = vector.shape_cast %270 : vector<1x128xf32> to vector<128xf32>
    %272 = vector.shape_cast %271 : vector<128xf32> to vector<1x128xf32>
    %273 = vector.broadcast %272 : vector<1x128xf32> to vector<16x128xf32>
    %274 = arith.addf %269, %273 : vector<16x128xf32>
    %275 = arith.addf %254, %274 : vector<16x128xf32>
    %c1_90 = arith.constant 1 : index
    %c0_91 = arith.constant 0 : index
    %276 = vector.load %arg12[%c1_90, %c0_91] : memref<2x128xf32, #tpu.memory_space<vmem>>, vector<1x128xf32>
    %277 = vector.shape_cast %276 : vector<1x128xf32> to vector<128xf32>
    %c1_92 = arith.constant 1 : index
    %c0_93 = arith.constant 0 : index
    %278 = vector.load %arg13[%c1_92, %c0_93] : memref<2x128xf32, #tpu.memory_space<vmem>>, vector<1x128xf32>
    %279 = vector.shape_cast %278 : vector<1x128xf32> to vector<128xf32>
    %cst_94 = arith.constant dense<0.000000e+00> : vector<16xf32>
    %280 = vector.multi_reduction <add>, %275, %cst_94 [1] : vector<16x128xf32> to vector<16xf32>
    %281 = vector.shape_cast %280 : vector<16xf32> to vector<16x1xf32>
    %cst_95 = arith.constant 1.280000e+02 : f32
    %282 = vector.broadcast %cst_95 : f32 to vector<16x1xf32>
    %283 = arith.divf %281, %282 : vector<16x1xf32>
    %284 = arith.mulf %275, %275 : vector<16x128xf32>
    %cst_96 = arith.constant dense<0.000000e+00> : vector<16xf32>
    %285 = vector.multi_reduction <add>, %284, %cst_96 [1] : vector<16x128xf32> to vector<16xf32>
    %286 = vector.shape_cast %285 : vector<16xf32> to vector<16x1xf32>
    %cst_97 = arith.constant 1.280000e+02 : f32
    %287 = vector.broadcast %cst_97 : f32 to vector<16x1xf32>
    %288 = arith.divf %286, %287 : vector<16x1xf32>
    %289 = arith.mulf %283, %283 : vector<16x1xf32>
    %290 = arith.subf %288, %289 : vector<16x1xf32>
    %cst_98 = arith.constant 0.000000e+00 : f32
    %291 = vector.broadcast %cst_98 : f32 to vector<16x1xf32>
    %292 = arith.maximumf %290, %291 : vector<16x1xf32>
    %293 = vector.broadcast %283 : vector<16x1xf32> to vector<16x128xf32>
    %294 = arith.subf %275, %293 : vector<16x128xf32>
    %cst_99 = arith.constant 9.99999974E-6 : f32
    %295 = vector.broadcast %cst_99 : f32 to vector<16x1xf32>
    %296 = arith.addf %292, %295 : vector<16x1xf32>
    %297 = math.rsqrt %296 : vector<16x1xf32>
    %298 = vector.broadcast %297 : vector<16x1xf32> to vector<16x128xf32>
    %299 = arith.mulf %294, %298 : vector<16x128xf32>
    %300 = vector.shape_cast %277 : vector<128xf32> to vector<1x128xf32>
    %301 = vector.broadcast %300 : vector<1x128xf32> to vector<16x128xf32>
    %302 = arith.mulf %299, %301 : vector<16x128xf32>
    %303 = vector.shape_cast %279 : vector<128xf32> to vector<1x128xf32>
    %304 = vector.broadcast %303 : vector<1x128xf32> to vector<16x128xf32>
    %305 = arith.addf %302, %304 : vector<16x128xf32>
    %306 = vector.shape_cast %305 : vector<16x128xf32> to vector<2x8x128xf32>
    %c0_100 = arith.constant 0 : index
    %c0_101 = arith.constant 0 : index
    %c0_102 = arith.constant 0 : index
    %307 = vector.load %arg14[%c0_100, %c0_101, %c0_102] : memref<1x1x128xf32, #tpu.memory_space<vmem>>, vector<1x1x128xf32>
    %308 = vector.broadcast %307 : vector<1x1x128xf32> to vector<2x8x128xf32>
    %309 = arith.mulf %306, %308 : vector<2x8x128xf32>
    %cst_103 = arith.constant dense<0.000000e+00> : vector<2x8xf32>
    %310 = vector.multi_reduction <add>, %309, %cst_103 [2] : vector<2x8x128xf32> to vector<2x8xf32>
    %311 = vector.shape_cast %310 : vector<2x8xf32> to vector<2x8x1xf32>
    %c0_104 = arith.constant 0 : index
    %c0_105 = arith.constant 0 : index
    %312 = vector.load %arg15[%c0_104, %c0_105] : memref<1x1xf32, #tpu.memory_space<vmem>>, vector<1x1xf32>
    %313 = vector.extract %312[0, 0] : f32 from vector<1x1xf32>
    %314 = vector.broadcast %313 : f32 to vector<2x8x1xf32>
    %315 = arith.addf %311, %314 : vector<2x8x1xf32>
    %cst_106 = arith.constant dense<0xFF800000> : vector<2x1xf32>
    %316 = vector.multi_reduction <maximumf>, %315, %cst_106 [1] : vector<2x8x1xf32> to vector<2x1xf32>
    %317 = vector.shape_cast %316 : vector<2x1xf32> to vector<2x1x1xf32>
    %318 = vector.broadcast %317 : vector<2x1x1xf32> to vector<2x8x1xf32>
    %319 = arith.subf %315, %318 : vector<2x8x1xf32>
    %320 = math.exp %319 : vector<2x8x1xf32>
    %cst_107 = arith.constant dense<0.000000e+00> : vector<2x1xf32>
    %321 = vector.multi_reduction <add>, %320, %cst_107 [1] : vector<2x8x1xf32> to vector<2x1xf32>
    %322 = vector.shape_cast %321 : vector<2x1xf32> to vector<2x1x1xf32>
    %323 = tpu.reciprocal %322 {approx = true} : vector<2x1x1xf32> -> vector<2x1x1xf32>
    %324 = vector.broadcast %323 : vector<2x1x1xf32> to vector<2x8x1xf32>
    %325 = arith.mulf %320, %324 : vector<2x8x1xf32>
    %326 = vector.broadcast %325 : vector<2x8x1xf32> to vector<2x8x128xf32>
    %327 = arith.mulf %306, %326 : vector<2x8x128xf32>
    %cst_108 = arith.constant dense<0.000000e+00> : vector<2x128xf32>
    %328 = vector.multi_reduction <add>, %327, %cst_108 [1] : vector<2x8x128xf32> to vector<2x128xf32>
    %c0_109 = arith.constant 0 : index
    %c0_110 = arith.constant 0 : index
    %329 = vector.load %arg16[%c0_109, %c0_110] : memref<2x128xf32, #tpu.memory_space<vmem>>, vector<2x128xf32>
    tpu.vector_store %arg16[%c0_109, %c0_110], %328 {strides = array<i32>} : memref<2x128xf32, #tpu.memory_space<vmem>>, vector<2x128xf32>,
    return
  }
  func.func @transform_0(%arg0: i32) -> (i32, i32, i32) {
    %c0_i32 = arith.constant 0 : i32
    %c0_i32_0 = arith.constant 0 : i32
    %c0_i32_1 = arith.constant 0 : i32
    return %arg0, %c0_i32, %c0_i32_0 : i32, i32, i32
  }
  func.func @transform_1(%arg0: i32) -> (i32, i32, i32) {
    %c0_i32 = arith.constant 0 : i32
    %c0_i32_0 = arith.constant 0 : i32
    %c0_i32_1 = arith.constant 0 : i32
    %c0_i32_2 = arith.constant 0 : i32
    return %c0_i32, %c0_i32_0, %c0_i32_1 : i32, i32, i32
  }
  func.func @transform_2(%arg0: i32) -> (i32, i32) {
    %c0_i32 = arith.constant 0 : i32
    %c0_i32_0 = arith.constant 0 : i32
    %c0_i32_1 = arith.constant 0 : i32
    return %c0_i32, %c0_i32_0 : i32, i32
  }
  func.func @transform_3(%arg0: i32) -> (i32, i32, i32) {
    %c0_i32 = arith.constant 0 : i32
    %c0_i32_0 = arith.constant 0 : i32
    %c0_i32_1 = arith.constant 0 : i32
    %c0_i32_2 = arith.constant 0 : i32
    return %c0_i32, %c0_i32_0, %c0_i32_1 : i32, i32, i32
  }
  func.func @transform_4(%arg0: i32) -> (i32, i32) {
    %c0_i32 = arith.constant 0 : i32
    %c0_i32_0 = arith.constant 0 : i32
    %c0_i32_1 = arith.constant 0 : i32
    return %c0_i32, %c0_i32_0 : i32, i32
  }
  func.func @transform_5(%arg0: i32) -> (i32, i32, i32) {
    %c0_i32 = arith.constant 0 : i32
    %c0_i32_0 = arith.constant 0 : i32
    %c0_i32_1 = arith.constant 0 : i32
    %c0_i32_2 = arith.constant 0 : i32
    return %c0_i32, %c0_i32_0, %c0_i32_1 : i32, i32, i32
  }
  func.func @transform_6(%arg0: i32) -> (i32, i32) {
    %c0_i32 = arith.constant 0 : i32
    %c0_i32_0 = arith.constant 0 : i32
    %c0_i32_1 = arith.constant 0 : i32
    return %c0_i32, %c0_i32_0 : i32, i32
  }
  func.func @transform_7(%arg0: i32) -> (i32, i32, i32) {
    %c0_i32 = arith.constant 0 : i32
    %c0_i32_0 = arith.constant 0 : i32
    %c0_i32_1 = arith.constant 0 : i32
    %c0_i32_2 = arith.constant 0 : i32
    return %c0_i32, %c0_i32_0, %c0_i32_1 : i32, i32, i32
  }
  func.func @transform_8(%arg0: i32) -> (i32, i32) {
    %c0_i32 = arith.constant 0 : i32
    %c0_i32_0 = arith.constant 0 : i32
    %c0_i32_1 = arith.constant 0 : i32
    return %c0_i32, %c0_i32_0 : i32, i32
  }
  func.func @transform_9(%arg0: i32) -> (i32, i32) {
    %c0_i32 = arith.constant 0 : i32
    %c0_i32_0 = arith.constant 0 : i32
    %c0_i32_1 = arith.constant 0 : i32
    return %c0_i32, %c0_i32_0 : i32, i32
  }
  func.func @transform_10(%arg0: i32) -> (i32, i32) {
    %c0_i32 = arith.constant 0 : i32
    %c0_i32_0 = arith.constant 0 : i32
    %c0_i32_1 = arith.constant 0 : i32
    return %c0_i32, %c0_i32_0 : i32, i32
  }
  func.func @transform_11(%arg0: i32) -> (i32, i32) {
    %c0_i32 = arith.constant 0 : i32
    %c0_i32_0 = arith.constant 0 : i32
    %c0_i32_1 = arith.constant 0 : i32
    return %c0_i32, %c0_i32_0 : i32, i32
  }
  func.func @transform_12(%arg0: i32) -> (i32, i32) {
    %c0_i32 = arith.constant 0 : i32
    %c0_i32_0 = arith.constant 0 : i32
    %c0_i32_1 = arith.constant 0 : i32
    return %c0_i32, %c0_i32_0 : i32, i32
  }
  func.func @transform_13(%arg0: i32) -> (i32, i32, i32) {
    %c0_i32 = arith.constant 0 : i32
    %c0_i32_0 = arith.constant 0 : i32
    %c0_i32_1 = arith.constant 0 : i32
    %c0_i32_2 = arith.constant 0 : i32
    return %c0_i32, %c0_i32_0, %c0_i32_1 : i32, i32, i32
  }
  func.func @transform_14(%arg0: i32) -> (i32, i32) {
    %c0_i32 = arith.constant 0 : i32
    %c0_i32_0 = arith.constant 0 : i32
    %c0_i32_1 = arith.constant 0 : i32
    return %c0_i32, %c0_i32_0 : i32, i32
  }
  func.func @transform_15(%arg0: i32) -> (i32, i32) {
    %c0_i32 = arith.constant 0 : i32
    %c0_i32_0 = arith.constant 0 : i32
    return %arg0, %c0_i32 : i32, i32
  }
}

</mosaic_0001>

<bundles_post_ra>
// kernel: transformer_attention_block.1
= control target key start
LH: loop header
LB: loop body
LE: loop exit
PB: predicated region body
PF: predicated region fallthrough
CT: control target
= control target key end

     0   :  { %s4254_s0 = inlined_call_operand.hbm [shape: f32[2,8,128], index: 0, kind: input, shape index: {}]   ;;  %s4255_s1 = inlined_call_operand.hbm [shape: bf16[2,128,384], index: 1, kind: input, shape index: {}]   ;;  %s4256_s2 = inlined_call_operand.vmem [shape: f32[2,384], index: 2, kind: input, shape index: {}]   ;;  %s4257_s3 = inlined_call_operand.hbm [shape: bf16[2,128,128], index: 3, kind: input, shape index: {}]   ;;  %s4258_s4 = inlined_call_operand.hbm [shape: f32[2,128], index: 4, kind: input, shape index: {}]   ;;  %s4259_s5 = inlined_call_operand.hbm [shape: bf16[2,128,256], index: 5, kind: input, shape index: {}]   ;;  %s4260_s6 = inlined_call_operand.hbm [shape: f32[2,256], index: 6, kind: input, shape index: {}]   ;;  %s4261_s7 = inlined_call_operand.hbm [shape: bf16[2,256,128], index: 7, kind: input, shape index: {}]   ;;  %s4262_s8 = inlined_call_operand.hbm [shape: f32[2,128], index: 8, kind: input, shape index: {}]   ;;  %s4263_s9 = inlined_call_operand.vmem [shape: f32[2,128], index: 9, kind: input, shape index: {}]   ;;  %s4264_s10 = inlined_call_operand.hbm [shape: f32[2,128], index: 10, kind: input, shape index: {}]   ;;  %s4265_s11 = inlined_call_operand.vmem [shape: f32[2,128], index: 11, kind: input, shape index: {}]   ;;  %s4266_s12 = inlined_call_operand.hbm [shape: f32[2,128], index: 12, kind: input, shape index: {}]   ;;  %s4267_s13 = inlined_call_operand.hbm [shape: f32[1,1,128], index: 13, kind: input, shape index: {}]   ;;  %s4268_s14 = inlined_call_operand.<no memory space> [shape: f32[1,1], index: 14, kind: input, shape index: {}]   ;;  %s4269_s15 = inlined_call_operand.hbm [shape: f32[2,128], index: 15, kind: output, shape index: {}]  }
   0x1   :  { %v20_v0 = vstv %s4268_s14 }
   0x2   :  { %21 = vst [vmem:[#allocation2] sm:$0x1] %v20_v0 }
   0x3   :  { %22 = vsyncpa [#allocation4], 0 }
   0x4   :  { %23 = vsyncpa [#allocation7], 0 }
   0x5   :  { %24 = vsyncpa [#allocation10], 0 }
   0x6   :  { %25 = vsyncpa [#allocation13], 0 }
   0x7   :  { %26 = vsyncpa [#allocation16], 0 }
   0x8   :  { %27 = vsyncpa [#allocation19], 0  ;;  %s46_s22 = sshll.u32 %s4255_s1, 4  ;;  %s47_s22 = int_to_ptr.hbm [resolvable:$true] %s46_s22 }
   0x9   :  { %28 = vsyncpa [#allocation5], 0  ;;  %s3809_s23 = smov [#allocation6]   ;;  %s75_s14 = sshll.u32 %s4258_s4, 4  ;;  %s76_s14 = int_to_ptr.hbm [resolvable:$true] %s75_s14 }
   0xa   :  { %s48_s24 = sshll.u32 %s3809_s23, 4  ;;  %s3810_s27 = smov 192   ;;  %s49_s24 = int_to_ptr.vmem [resolvable:$true] %s48_s24 }
   0xb   :  { %s3811_s28 = smov 12   ;;  %s3812_s29 = smov [#allocation9]  }
   0xc   :  { %54 = dma.hbm_to_vmem [thread:$0]  %s47_s22, 6144, %s49_s24, [#allocation7], %s3810_s27, %s3810_s27, %s3811_s28  }
   0xd   :  { %s77_s30 = sshll.u32 %s3812_s29, 4  ;;  %s99_s18 = sshll.u32 %s4260_s6, 4  ;;  %s78_s30 = int_to_ptr.vmem [resolvable:$true] %s77_s30  ;;  %s100_s18 = int_to_ptr.hbm [resolvable:$true] %s99_s18 }
   0xe   :  { %80 = dma.hbm_to_vmem [thread:$0]  %s76_s14, 32, %s78_s30, [#allocation10]  }
   0xf   :  { %s123_s20 = sshll.u32 %s4262_s8, 4  ;;  %s3813_s21 = smov [#allocation12]   ;;  %s124_s20 = int_to_ptr.hbm [resolvable:$true] %s123_s20 }
  0x10   :  { %s101_s23 = sshll.u32 %s3813_s21, 4  ;;  %s3814_s4 = smov [#allocation15]   ;;  %s102_s23 = int_to_ptr.vmem [resolvable:$true] %s101_s23 }
  0x11   :  { %104 = dma.hbm_to_vmem [thread:$0]  %s100_s18, 64, %s102_s23, [#allocation13]  }
  0x12   :  { %s125_s22 = sshll.u32 %s3814_s4, 4  ;;  %s149_s26 = sshll.u32 %s4266_s12, 4  ;;  %s126_s22 = int_to_ptr.vmem [resolvable:$true] %s125_s22  ;;  %s150_s26 = int_to_ptr.hbm [resolvable:$true] %s149_s26 }
  0x13   :  { %128 = dma.hbm_to_vmem [thread:$0]  %s124_s20, 32, %s126_s22, [#allocation16]  }
  0x14   :  { %s33_s27 = sshll.u32 %s4254_s0, 4  ;;  %s3815_s28 = smov [#allocation18]   ;;  %s34_s27 = int_to_ptr.hbm [resolvable:$true] %s33_s27 }
  0x15   :  { %s151_s8 = sshll.u32 %s3815_s28, 4  ;;  %s3816_s29 = smov [#allocation3]   ;;  %s152_s8 = int_to_ptr.vmem [resolvable:$true] %s151_s8 }
  0x16   :  { %154 = dma.hbm_to_vmem [thread:$0]  %s150_s26, 32, %s152_s8, [#allocation19]  }
  0x17   :  { %s35_s30 = sshll.u32 %s3816_s29, 4  ;;  %s3817_s16 = smov 128   ;;  %s36_s30 = int_to_ptr.vmem [resolvable:$true] %s35_s30 }
  0x18   :  { %s3818_s17 = smov 8   ;;  %s61_s1 = sshll.u32 %s4257_s3, 4  ;;  %s62_s1 = int_to_ptr.hbm [resolvable:$true] %s61_s1 }
  0x19   :  { %41 = dma.hbm_to_vmem [thread:$0]  %s34_s27, 256, %s36_s30, [#allocation4], %s3817_s16, %s3817_s16, %s3818_s17  }
  0x1a   :  { %s3819_s19 = smov [#allocation8]   ;;  %s85_s23 = sshll.u32 %s4259_s5, 4  ;;  %s86_s23 = int_to_ptr.hbm [resolvable:$true] %s85_s23 }
  0x1b   :  { %s63_s20 = sshll.u32 %s3819_s19, 4  ;;  %s3820_s4 = smov 64   ;;  %s64_s20 = int_to_ptr.vmem [resolvable:$true] %s63_s20 }
  0x1c   :  { %s3821_s22 = smov 4   ;;  %s3822_s24 = smov [#allocation11]  }
  0x1d   :  { %69 = dma.hbm_to_vmem [thread:$0]  %s62_s1, 2048, %s64_s20, [#allocation7], %s3820_s4, %s3820_s4, %s3821_s22  }
  0x1e   :  { %s87_s25 = sshll.u32 %s3822_s24, 4  ;;  %s109_s3 = sshll.u32 %s4261_s7, 4  ;;  %s88_s25 = int_to_ptr.vmem [resolvable:$true] %s87_s25  ;;  %s110_s3 = int_to_ptr.hbm [resolvable:$true] %s109_s3 }
  0x1f   :  { %93 = dma.hbm_to_vmem [thread:$0]  %s86_s23, 4096, %s88_s25, [#allocation10], %s3817_s16, %s3817_s16, %s3818_s17  }
  0x20   :  { %s136_s28 = sshll.u32 %s4264_s10, 4  ;;  %s3823_s5 = smov [#allocation14]   ;;  %s137_s28 = int_to_ptr.hbm [resolvable:$true] %s136_s28 }
  0x21   :  { %s111_s8 = sshll.u32 %s3823_s5, 4  ;;  %s3824_s29 = smov [#allocation17]   ;;  %s112_s8 = int_to_ptr.vmem [resolvable:$true] %s111_s8 }
  0x22   :  { %117 = dma.hbm_to_vmem [thread:$0]  %s110_s3, 4096, %s112_s8, [#allocation13], %s3820_s4, %s3820_s4, %s3821_s22  }
  0x23   :  { %s138_s30 = sshll.u32 %s3824_s29, 4  ;;  %s160_s7 = sshll.u32 %s4267_s13, 4  ;;  %s139_s30 = int_to_ptr.vmem [resolvable:$true] %s138_s30  ;;  %s161_s7 = int_to_ptr.hbm [resolvable:$true] %s160_s7 }
  0x24   :  { %141 = dma.hbm_to_vmem [thread:$0]  %s137_s28, 32, %s139_s30, [#allocation16]  }
  0x25   :  { %s3825_s16 = smov [#allocation20]  }
  0x26   :  { %s162_s17 = sshll.u32 %s3825_s16, 4  ;;  %s163_s17 = int_to_ptr.vmem [resolvable:$true] %s162_s17 }
  0x27   :  { %165 = dma.hbm_to_vmem [thread:$0]  %s161_s7, 16, %s163_s17, [#allocation19]  }
  0x28   :  { %3795 = dma.done.wait [#allocation4], 256  }
  0x29   :  { %3796 = vsyncadd [#allocation4], 4294967040 }
  0x2a   :  { %3797 = dma.done.wait [#allocation7], 8192  }
  0x2b   :  { %3798 = vsyncadd [#allocation7], 4294959104 }
  0x2c   :  { %3799 = dma.done.wait [#allocation10], 4128  }
  0x2d   :  { %3800 = vsyncadd [#allocation10], 4294963168 }
  0x2e   :  { %3801 = dma.done.wait [#allocation13], 4160  }
  0x2f   :  { %3802 = vsyncadd [#allocation13], 4294963136 }
  0x30   :  { %3803 = dma.done.wait [#allocation16], 64  }
  0x31   :  { %3804 = vsyncadd [#allocation16], 4294967232 }
  0x32   :  { %3805 = dma.done.wait [#allocation19], 48  }
  0x33   :  { %3806 = vsyncadd [#allocation19], 4294967248  ;;  %v2764_v1 = vld [vmem:[#allocation6 + $0xa8] sm:$0xf]  ;;  %v3245_v2 = vld [vmem:[#allocation6 + $0xb0] sm:$0xf0] }
  0x34   :  { %v3244_v3 = vld [vmem:[#allocation6 + $0xac] sm:$0xf]  ;;  %v2765_v4 = vor.u32 %v3245_v2, %v2764_v1  ;;  %v2766_v5 = vld [vmem:[#allocation6 + $0xb4] sm:$0xf0]  ;;  %v2752_v6 = vld [vmem:[#allocation6 + $0x90] sm:$0xf] }
  0x35   :  { %v3242_v7 = vld [vmem:[#allocation6 + $0x98] sm:$0xf0]  ;;  %v2769_v8 = vor.u32 %v3244_v3, %v2766_v5  ;;  %v3241_v9 = vld [vmem:[#allocation6 + $0x94] sm:$0xf]  ;;  %v2754_v10 = vld [vmem:[#allocation6 + $0x9c] sm:$0xf0] }
  0x36   :  { %384 = vmatpush.bf16.msra.mxu0 %v2765_v4  ;;  %v2753_v11 = vor.u32 %v3242_v7, %v2752_v6  ;;  %v2757_v12 = vor.u32 %v3241_v9, %v2754_v10  ;;  %v2740_v13 = vld [vmem:[#allocation6 + $0x78] sm:$0xf]  ;;  %v3239_v14 = vld [vmem:[#allocation6 + $0x80] sm:$0xf0]  ;;  %v3238_v15 = vld [vmem:[#allocation6 + $0x7c] sm:$0xf] }
  0x37   :  { %398 = vmatpush.bf16.msra.mxu1 %v2769_v8  ;;  %v2742_v16 = vld [vmem:[#allocation6 + $0x84] sm:$0xf0]  ;;  %v2741_v17 = vor.u32 %v3239_v14, %v2740_v13  ;;  %v2728_v19 = vld [vmem:[#allocation6 + $0x60] sm:$0xf]  ;;  %v3236_v20 = vld [vmem:[#allocation6 + $0x68] sm:$0xf0] }
  0x38   :  { %v2745_v18 = vor.u32 %v3238_v15, %v2742_v16  ;;  %v3235_v21 = vld [vmem:[#allocation6 + $0x64] sm:$0xf]  ;;  %v2730_v22 = vld [vmem:[#allocation6 + $0x6c] sm:$0xf0]  ;;  %v2716_v23 = vld [vmem:[#allocation6 + $0x48] sm:$0xf]  ;;  %v2729_v24 = vor.u32 %v3236_v20, %v2728_v19 }
  0x39   :  { %v3233_v25 = vld [vmem:[#allocation6 + $0x50] sm:$0xf0]  ;;  %v3232_v26 = vld [vmem:[#allocation6 + $0x4c] sm:$0xf]  ;;  %v2733_v27 = vor.u32 %v3235_v21, %v2730_v22  ;;  %v2718_v28 = vld [vmem:[#allocation6 + $0x54] sm:$0xf0] }
  0x3a   :  { %385 = vmatpush.bf16.msra.mxu0 %v2753_v11  ;;  %v2717_v29 = vor.u32 %v3233_v25, %v2716_v23  ;;  %v2721_v30 = vor.u32 %v3232_v26, %v2718_v28  ;;  %v2704_v31 = vld [vmem:[#allocation6 + $0x30] sm:$0xf]  ;;  %v3230_v32 = vld [vmem:[#allocation6 + $0x38] sm:$0xf0]  ;;  %v3229_v33 = vld [vmem:[#allocation6 + $0x34] sm:$0xf] }
  0x3b   :  { %399 = vmatpush.bf16.msra.mxu1 %v2757_v12  ;;  %v2706_v34 = vld [vmem:[#allocation6 + $0x3c] sm:$0xf0]  ;;  %v2705_v35 = vor.u32 %v3230_v32, %v2704_v31  ;;  %v2692_v37 = vld [vmem:[#allocation6 + $0x18] sm:$0xf]  ;;  %v3227_v38 = vld [vmem:[#allocation6 + $0x20] sm:$0xf0] }
  0x3c   :  { %v2709_v36 = vor.u32 %v3229_v33, %v2706_v34  ;;  %v3226_v39 = vld [vmem:[#allocation6 + $0x1c] sm:$0xf]  ;;  %v2694_v40 = vld [vmem:[#allocation6 + $0x24] sm:$0xf0]  ;;  %v2693_v41 = vor.u32 %v3227_v38, %v2692_v37  ;;  %v2680_v43 = vld [vmem:[#allocation6] sm:$0xf] }
  0x3d   :  { %v2697_v42 = vor.u32 %v3226_v39, %v2694_v40  ;;  %v3224_v44 = vld [vmem:[#allocation6 + $0x8] sm:$0xf0]  ;;  %v3223_v45 = vld [vmem:[#allocation6 + $0x4] sm:$0xf]  ;;  %v2682_v46 = vld [vmem:[#allocation6 + $0xc] sm:$0xf0] }
  0x3e   :  { %386 = vmatpush.bf16.msra.mxu0 %v2741_v17  ;;  %v2681_v47 = vor.u32 %v3224_v44, %v2680_v43  ;;  %v3950_v48 = vld [vmem:[#allocation3] sm:$0xff]  ;;  %v3952_v49 = vld [vmem:[#allocation3 + $0x8] sm:$0xff]  ;;  %v2685_v50 = vor.u32 %v3223_v45, %v2682_v46  ;;  %v3243_v62 = vld [vmem:[#allocation6 + $0xa0] sm:$0xf0]  ;;  %vm466_vm0 = vcmask 261120   ;;  %s3826_s1 = smov 32  }
  0x3f   :  { %400 = vmatpush.bf16.msra.mxu1 %v2745_v18  ;;  %v3956_v51 = vpack.c.bf16 %v3952_v49, %v3950_v48  ;;  %v3963_v52 = vld [vmem:[%s4256_s2] ss:$2 sm:$0x7]  ;;  %v3246_v57 = vld [vmem:[#allocation6 + $0xb8] sm:$0xf0]  ;;  %s3827_s19 = smov 96  }
  0x40   :  { %v250_v53 = vperm.slane %v3963_v52, 0  ;;  %v251_v54 = vperm.slane %v3963_v52, 1  ;;  %v2772_v56 = vld [vmem:[#allocation6 + $0xb0] sm:$0xf]  ;;  %v2760_v58 = vld [vmem:[#allocation6 + $0x98] sm:$0xf] }
  0x41   :  { %v2773_v61 = vor.u32 %v3246_v57, %v2772_v56  ;;  %v2761_v0 = vor.u32 %v3243_v62, %v2760_v58  ;;  %v2748_v2 = vld [vmem:[#allocation6 + $0x80] sm:$0xf]  ;;  %v3240_v3 = vld [vmem:[#allocation6 + $0x88] sm:$0xf0]  ;;  %v2736_v8 = vld [vmem:[#allocation6 + $0x68] sm:$0xf] }
  0x42   :  { %387 = vmatpush.bf16.msra.mxu0 %v2729_v24  ;;  %v2749_v5 = vor.u32 %v3240_v3, %v2748_v2  ;;  %v3237_v9 = vld [vmem:[#allocation6 + $0x70] sm:$0xf0]  ;;  %v2724_v17 = vld [vmem:[#allocation6 + $0x50] sm:$0xf]  ;;  %v3234_v18 = vld [vmem:[#allocation6 + $0x58] sm:$0xf0] }
  0x43   :  { %401 = vmatpush.bf16.msra.mxu1 %v2733_v27  ;;  %412 = vmatpush.bf16.msra.mxu2 %v2773_v61  ;;  %v2737_v13 = vor.u32 %v3237_v9, %v2736_v8  ;;  %v2725_v19 = vor.u32 %v3234_v18, %v2724_v17  ;;  %v2712_v20 = vld [vmem:[#allocation6 + $0x38] sm:$0xf]  ;;  %v3231_v21 = vld [vmem:[#allocation6 + $0x40] sm:$0xf0]  ;;  %v2700_v23 = vld [vmem:[#allocation6 + $0x20] sm:$0xf] }
  0x44   :  { %v2713_v22 = vor.u32 %v3231_v21, %v2712_v20  ;;  %v3228_v24 = vld [vmem:[#allocation6 + $0x28] sm:$0xf0]  ;;  %v2688_v26 = vld [vmem:[#allocation6 + $0x8] sm:$0xf]  ;;  %v3225_v27 = vld [vmem:[#allocation6 + $0x10] sm:$0xf0] }
  0x45   :  { %v2701_v25 = vor.u32 %v3228_v24, %v2700_v23  ;;  %v2689_v28 = vor.u32 %v3225_v27, %v2688_v26  ;;  %vm627_vm1 = vcmask 64512   ;;  %v252_v58 = vperm.slane %v3963_v52, 2  ;;  %s3829_s26 = smov [#allocation21]   ;;  %s2663_s27 = sshll.u32 %s4269_s15, 4  ;;  %s2664_s27 = int_to_ptr.hbm [resolvable:$true] %s2663_s27 }
  0x46   :  { %388 = vmatpush.bf16.msra.mxu0 %v2717_v29  ;;  %vm727_vm2 = vcmask 1043456   ;;  %vm903_vm3 = vcmask 523264   ;;  %vm906_vm4 = vcmask 785408   ;;  %s2661_s6 = sshll.u32 %s3829_s26, 4  ;;  %s2662_s6 = int_to_ptr.vmem [resolvable:$true] %s2661_s6 }
  0x47   :  { %402 = vmatpush.bf16.msra.mxu1 %v2721_v30  ;;  %413 = vmatpush.bf16.msra.mxu2 %v2761_v0 }
  0x4a   :  { %389 = vmatpush.bf16.msra.mxu0 %v2705_v35 }
  0x4b   :  { %403 = vmatpush.bf16.msra.mxu1 %v2709_v36  ;;  %414 = vmatpush.bf16.msra.mxu2 %v2749_v5 }
  0x4e   :  { %390 = vmatpush.bf16.msra.mxu0 %v2693_v41 }
  0x4f   :  { %404 = vmatpush.bf16.msra.mxu1 %v2697_v42  ;;  %415 = vmatpush.bf16.msra.mxu2 %v2737_v13 }
  0x52   :  { %391 = vmatpush.bf16.msra.mxu0 %v2681_v47 }
  0x53   :  { %405 = vmatpush.bf16.msra.mxu1 %v2685_v50  ;;  %416 = vmatpush.bf16.msra.mxu2 %v2725_v19 }
  0x55   :  { %392 = vmatmul.bf16.vlgmr.msra.gmra.mxu0 %v3956_v51 }
  0x56   :  { %406 = vmatmul.bf16.vlgmr.msra.gmra.mxu1 %v3956_v51 }
  0x57   :  { %417 = vmatpush.bf16.msra.mxu2 %v2713_v22 }
  0x5b   :  { %418 = vmatpush.bf16.msra.mxu2 %v2701_v25 }
  0x5f   :  { %419 = vmatpush.bf16.msra.mxu2 %v2689_v28 }
  0x62   :  { %420 = vmatmul.bf16.vlgmr.msra.gmra.mxu2 %v3956_v51 }
  0xd2   :  { %v393_v55 = vpop.f32.mrf.mxu0 }
  0xd3   :  { %v394_v59 = vadd.f32 %v393_v55, %v250_v53  ;;  %v407_v60 = vpop.f32.mrf.mxu1 }
  0xd4   :  { %v408_v63 = vadd.f32 %v407_v60, %v251_v54 }
  0xd6   :  { %v426_v1 = vpack.c.bf16 %v408_v63, %v394_v59 }
  0xd8   :  { %440 = vrot.lane.b32.xlu2 %v426_v1, %s3826_s1  ;;  %436 = vrot.lane.b32.xlu0 %v426_v1, %s3820_s4  ;;  %v444_v4 = vrot.slane %v426_v1, 4 }
  0xda   :  { %v395_v6 = vpop.f32.mrf.mxu0  ;;  %v471_v7 = vsel %vm466_vm0, %v444_v4, 0 }
  0xdb   :  { %v396_v10 = vadd.f32 %v395_v6, %v250_v53  ;;  %v409_v11 = vpop.f32.mrf.mxu1  ;;  %480 = vmatpush.bf16.xpose.msra.mxu3 %v471_v7 }
  0xdc   :  { %v410_v12 = vadd.f32 %v409_v11, %v251_v54 }
  0xde   :  { %v428_v14 = vpack.c.bf16 %v410_v12, %v396_v10 }
  0xe0   :  { %434 = vrot.lane.b32.xlu1 %v428_v14, %s3827_s19  ;;  %442 = vrot.lane.b32.xlu2 %v428_v14, %s3826_s1  ;;  %v445_v15 = vrot.slane %v428_v14, 4 }
  0xe1   :  { %432 = vrot.lane.b32.xlu0 %v426_v1, %s3827_s19 }
  0xe2   :  { %2774 = vmatmul.msk.bf16.vlgmr.msra.gmra.mxu3 %vm466_vm0, %v426_v1  ;;  %v490_v16 = vsel %vm466_vm0, %v445_v15, 0 }
  0xe3   :  { %499 = vmatpush.bf16.xpose.msrb.mxu3 %v490_v16 }
  0xe5   :  { %v421_v59 = vpop.f32.mrf.mxu2 }
  0xe6   :  { %v422_v60 = vadd.f32 %v421_v59, %v252_v58 }
  0xe8   :  { %438 = vrot.lane.b32.xlu1 %v428_v14, %s3820_s4  ;;  %v3993_v61 = vpack.c.bf16 %v422_v60, %v422_v60 }
  0xea   :  { %v729_v62 = vsel %vm727_vm2, %v3993_v61, 0 }
  0xeb   :  { %738 = vmatpush.bf16.msrb.mxu1 %v729_v62 }
  0xed   :  { %v423_v63 = vpop.f32.mrf.mxu2 }
  0xee   :  { %v424_v0 = vadd.f32 %v423_v63, %v252_v58 }
  0xf0   :  { %v3997_v1 = vpack.c.bf16 %v424_v0, %v424_v0 }
  0xf2   :  { %2775 = vmatmul.msk.bf16.vlgmr.msrb.gmra.mxu3 %vm466_vm0, %v428_v14  ;;  %v748_v2 = vsel %vm727_vm2, %v3997_v1, 0 }
 0x132   :  { %v441_v29 = vpop.permute.xlu2 %440 }
 0x133   :  { %v450_v36 = vrot.slane %v441_v29, 4 }
 0x135   :  { %v585_v43 = vsel %vm466_vm0, %v450_v36, 0 }
 0x13a   :  { %v443_v33 = vpop.permute.xlu2 %442 }
 0x13b   :  { %v451_v34 = vrot.slane %v443_v33, 4 }
 0x13d   :  { %v604_v42 = vsel %vm466_vm0, %v451_v34, 0 }
 0x14a   :  { %v437_v30 = vpop.permute.xlu0 %436 }
 0x14b   :  { %v448_v31 = vrot.slane %v437_v30, 4 }
 0x14d   :  { %v547_v32 = vsel %vm466_vm0, %v448_v31, 0 }
 0x14e   :  { %556 = vmatpush.bf16.xpose.msrb.mxu2 %v547_v32 }
 0x152   :  { %v435_v35 = vpop.permute.xlu1 %434 }
 0x153   :  { %v447_v37 = vrot.slane %v435_v35, 4  ;;  %v433_v38 = vpop.permute.xlu0 %432 }
 0x154   :  { %v446_v39 = vrot.slane %v433_v38, 4 }
 0x155   :  { %2778 = vmatmul.msk.bf16.vlgmr.msrb.gmra.mxu2 %vm466_vm0, %v437_v30  ;;  %v528_v40 = vsel %vm466_vm0, %v447_v37, 0 }
 0x156   :  { %v509_v41 = vsel %vm466_vm0, %v446_v39, 0  ;;  %537 = vmatpush.bf16.xpose.msrb.mxu0 %v528_v40 }
 0x157   :  { %518 = vmatpush.bf16.xpose.msra.mxu3 %v509_v41 }
 0x15a   :  { %v439_v44 = vpop.permute.xlu1 %438 }
 0x15b   :  { %v449_v45 = vrot.slane %v439_v44, 4 }
 0x15d   :  { %2777 = vmatmul.msk.bf16.vlgmr.msrb.gmra.mxu0 %vm466_vm0, %v435_v35  ;;  %v566_v46 = vsel %vm466_vm0, %v449_v45, 0 }
 0x15e   :  { %613 = vmatpush.bf16.xpose.msra.mxu0 %v604_v42  ;;  %2776 = vmatmul.msk.bf16.vlgmr.msra.gmra.mxu3 %vm466_vm0, %v433_v38 }
 0x15f   :  { %594 = vmatpush.bf16.xpose.msrb.mxu3 %v585_v43  ;;  %575 = vmatpush.bf16.xpose.msra.mxu2 %v566_v46 }
 0x165   :  { %v482_v47 = vpop.f32.mrf.mxu3 }
 0x166   :  { %2779 = vmatmul.msk.bf16.vlgmr.msra.gmra.mxu2 %vm466_vm0, %v439_v44  ;;  %v619_v50 = vmul.f32 0.17677669, %v482_v47 }
 0x167   :  { %757 = vmatpush.bf16.msrb.mxu2 %v748_v2 }
 0x168   :  { %v628_v51 = vsel %vm627_vm1, %v619_v50, -inf }
 0x169   :  { %629 = vmax.xlane.f32.xlu2 %v628_v51 }
 0x16d   :  { %v484_v53 = vpop.f32.mrf.mxu3  ;;  %2781 = vmatmul.msk.bf16.vlgmr.msra.gmra.mxu0 %vm466_vm0, %v443_v33 }
 0x16e   :  { %2780 = vmatmul.msk.bf16.vlgmr.msrb.gmra.mxu3 %vm466_vm0, %v441_v29 }
 0x175   :  { %v501_v54 = vpop.f32.mrf.mxu3 }
 0x176   :  { %v620_v55 = vmul.f32 0.17677669, %v501_v54 }
 0x178   :  { %v631_v56 = vsel %vm627_vm1, %v620_v55, -inf }
 0x179   :  { %632 = vmax.xlane.f32.xlu0 %v631_v56 }
 0x17d   :  { %v503_v57 = vpop.f32.mrf.mxu3 }
 0x1d8   :  { %v558_v3 = vpop.f32.mrf.mxu2 }
 0x1d9   :  { %v623_v4 = vmul.f32 0.17677669, %v558_v3 }
 0x1da   :  { %v539_v52 = vpop.f32.mrf.mxu0 }
 0x1db   :  { %v640_v5 = vsel %vm627_vm1, %v623_v4, -inf  ;;  %v622_v8 = vmul.f32 0.17677669, %v539_v52 }
 0x1dc   :  { %641 = vmax.xlane.f32.xlu2 %v640_v5  ;;  %v630_v6 = vpop.xlane.xlu2 %629 }
 0x1dd   :  { %v652_v7 = vsub.f32 %v619_v50, %v630_v6  ;;  %v637_v14 = vsel %vm627_vm1, %v622_v8, -inf }
 0x1df   :  { %v660_v9 = vmul.f32 1.442695, %v652_v7 }
 0x1e0   :  { %v560_v10 = vpop.f32.mrf.mxu2 }
 0x1e1   :  { %3417 = vpow2.f32 %v660_v9  ;;  %v520_v11 = vpop.f32.mrf.mxu3 }
 0x1e2   :  { %v621_v12 = vmul.f32 0.17677669, %v520_v11  ;;  %v541_v13 = vpop.f32.mrf.mxu0 }
 0x1e4   :  { %638 = vmax.xlane.f32.xlu2 %v637_v14  ;;  %v634_v15 = vsel %vm627_vm1, %v621_v12, -inf }
 0x1e5   :  { %635 = vmax.xlane.f32.xlu1 %v634_v15 }
 0x1e7   :  { %v3418_v16 = vpop.eup %3417 }
 0x1e8   :  { %v676_v18 = vsel %vm627_vm1, %v3418_v16, 0.0 }
 0x1e9   :  { %v577_v17 = vpop.f32.mrf.mxu2  ;;  %v522_v19 = vpop.f32.mrf.mxu3  ;;  %677 = vadd.xlane.f32.xlu0 %v676_v18 }
 0x1ea   :  { %v615_v20 = vpop.f32.mrf.mxu0  ;;  %v624_v21 = vmul.f32 0.17677669, %v577_v17 }
 0x1eb   :  { %v626_v30 = vmul.f32 0.17677669, %v615_v20 }
 0x1ec   :  { %v633_v22 = vpop.xlane.xlu0 %632  ;;  %v643_v26 = vsel %vm627_vm1, %v624_v21, -inf }
 0x1ed   :  { %v653_v23 = vsub.f32 %v620_v55, %v633_v22  ;;  %v649_v32 = vsel %vm627_vm1, %v626_v30, -inf }
 0x1ef   :  { %v662_v24 = vmul.f32 1.442695, %v653_v23 }
 0x1f1   :  { %v579_v25 = vpop.f32.mrf.mxu2  ;;  %v596_v27 = vpop.f32.mrf.mxu3  ;;  %644 = vmax.xlane.f32.xlu0 %v643_v26  ;;  %3419 = vpow2.f32 %v662_v24 }
 0x1f2   :  { %v625_v28 = vmul.f32 0.17677669, %v596_v27  ;;  %v617_v29 = vpop.f32.mrf.mxu0 }
 0x1f4   :  { %v646_v31 = vsel %vm627_vm1, %v625_v28, -inf }
 0x1f5   :  { %647 = vmax.xlane.f32.xlu1 %v646_v31 }
 0x1f7   :  { %v3420_v33 = vpop.eup %3419 }
 0x1f8   :  { %v679_v35 = vsel %vm627_vm1, %v3420_v33, 0.0 }
 0x1f9   :  { %v598_v34 = vpop.f32.mrf.mxu3  ;;  %650 = vmax.xlane.f32.xlu0 %v649_v32 }
 0x1fc   :  { %454 = vrot.lane.b32.xlu2 %v3993_v61, %s3827_s19 }
 0x1fd   :  { %680 = vadd.xlane.f32.xlu1 %v679_v35 }
 0x20d   :  { %456 = vrot.lane.b32.xlu0 %v3997_v1, %s3827_s19 }
 0x24f   :  { %v642_v36 = vpop.xlane.xlu2 %641 }
 0x250   :  { %v656_v37 = vsub.f32 %v623_v4, %v642_v36 }
 0x252   :  { %v668_v38 = vmul.f32 1.442695, %v656_v37 }
 0x254   :  { %3421 = vpow2.f32 %v668_v38 }
 0x257   :  { %v639_v39 = vpop.xlane.xlu2 %638 }
 0x258   :  { %v655_v40 = vsub.f32 %v622_v8, %v639_v39  ;;  %v636_v41 = vpop.xlane.xlu1 %635 }
 0x259   :  { %v654_v42 = vsub.f32 %v621_v12, %v636_v41 }
 0x25a   :  { %v4013_v43 = vpop.eup %3421  ;;  %v666_v44 = vmul.f32 1.442695, %v655_v40 }
 0x25b   :  { %v664_v45 = vmul.f32 1.442695, %v654_v42  ;;  %v688_v46 = vsel %vm627_vm1, %v4013_v43, 0.0 }
 0x25c   :  { %3423 = vpow2.f32 %v666_v44  ;;  %v678_v47 = vpop.xlane.xlu0 %677  ;;  %689 = vadd.xlane.f32.xlu1 %v688_v46 }
 0x25d   :  { %3425 = vpow2.f32 %v664_v45 }
 0x25e   :  { %3427 = vrcp.f32 %v678_v47 }
 0x25f   :  { %v455_v50 = vpop.permute.xlu2 %454 }
 0x260   :  { %v767_v51 = vsel %vm727_vm2, %v455_v50, 0 }
 0x261   :  { %776 = vmatpush.bf16.msra.mxu3 %v767_v51 }
 0x262   :  { %v3424_v53 = vpop.eup %3423 }
 0x263   :  { %v3426_v54 = vpop.eup %3425  ;;  %v685_v55 = vsel %vm627_vm1, %v3424_v53, 0.0 }
 0x264   :  { %v3428_v56 = vpop.eup %3427  ;;  %v645_v57 = vpop.xlane.xlu0 %644  ;;  %v682_v58 = vsel %vm627_vm1, %v3426_v54, 0.0  ;;  %686 = vadd.xlane.f32.xlu1 %v685_v55 }
 0x265   :  { %v708_v59 = vmul.f32 %v3428_v56, %v3418_v16  ;;  %v657_v60 = vsub.f32 %v624_v21, %v645_v57  ;;  %683 = vadd.xlane.f32.xlu2 %v682_v58 }
 0x267   :  { %v670_v62 = vmul.f32 1.442695, %v657_v60  ;;  %v716_v63 = vpack.c.bf16 %v708_v59, %v708_v59 }
 0x268   :  { %v648_v0 = vpop.xlane.xlu1 %647 }
 0x269   :  { %3429 = vpow2.f32 %v670_v62  ;;  %v658_v2 = vsub.f32 %v625_v28, %v648_v0  ;;  %2782 = vmatmul.msk.bf16.vlgmr.msrb.gmra.mxu1 %vm627_vm1, %v716_v63 }
 0x26b   :  { %v672_v3 = vmul.f32 1.442695, %v658_v2 }
 0x26c   :  { %v651_v4 = vpop.xlane.xlu0 %650 }
 0x26d   :  { %v659_v52 = vsub.f32 %v626_v30, %v651_v4  ;;  %3431 = vpow2.f32 %v672_v3 }
 0x26f   :  { %v3430_v5 = vpop.eup %3429  ;;  %v674_v6 = vmul.f32 1.442695, %v659_v52 }
 0x270   :  { %v681_v7 = vpop.xlane.xlu1 %680  ;;  %v691_v8 = vsel %vm627_vm1, %v3430_v5, 0.0 }
 0x271   :  { %3433 = vpow2.f32 %v674_v6  ;;  %692 = vadd.xlane.f32.xlu1 %v691_v8  ;;  %v3253_v8 = vld [vmem:[#allocation8 + $0x30] sm:$0xff] }
 0x272   :  { %3435 = vrcp.f32 %v681_v7  ;;  %v3254_v7 = vld [vmem:[#allocation8 + $0x38] sm:$0xff] }
 0x273   :  { %v3432_v9 = vpop.eup %3431 }
 0x274   :  { %v694_v13 = vsel %vm627_vm1, %v3432_v9, 0.0 }
 0x277   :  { %v3434_v10 = vpop.eup %3433 }
 0x278   :  { %v3436_v11 = vpop.eup %3435  ;;  %v697_v12 = vsel %vm627_vm1, %v3434_v10, 0.0 }
 0x279   :  { %v709_v14 = vmul.f32 %v3436_v11, %v3420_v33  ;;  %698 = vadd.xlane.f32.xlu0 %v697_v12  ;;  %695 = vadd.xlane.f32.xlu1 %v694_v13  ;;  %v3250_v11 = vld [vmem:[#allocation8 + $0x18] sm:$0xff]  ;;  %v3249_v12 = vld [vmem:[#allocation8 + $0x10] sm:$0xff]  ;;  %v3248_v13 = vld [vmem:[#allocation8 + $0x8] sm:$0xff] }
 0x27b   :  { %v717_v15 = vpack.c.bf16 %v709_v14, %v709_v14  ;;  %v3247_v14 = vld [vmem:[#allocation8] sm:$0xff] }
 0x27d   :  { %2783 = vmatmul.msk.bf16.vlgmr.msrb.gmra.mxu2 %vm627_vm1, %v717_v15  ;;  %460 = vrot.lane.b32.xlu2 %v3997_v1, %s3820_s4 }
 0x27f   :  { %v457_v16 = vpop.permute.xlu0 %456 }
 0x280   :  { %v786_v17 = vsel %vm727_vm2, %v457_v16, 0 }
 0x281   :  { %795 = vmatpush.bf16.msrb.mxu0 %v786_v17 }
 0x285   :  { %458 = vrot.lane.b32.xlu2 %v3993_v61, %s3820_s4 }
 0x28d   :  { %464 = vrot.lane.b32.xlu2 %v3997_v1, %s3826_s1 }
 0x292   :  { %462 = vrot.lane.b32.xlu1 %v3993_v61, %s3826_s1 }
 0x2cf   :  { %v690_v18 = vpop.xlane.xlu1 %689 }
 0x2d7   :  { %v687_v19 = vpop.xlane.xlu1 %686 }
 0x2d8   :  { %v684_v20 = vpop.xlane.xlu2 %683  ;;  %3437 = vrcp.f32 %v687_v19 }
 0x2d9   :  { %3439 = vrcp.f32 %v684_v20 }
 0x2da   :  { %3441 = vrcp.f32 %v690_v18 }
 0x2de   :  { %v3438_v21 = vpop.eup %3437 }
 0x2df   :  { %v3440_v22 = vpop.eup %3439  ;;  %v711_v23 = vmul.f32 %v3438_v21, %v3424_v53 }
 0x2e0   :  { %v710_v24 = vmul.f32 %v3440_v22, %v3426_v54  ;;  %v461_v25 = vpop.permute.xlu2 %460  ;;  %v3442_v1 = vpop.eup %3441 }
 0x2e1   :  { %v719_v26 = vpack.c.bf16 %v711_v23, %v711_v23  ;;  %v824_v27 = vsel %vm727_vm2, %v461_v25, 0  ;;  %v712_v30 = vmul.f32 %v3442_v1, %v4013_v43 }
 0x2e2   :  { %v718_v28 = vpack.c.bf16 %v710_v24, %v710_v24  ;;  %833 = vmatpush.bf16.msra.mxu2 %v824_v27 }
 0x2e3   :  { %2785 = vmatmul.msk.bf16.vlgmr.msrb.gmra.mxu0 %vm627_vm1, %v719_v26  ;;  %v720_v34 = vpack.c.bf16 %v712_v30, %v712_v30  ;;  %v3404_v30 = vld [vmem:[#allocation9] ss:$0 sm:$0xff] }
 0x2e4   :  { %2784 = vmatmul.msk.bf16.vlgmr.msra.gmra.mxu3 %vm627_vm1, %v718_v28  ;;  %v693_v61 = vpop.xlane.xlu1 %692 }
 0x2e5   :  { %3443 = vrcp.f32 %v693_v61 }
 0x2e6   :  { %v4037_v29 = vpop.f32.mrf.mxu1 }
 0x2e8   :  { %v459_v31 = vpop.permute.xlu2 %458 }
 0x2e9   :  { %v805_v32 = vsel %vm727_vm2, %v459_v31, 0 }
 0x2ea   :  { %814 = vmatpush.bf16.msra.mxu1 %v805_v32 }
 0x2eb   :  { %v3444_v33 = vpop.eup %3443 }
 0x2ec   :  { %v713_v35 = vmul.f32 %v3444_v33, %v3430_v5  ;;  %v699_v36 = vpop.xlane.xlu0 %698  ;;  %v696_v44 = vpop.xlane.xlu1 %695 }
 0x2ed   :  { %3445 = vrcp.f32 %v699_v36  ;;  %2786 = vmatmul.msk.bf16.vlgmr.msra.gmra.mxu1 %vm627_vm1, %v720_v34 }
 0x2ee   :  { %v721_v37 = vpack.c.bf16 %v713_v35, %v713_v35  ;;  %v742_v38 = vpop.f32.mrf.mxu1  ;;  %3447 = vrcp.f32 %v696_v44  ;;  %976 = vmatpush.bf16.msrb.mxu1 %v3254_v7 }
 0x2ef   :  { %v3828_v38 = vmov 128.0  }
 0x2f0   :  { %v465_v39 = vpop.permute.xlu2 %464  ;;  %2787 = vmatmul.msk.bf16.vlgmr.msra.gmra.mxu2 %vm627_vm1, %v721_v37  ;;  %3449 = vrcp.f32 %v3828_v38  ;;  %v2826_v38 = vld [vmem:[#allocation11 + $0x8] sm:$0xf0] }
 0x2f1   :  { %v862_v40 = vsel %vm727_vm2, %v465_v39, 0 }
 0x2f2   :  { %871 = vmatpush.bf16.msra.mxu0 %v862_v40  ;;  %977 = vmatpush.bf16.msrb.mxu1 %v3253_v8 }
 0x2f3   :  { %v3446_v41 = vpop.eup %3445 }
 0x2f4   :  { %v715_v42 = vmul.f32 %v3446_v41, %v3434_v10  ;;  %v3448_v45 = vpop.eup %3447  ;;  %v3251_v10 = vld [vmem:[#allocation8 + $0x20] sm:$0xff]  ;;  %v2880_v41 = vld [vmem:[#allocation11 + $0x70] sm:$0xf] }
 0x2f5   :  { %v714_v47 = vmul.f32 %v3448_v45, %v3432_v9  ;;  %v3252_v9 = vld [vmem:[#allocation8 + $0x28] sm:$0xff]  ;;  %v2882_v45 = vld [vmem:[#allocation11 + $0x78] sm:$0xf0] }
 0x2f6   :  { %v723_v43 = vpack.c.bf16 %v715_v42, %v715_v42  ;;  %978 = vmatpush.bf16.msrb.mxu1 %v3252_v9  ;;  %v3270_v42 = vld [vmem:[#allocation11 + $0x74] sm:$0xf0] }
 0x2f7   :  { %v722_v53 = vpack.c.bf16 %v714_v47, %v714_v47  ;;  %v2881_v44 = vor.u32 %v3270_v42, %v2880_v41 }
 0x2f8   :  { %2789 = vmatmul.msk.bf16.vlgmr.msra.gmra.mxu0 %vm627_vm1, %v723_v43  ;;  %v3269_v43 = vld [vmem:[#allocation11 + $0x74] sm:$0xf] }
 0x2f9   :  { %1156 = vmatpush.bf16.msrb.mxu2 %v2881_v44 }
 0x2fa   :  { %979 = vmatpush.bf16.msrb.mxu1 %v3251_v10 }
 0x2fe   :  { %980 = vmatpush.bf16.msrb.mxu1 %v3250_v11 }
 0x300   :  { %v759_v46 = vpop.f32.mrf.mxu2 }
 0x302   :  { %981 = vmatpush.bf16.msrb.mxu1 %v3249_v12  ;;  %v2848_v12 = vld [vmem:[#allocation11 + $0x30] sm:$0xf] }
 0x304   :  { %v463_v50 = vpop.permute.xlu1 %462 }
 0x305   :  { %v843_v51 = vsel %vm727_vm2, %v463_v50, 0  ;;  %v3268_v50 = vld [vmem:[#allocation11 + $0x64] sm:$0xf0] }
 0x306   :  { %852 = vmatpush.bf16.msrb.mxu3 %v843_v51  ;;  %982 = vmatpush.bf16.msrb.mxu1 %v3248_v13  ;;  %v3267_v51 = vld [vmem:[#allocation11 + $0x64] sm:$0xf]  ;;  %v3262_v13 = vld [vmem:[#allocation11 + $0x34] sm:$0xf0] }
 0x308   :  { %v761_v54 = vpop.f32.mrf.mxu2 }
 0x309   :  { %2788 = vmatmul.msk.bf16.vlgmr.msrb.gmra.mxu3 %vm627_vm1, %v722_v53  ;;  %v2874_v54 = vld [vmem:[#allocation11 + $0x68] sm:$0xf0] }
 0x30a   :  { %983 = vmatpush.bf16.msrb.mxu1 %v3247_v14  ;;  %v3261_v14 = vld [vmem:[#allocation11 + $0x34] sm:$0xf] }
 0x360   :  { %v797_v55 = vpop.f32.mrf.mxu0 }
 0x367   :  { %v778_v56 = vpop.f32.mrf.mxu3 }
 0x368   :  { %v3374_v57 = vpack.i.bf16 %v797_v55, %v778_v56  ;;  %v799_v58 = vpop.f32.mrf.mxu0  ;;  %v2877_v55 = vor.u32 %v3267_v51, %v2874_v54  ;;  %v3277_v51 = vld [vmem:[#allocation14 + $0x30] sm:$0xff] }
 0x369   :  { %v3266_v58 = vld [vmem:[#allocation11 + $0x54] sm:$0xf0] }
 0x36a   :  { %v816_v59 = vpop.f32.mrf.mxu1  ;;  %3375 = vrot.lane.b32.xlu2 %v3374_v57, %s3826_s1  ;;  %v2864_v57 = vld [vmem:[#allocation11 + $0x50] sm:$0xf] }
 0x36f   :  { %v780_v60 = vpop.f32.mrf.mxu3 }
 0x370   :  { %v2865_v60 = vor.u32 %v3266_v58, %v2864_v57  ;;  %v3284_v57 = vld [vmem:[#allocation14 + $0x68] sm:$0xff] }
 0x372   :  { %v818_v62 = vpop.f32.mrf.mxu1 }
 0x373   :  { %v835_v63 = vpop.f32.mrf.mxu2  ;;  %v2866_v62 = vld [vmem:[#allocation11 + $0x58] sm:$0xf0] }
 0x374   :  { %v3379_v0 = vpack.i.bf16 %v835_v63, %v816_v59  ;;  %v3265_v59 = vld [vmem:[#allocation11 + $0x54] sm:$0xf] }
 0x375   :  { %v873_v2 = vpop.f32.mrf.mxu0  ;;  %v2869_v63 = vor.u32 %v3265_v59, %v2866_v62  ;;  %v3275_v59 = vld [vmem:[#allocation14 + $0x20] sm:$0xff] }
 0x376   :  { %3380 = vrot.lane.b32.xlu1 %v3379_v0, %s3820_s4 }
 0x37b   :  { %v837_v3 = vpop.f32.mrf.mxu2 }
 0x37c   :  { %v3264_v3 = vld [vmem:[#allocation11 + $0x44] sm:$0xf0] }
 0x37d   :  { %v875_v4 = vpop.f32.mrf.mxu0 }
 0x37e   :  { %v3263_v4 = vld [vmem:[#allocation11 + $0x44] sm:$0xf] }
 0x38c   :  { %v854_v52 = vpop.f32.mrf.mxu3 }
 0x38d   :  { %v3384_v5 = vpack.i.bf16 %v873_v2, %v854_v52  ;;  %v2856_v2 = vld [vmem:[#allocation11 + $0x40] sm:$0xf] }
 0x38f   :  { %3385 = vrot.lane.b32.xlu2 %v3384_v5, %s3827_s19  ;;  %v2857_v5 = vor.u32 %v3264_v3, %v2856_v2 }
 0x394   :  { %v856_v6 = vpop.f32.mrf.mxu3 }
 0x395   :  { %v2858_v6 = vld [vmem:[#allocation11 + $0x48] sm:$0xf0] }
 0x396   :  { %v2861_v8 = vor.u32 %v3263_v4, %v2858_v6 }
 0x3c4   :  { %v3376_v15 = vpop.permute.xlu2 %3375 }
 0x3c5   :  { %v3378_v16 = vunpack.i.h.bf16 %v3376_v15  ;;  %v3377_v17 = vunpack.i.l.bf16 %v3376_v15  ;;  %v2849_v15 = vor.u32 %v3262_v13, %v2848_v12 }
 0x3c7   :  { %v902_v22 = vsel %vm466_vm0, %v759_v46, %v3378_v16  ;;  %v901_v23 = vsel %vm466_vm0, %v4037_v29, %v3377_v17  ;;  %v2885_v46 = vor.u32 %v3269_v43, %v2882_v45  ;;  %v2850_v16 = vld [vmem:[#allocation11 + $0x38] sm:$0xf0] }
 0x3c9   :  { %1170 = vmatpush.bf16.msra.mxu3 %v2885_v46  ;;  %v3278_v46 = vld [vmem:[#allocation14 + $0x38] sm:$0xff] }
 0x3ca   :  { %1320 = vmatpush.bf16.msrb.mxu0 %v3278_v46 }
 0x3cd   :  { %1171 = vmatpush.bf16.msra.mxu3 %v2877_v55 }
 0x3ce   :  { %1321 = vmatpush.bf16.msrb.mxu0 %v3277_v51 }
 0x3d1   :  { %1172 = vmatpush.bf16.msra.mxu3 %v2869_v63 }
 0x3d5   :  { %1173 = vmatpush.bf16.msra.mxu3 %v2861_v8 }
 0x3e8   :  { %v3381_v18 = vpop.permute.xlu1 %3380 }
 0x3e9   :  { %v3383_v19 = vunpack.i.h.bf16 %v3381_v18  ;;  %v3382_v20 = vunpack.i.l.bf16 %v3381_v18  ;;  %v3386_v21 = vpop.permute.xlu2 %3385  ;;  %v2853_v18 = vor.u32 %v3261_v14, %v2850_v16 }
 0x3ea   :  { %v3388_v24 = vunpack.i.h.bf16 %v3386_v21  ;;  %v3387_v25 = vunpack.i.l.bf16 %v3386_v21  ;;  %v3260_v21 = vld [vmem:[#allocation11 + $0x24] sm:$0xf0] }
 0x3eb   :  { %v904_v26 = vsel %vm903_vm3, %v901_v23, %v3382_v20  ;;  %v905_v27 = vsel %vm903_vm3, %v902_v22, %v3383_v19  ;;  %1174 = vmatpush.bf16.msra.mxu3 %v2853_v18  ;;  %v2840_v20 = vld [vmem:[#allocation11 + $0x20] sm:$0xf] }
 0x3ec   :  { %v908_v28 = vsel %vm906_vm4, %v905_v27, %v3388_v24  ;;  %v907_v1 = vsel %vm906_vm4, %v904_v26, %v3387_v25  ;;  %v2841_v23 = vor.u32 %v3260_v21, %v2840_v20  ;;  %v3259_v24 = vld [vmem:[#allocation11 + $0x24] sm:$0xf]  ;;  %v2842_v25 = vld [vmem:[#allocation11 + $0x28] sm:$0xf0]  ;;  %v3273_v20 = vld [vmem:[#allocation14 + $0x10] sm:$0xff] }
 0x3ed   :  { %v909_v61 = vpack.c.bf16 %v908_v28, %v907_v1  ;;  %v2845_v27 = vor.u32 %v3259_v24, %v2842_v25  ;;  %v2832_v28 = vld [vmem:[#allocation11 + $0x10] sm:$0xf]  ;;  %v3258_v1 = vld [vmem:[#allocation11 + $0x14] sm:$0xf0]  ;;  %v3279_v24 = vld [vmem:[#allocation14 + $0x40] sm:$0xff] }
 0x3ee   :  { %v3281_v21 = vld [vmem:[#allocation14 + $0x50] sm:$0xff]  ;;  %v1070_v25 = vld [vmem:[#allocation12] ss:$2 sm:$0x3] }
 0x3ef   :  { %984 = vmatmul.bf16.vlgmr.msrb.gmra.mxu1 %v909_v61  ;;  %1175 = vmatpush.bf16.msra.mxu3 %v2845_v27  ;;  %v3257_v61 = vld [vmem:[#allocation11 + $0x14] sm:$0xf] }
 0x46c   :  { %v985_v31 = vpop.f32.mrf.mxu1 }
 0x46d   :  { %v986_v32 = vadd.f32 %v3404_v30, %v985_v31  ;;  %v2834_v31 = vld [vmem:[#allocation11 + $0x18] sm:$0xf0] }
 0x46f   :  { %v4058_v33 = vadd.f32 %v986_v32, %v3950_v48  ;;  %v3450_v48 = vpop.eup %3449  ;;  %v2824_v32 = vld [vmem:[#allocation11] sm:$0xf] }
 0x470   :  { %v999_v39 = vmul.f32 128.0, %v3450_v48  ;;  %vm1003_vm5 = vweird.f32 %v3450_v48 }
 0x471   :  { %994 = vadd.xlane.f32.xlu1 %v4058_v33  ;;  %v1007_v29 = vmul.f32 %v4058_v33, %v4058_v33 }
 0x472   :  { %v1000_v40 = vsub.f32 1.0, %v999_v39 }
 0x473   :  { %1009 = vadd.xlane.f32.xlu2 %v1007_v29  ;;  %v3256_v29 = vld [vmem:[#allocation11 + $0x4] sm:$0xf0] }
 0x474   :  { %v987_v34 = vpop.f32.mrf.mxu1  ;;  %v1001_v47 = vmul.f32 %v3450_v48, %v1000_v40 }
 0x475   :  { %v988_v35 = vadd.f32 %v3404_v30, %v987_v34  ;;  %v2833_v30 = vor.u32 %v3258_v1, %v2832_v28  ;;  %v1072_v28 = vperm.slane %v1070_v25, 0  ;;  %v1073_v1 = vperm.slane %v1070_v25, 1  ;;  %v3009_v25 = vld [vmem:[#allocation6 + $0x128] sm:$0xf] }
 0x476   :  { %v1002_v56 = vadd.f32 %v3450_v48, %v1001_v47  ;;  %v3286_v47 = vld [vmem:[#allocation14 + $0x78] sm:$0xff] }
 0x477   :  { %v4064_v36 = vadd.f32 %v988_v35, %v3952_v49  ;;  %v2872_v49 = vld [vmem:[#allocation11 + $0x60] sm:$0xf]  ;;  %v2837_v35 = vor.u32 %v3257_v61, %v2834_v31  ;;  %1334 = vmatpush.bf16.msra.mxu1 %v3286_v47 }
 0x478   :  { %v2873_v53 = vor.u32 %v3268_v50, %v2872_v49  ;;  %v4069_v0 = vsel %vm1003_vm5, %v3450_v48, %v1002_v56  ;;  %v2825_v48 = vor.u32 %v3256_v29, %v2824_v32  ;;  %v3276_v56 = vld [vmem:[#allocation14 + $0x28] sm:$0xff] }
 0x479   :  { %996 = vadd.xlane.f32.xlu0 %v4064_v36  ;;  %v1008_v37 = vmul.f32 %v4064_v36, %v4064_v36  ;;  %1176 = vmatpush.bf16.msra.mxu3 %v2837_v35 }
 0x47a   :  { %1157 = vmatpush.bf16.msrb.mxu2 %v2873_v53  ;;  %v3285_v53 = vld [vmem:[#allocation14 + $0x70] sm:$0xff]  ;;  %1322 = vmatpush.bf16.msrb.mxu0 %v3276_v56  ;;  %v3037_v56 = vld [vmem:[#allocation6 + $0x168] sm:$0xf] }
 0x47b   :  { %1335 = vmatpush.bf16.msra.mxu1 %v3285_v53 }
 0x47e   :  { %1158 = vmatpush.bf16.msrb.mxu2 %v2865_v60  ;;  %v3283_v60 = vld [vmem:[#allocation14 + $0x60] sm:$0xff]  ;;  %1323 = vmatpush.bf16.msrb.mxu0 %v3275_v59 }
 0x47f   :  { %1336 = vmatpush.bf16.msra.mxu1 %v3284_v57  ;;  %v3309_v57 = vld [vmem:[#allocation6 + $0x170] sm:$0xf0] }
 0x480   :  { %v3038_v59 = vor.u32 %v3309_v57, %v3037_v56  ;;  %v3291_v56 = vld [vmem:[#allocation6 + $0xe0] sm:$0xf0]  ;;  %v3290_v57 = vld [vmem:[#allocation6 + $0xdc] sm:$0xf] }
 0x481   :  { %1011 = vadd.xlane.f32.xlu0 %v1008_v37  ;;  %v3255_v37 = vld [vmem:[#allocation11 + $0x4] sm:$0xf] }
 0x482   :  { %1159 = vmatpush.bf16.msrb.mxu2 %v2857_v5  ;;  %v2829_v39 = vor.u32 %v3255_v37, %v2826_v38 }
 0x483   :  { %1337 = vmatpush.bf16.msra.mxu1 %v3283_v60  ;;  %v3039_v60 = vld [vmem:[#allocation6 + $0x174] sm:$0xf0] }
 0x484   :  { %1177 = vmatpush.bf16.msra.mxu3 %v2829_v39 }
 0x486   :  { %1160 = vmatpush.bf16.msrb.mxu2 %v2849_v15  ;;  %v3406_v15 = vld [vmem:[#allocation17] ss:$0 sm:$0xff] }
 0x48a   :  { %1161 = vmatpush.bf16.msrb.mxu2 %v2841_v23  ;;  %v3271_v23 = vld [vmem:[#allocation14] sm:$0xff] }
 0x48e   :  { %1162 = vmatpush.bf16.msrb.mxu2 %v2833_v30 }
 0x492   :  { %1163 = vmatpush.bf16.msrb.mxu2 %v2825_v48 }
 0x496   :  { %1575 = vmatpush.bf16.msra.mxu2 %v3038_v59  ;;  %v2967_v59 = vld [vmem:[#allocation6 + $0xe4] sm:$0xf0] }
 0x4e4   :  { %v995_v52 = vpop.xlane.xlu1 %994 }
 0x4e5   :  { %v4072_v7 = vmul.f32 %v4069_v0, %v995_v52 }
 0x4e6   :  { %v1010_v9 = vpop.xlane.xlu2 %1009 }
 0x4e7   :  { %v1015_v10 = vmul.f32 %v4072_v7, %v4072_v7  ;;  %v1013_v11 = vmul.f32 %v1010_v9, %v4069_v0  ;;  %v1021_v5 = vsub.f32 %v4058_v33, %v4072_v7  ;;  %v3405_v9 = vld [vmem:[%s4263_s9] ss:$0 sm:$0xff]  ;;  %v3274_v7 = vld [vmem:[#allocation14 + $0x18] sm:$0xff] }
 0x4e8   :  { %1324 = vmatpush.bf16.msrb.mxu0 %v3274_v7 }
 0x4e9   :  { %v1017_v17 = vsub.f32 %v1013_v11, %v1015_v10 }
 0x4eb   :  { %v1019_v19 = vmax.f32 %v1017_v17, 0.0 }
 0x4ec   :  { %v997_v22 = vpop.xlane.xlu0 %996  ;;  %1325 = vmatpush.bf16.msrb.mxu0 %v3273_v20  ;;  %v3001_v20 = vld [vmem:[#allocation6 + $0x120] sm:$0xf] }
 0x4ed   :  { %v1023_v26 = vadd.f32 1e-05, %v1019_v19  ;;  %v1006_v34 = vmul.f32 %v4069_v0, %v997_v22  ;;  %v3282_v19 = vld [vmem:[#allocation14 + $0x58] sm:$0xff]  ;;  %v3280_v22 = vld [vmem:[#allocation14 + $0x48] sm:$0xff] }
 0x4ee   :  { %1338 = vmatpush.bf16.msra.mxu1 %v3282_v19 }
 0x4ef   :  { %3451 = vrsqrt.f32 %v1023_v26  ;;  %v1016_v42 = vmul.f32 %v1006_v34, %v1006_v34  ;;  %vm1031_vm7 = vweird.f32 %v1023_v26  ;;  %v1022_v11 = vsub.f32 %v4064_v36, %v1006_v34  ;;  %v3272_v36 = vld [vmem:[#allocation14 + $0x8] sm:$0xff] }
 0x4f0   :  { %1326 = vmatpush.bf16.msrb.mxu0 %v3272_v36  ;;  %v3299_v36 = vld [vmem:[#allocation6 + $0x124] sm:$0xf] }
 0x4f2   :  { %1339 = vmatpush.bf16.msra.mxu1 %v3281_v21  ;;  %v3300_v21 = vld [vmem:[#allocation6 + $0x128] sm:$0xf0] }
 0x4f4   :  { %v1012_v40 = vpop.xlane.xlu0 %1011  ;;  %1327 = vmatpush.bf16.msrb.mxu0 %v3271_v23  ;;  %v3002_v23 = vor.u32 %v3300_v21, %v3001_v20 }
 0x4f5   :  { %v3452_v41 = vpop.eup %3451  ;;  %v1014_v43 = vmul.f32 %v1012_v40, %v4069_v0 }
 0x4f6   :  { %v1026_v44 = vmul.f32 %v3452_v41, %v1023_v26  ;;  %vm1032_vm6 = vweird.f32 %v3452_v41  ;;  %1340 = vmatpush.bf16.msra.mxu1 %v3280_v22 }
 0x4f7   :  { %v1018_v45 = vsub.f32 %v1014_v43, %v1016_v42  ;;  %vm1033_vm8 = vmor %vm1031_vm7, %vm1032_vm6 }
 0x4f8   :  { %v1027_v49 = vmul.f32 %v3452_v41, %v1026_v44 }
 0x4f9   :  { %v1020_v50 = vmax.f32 %v1018_v45, 0.0 }
 0x4fa   :  { %v1028_v55 = vmul.f32 0.5, %v1027_v49  ;;  %1341 = vmatpush.bf16.msra.mxu1 %v3279_v24  ;;  %v3003_v24 = vld [vmem:[#allocation6 + $0x12c] sm:$0xf0] }
 0x4fb   :  { %v1024_v54 = vadd.f32 1e-05, %v1020_v50 }
 0x4fc   :  { %v1029_v58 = vsub.f32 1.5, %v1028_v55 }
 0x4fd   :  { %3453 = vrsqrt.f32 %v1024_v54  ;;  %vm1041_vm10 = vweird.f32 %v1024_v54 }
 0x4fe   :  { %v1030_v63 = vmul.f32 %v3452_v41, %v1029_v58  ;;  %v3308_v58 = vld [vmem:[#allocation6 + $0x16c] sm:$0xf] }
 0x500   :  { %v1034_v4 = vsel %vm1033_vm8, %v3452_v41, %v1030_v63  ;;  %v3407_v41 = vld [vmem:[#allocation15] ss:$0 sm:$0xff]  ;;  %v3310_v63 = vld [vmem:[#allocation6 + $0x178] sm:$0xf0] }
 0x501   :  { %v1045_v8 = vmul.f32 %v1034_v4, %v1021_v5  ;;  %v3025_v4 = vld [vmem:[#allocation6 + $0x150] sm:$0xf]  ;;  %v3305_v5 = vld [vmem:[#allocation6 + $0x154] sm:$0xf] }
 0x503   :  { %v3454_v62 = vpop.eup %3453  ;;  %v1048_v14 = vmul.f32 %v3405_v9, %v1045_v8  ;;  %v3027_v8 = vld [vmem:[#allocation6 + $0x15c] sm:$0xf0] }
 0x504   :  { %v1036_v2 = vmul.f32 %v3454_v62, %v1024_v54  ;;  %vm1042_vm9 = vweird.f32 %v3454_v62 }
 0x505   :  { %vm1043_vm11 = vmor %vm1041_vm10, %vm1042_vm9  ;;  %v1051_v17 = vadd.f32 %v3406_v15, %v1048_v14  ;;  %v3303_v14 = vld [vmem:[#allocation6 + $0x140] sm:$0xf0] }
 0x506   :  { %v1037_v3 = vmul.f32 %v3454_v62, %v1036_v2  ;;  %v3042_v2 = vor.u32 %v3308_v58, %v3039_v60  ;;  %v2973_v60 = vld [vmem:[#allocation6 + $0xe0] sm:$0xf] }
 0x508   :  { %v1038_v52 = vmul.f32 0.5, %v1037_v3  ;;  %1589 = vmatpush.bf16.msrb.mxu3 %v3042_v2 }
 0x50a   :  { %v1039_v6 = vsub.f32 1.5, %v1038_v52  ;;  %v3306_v52 = vld [vmem:[#allocation6 + $0x158] sm:$0xf0] }
 0x50c   :  { %v1040_v10 = vmul.f32 %v3454_v62, %v1039_v6  ;;  %v3026_v6 = vor.u32 %v3306_v52, %v3025_v4  ;;  %v2953_v52 = vld [vmem:[#allocation6 + $0xc0] sm:$0xf] }
 0x50e   :  { %v1044_v12 = vsel %vm1043_vm11, %v3454_v62, %v1040_v10  ;;  %v3045_v62 = vld [vmem:[#allocation6 + $0x170] sm:$0xf]  ;;  %v3307_v10 = vld [vmem:[#allocation6 + $0x160] sm:$0xf0]  ;;  %1576 = vmatpush.bf16.msra.mxu2 %v3026_v6 }
 0x50f   :  { %v1046_v13 = vmul.f32 %v1044_v12, %v1022_v11  ;;  %v3046_v3 = vor.u32 %v3310_v63, %v3045_v62  ;;  %v3030_v11 = vor.u32 %v3305_v5, %v3027_v8  ;;  %v3292_v62 = vld [vmem:[#allocation6 + $0xe8] sm:$0xf0]  ;;  %v3287_v6 = vld [vmem:[#allocation6 + $0xc4] sm:$0xf] }
 0x510   :  { %v2974_v4 = vor.u32 %v3292_v62, %v2973_v60  ;;  %v3288_v5 = vld [vmem:[#allocation6 + $0xc8] sm:$0xf0] }
 0x511   :  { %v1049_v16 = vmul.f32 %v3405_v9, %v1046_v13  ;;  %1603 = vmatpush.bf16.msra.mxu0 %v3046_v3  ;;  %v3033_v9 = vld [vmem:[#allocation6 + $0x158] sm:$0xf]  ;;  %1590 = vmatpush.bf16.msrb.mxu3 %v3030_v11  ;;  %v2970_v3 = vor.u32 %v3290_v57, %v2967_v59  ;;  %v2954_v8 = vor.u32 %v3288_v5, %v2953_v52  ;;  %v3289_v11 = vld [vmem:[#allocation6 + $0xd0] sm:$0xf0] }
 0x512   :  { %v3034_v12 = vor.u32 %v3307_v10, %v3033_v9  ;;  %v3013_v13 = vld [vmem:[#allocation6 + $0x138] sm:$0xf]  ;;  %v2955_v9 = vld [vmem:[#allocation6 + $0xcc] sm:$0xf0]  ;;  %v2961_v10 = vld [vmem:[#allocation6 + $0xc8] sm:$0xf] }
 0x513   :  { %v1052_v18 = vadd.f32 %v3406_v15, %v1049_v16  ;;  %v3302_v15 = vld [vmem:[#allocation6 + $0x13c] sm:$0xf]  ;;  %v3014_v16 = vor.u32 %v3303_v14, %v3013_v13  ;;  %v2958_v13 = vor.u32 %v3287_v6, %v2955_v9  ;;  %v2962_v14 = vor.u32 %v3289_v11, %v2961_v10 }
 0x515   :  { %v1053_v33 = vpack.c.bf16 %v1052_v18, %v1051_v17  ;;  %1604 = vmatpush.bf16.msra.mxu0 %v3034_v12  ;;  %1577 = vmatpush.bf16.msra.mxu2 %v3014_v16 }
 0x517   :  { %1164 = vmatmul.bf16.vlgmr.msrb.gmra.mxu2 %v1053_v33  ;;  %1178 = vmatmul.bf16.vlgmr.msra.gmra.mxu3 %v1053_v33  ;;  %v3304_v33 = vld [vmem:[#allocation6 + $0x148] sm:$0xf0] }
 0x519   :  { %1578 = vmatpush.bf16.msra.mxu2 %v3002_v23 }
 0x59a   :  { %v1165_v26 = vpop.f32.mrf.mxu2  ;;  %v1179_v27 = vpop.f32.mrf.mxu3 }
 0x59b   :  { %v1166_v61 = vadd.f32 %v1165_v26, %v1072_v28  ;;  %v1180_v30 = vadd.f32 %v1179_v27, %v1073_v1  ;;  %v3301_v26 = vld [vmem:[#allocation6 + $0x130] sm:$0xf0]  ;;  %v3006_v27 = vor.u32 %v3299_v36, %v3003_v24 }
 0x59d   :  { %v1184_v35 = vmax.f32 %v1166_v61, 0.0  ;;  %v1185_v37 = vmax.f32 %v1180_v30, 0.0  ;;  %v3297_v61 = vld [vmem:[#allocation6 + $0x110] sm:$0xf0]  ;;  %v3296_v30 = vld [vmem:[#allocation6 + $0x10c] sm:$0xf] }
 0x5a2   :  { %v1167_v31 = vpop.f32.mrf.mxu2  ;;  %v1181_v32 = vpop.f32.mrf.mxu3 }
 0x5a3   :  { %v1168_v29 = vadd.f32 %v1167_v31, %v1072_v28  ;;  %v1182_v34 = vadd.f32 %v1181_v32, %v1073_v1  ;;  %v3010_v28 = vor.u32 %v3301_v26, %v3009_v25  ;;  %v2989_v1 = vld [vmem:[#allocation6 + $0x108] sm:$0xf]  ;;  %v2991_v32 = vld [vmem:[#allocation6 + $0x114] sm:$0xf0] }
 0x5a4   :  { %v2990_v31 = vor.u32 %v3297_v61, %v2989_v1 }
 0x5a5   :  { %v1186_v38 = vmax.f32 %v1168_v29, 0.0  ;;  %v1187_v48 = vmax.f32 %v1182_v34, 0.0  ;;  %v2997_v29 = vld [vmem:[#allocation6 + $0x110] sm:$0xf]  ;;  %v3298_v34 = vld [vmem:[#allocation6 + $0x118] sm:$0xf0] }
 0x5a6   :  { %1579 = vmatpush.bf16.msra.mxu2 %v2990_v31 }
 0x5a7   :  { %v1188_v39 = vpack.c.bf16 %v1186_v38, %v1184_v35  ;;  %v1189_v40 = vpack.c.bf16 %v1187_v48, %v1185_v37  ;;  %v2994_v35 = vor.u32 %v3296_v30, %v2991_v32  ;;  %v2998_v37 = vor.u32 %v3298_v34, %v2997_v29  ;;  %v2977_v38 = vld [vmem:[#allocation6 + $0xf0] sm:$0xf]  ;;  %v3294_v48 = vld [vmem:[#allocation6 + $0xf8] sm:$0xf0]  ;;  %v3408_v32 = vld [vmem:[%s4265_s11] ss:$0 sm:$0xff] }
 0x5a9   :  { %1328 = vmatmul.bf16.vlgmr.msrb.gmra.mxu0 %v1188_v39  ;;  %1342 = vmatmul.bf16.vlgmr.msra.gmra.mxu1 %v1189_v40  ;;  %v3293_v39 = vld [vmem:[#allocation6 + $0xf4] sm:$0xf] }
 0x626   :  { %v1329_v42 = vpop.f32.mrf.mxu0  ;;  %v1343_v43 = vpop.f32.mrf.mxu1 }
 0x627   :  { %v1330_v44 = vadd.f32 %v3407_v41, %v1329_v42  ;;  %v2979_v42 = vld [vmem:[#allocation6 + $0xfc] sm:$0xf0] }
 0x629   :  { %v1344_v45 = vadd.f32 %v1343_v43, %v1330_v44  ;;  %v2985_v43 = vld [vmem:[#allocation6 + $0xf8] sm:$0xf]  ;;  %v3295_v44 = vld [vmem:[#allocation6 + $0x100] sm:$0xf0] }
 0x62b   :  { %v4085_v46 = vadd.f32 %v1344_v45, %v1051_v17  ;;  %v3015_v17 = vld [vmem:[#allocation6 + $0x144] sm:$0xf0] }
 0x62c   :  { %v3018_v7 = vor.u32 %v3302_v15, %v3015_v17 }
 0x62d   :  { %1352 = vadd.xlane.f32.xlu0 %v4085_v46  ;;  %v1358_v55 = vmul.f32 %v4085_v46, %v4085_v46 }
 0x62e   :  { %v1331_v47 = vpop.f32.mrf.mxu0  ;;  %v1345_v50 = vpop.f32.mrf.mxu1  ;;  %1591 = vmatpush.bf16.msrb.mxu3 %v3018_v7 }
 0x62f   :  { %v1332_v49 = vadd.f32 %v3407_v41, %v1331_v47  ;;  %v2978_v41 = vor.u32 %v3294_v48, %v2977_v38  ;;  %v2982_v47 = vor.u32 %v3293_v39, %v2979_v42  ;;  %v3409_v48 = vld [vmem:[#allocation18] ss:$0 sm:$0xff] }
 0x631   :  { %v1346_v51 = vadd.f32 %v1345_v50, %v1332_v49  ;;  %v2986_v49 = vor.u32 %v3295_v44, %v2985_v43  ;;  %1580 = vmatpush.bf16.msra.mxu2 %v2978_v41 }
 0x632   :  { %1592 = vmatpush.bf16.msrb.mxu3 %v3006_v27 }
 0x633   :  { %v4088_v53 = vadd.f32 %v1346_v51, %v1052_v18  ;;  %v3021_v18 = vld [vmem:[#allocation6 + $0x140] sm:$0xf] }
 0x634   :  { %v3022_v19 = vor.u32 %v3304_v33, %v3021_v18 }
 0x635   :  { %1354 = vadd.xlane.f32.xlu0 %v4088_v53  ;;  %v1359_v54 = vmul.f32 %v4088_v53, %v4088_v53 }
 0x636   :  { %1605 = vmatpush.bf16.msra.mxu0 %v3022_v19  ;;  %1593 = vmatpush.bf16.msrb.mxu3 %v2994_v35 }
 0x637   :  { %1362 = vadd.xlane.f32.xlu1 %v1359_v54 }
 0x63a   :  { %1606 = vmatpush.bf16.msra.mxu0 %v3010_v28  ;;  %1594 = vmatpush.bf16.msrb.mxu3 %v2982_v47 }
 0x63d   :  { %1360 = vadd.xlane.f32.xlu0 %v1358_v55  ;;  %v2965_v55 = vld [vmem:[#allocation6 + $0xd8] sm:$0xf] }
 0x63e   :  { %1607 = vmatpush.bf16.msra.mxu0 %v2998_v37  ;;  %v2966_v58 = vor.u32 %v3291_v56, %v2965_v55  ;;  %1595 = vmatpush.bf16.msrb.mxu3 %v2970_v3 }
 0x640   :  { %1581 = vmatpush.bf16.msra.mxu2 %v2966_v58 }
 0x642   :  { %1608 = vmatpush.bf16.msra.mxu0 %v2986_v49  ;;  %1596 = vmatpush.bf16.msrb.mxu3 %v2958_v13 }
 0x644   :  { %1582 = vmatpush.bf16.msra.mxu2 %v2954_v8 }
 0x646   :  { %1609 = vmatpush.bf16.msra.mxu0 %v2974_v4 }
 0x64a   :  { %1610 = vmatpush.bf16.msra.mxu0 %v2962_v14 }
 0x6a0   :  { %v1353_v22 = vpop.xlane.xlu0 %1352 }
 0x6a1   :  { %v1356_v63 = vmul.f32 %v1353_v22, %v4069_v0 }
 0x6a3   :  { %v1366_v16 = vmul.f32 %v1356_v63, %v1356_v63  ;;  %v1372_v34 = vsub.f32 %v4085_v46, %v1356_v63  ;;  %v2950_v46 = vld [vmem:[%s4256_s2 + $0x1] ss:$2 sm:$0x7] }
 0x6a4   :  { %v1441_v42 = vperm.slane %v2950_v46, 0  ;;  %v1442_v43 = vperm.slane %v2950_v46, 1  ;;  %v1443_v63 = vperm.slane %v2950_v46, 2 }
 0x6a8   :  { %v1355_v40 = vpop.xlane.xlu0 %1354 }
 0x6a9   :  { %v4096_v45 = vmul.f32 %v1355_v40, %v4069_v0 }
 0x6aa   :  { %v1363_v50 = vpop.xlane.xlu1 %1362 }
 0x6ab   :  { %v1367_v51 = vmul.f32 %v4096_v45, %v4096_v45  ;;  %v1365_v54 = vmul.f32 %v1363_v50, %v4069_v0  ;;  %v1373_v61 = vsub.f32 %v4088_v53, %v4096_v45 }
 0x6ad   :  { %v1369_v2 = vsub.f32 %v1365_v54, %v1367_v51 }
 0x6af   :  { %v1371_v12 = vmax.f32 %v1369_v2, 0.0 }
 0x6b0   :  { %v1361_v15 = vpop.xlane.xlu0 %1360 }
 0x6b1   :  { %v1375_v17 = vadd.f32 1e-05, %v1371_v12  ;;  %v1364_v18 = vmul.f32 %v1361_v15, %v4069_v0 }
 0x6b3   :  { %3455 = vrsqrt.f32 %v1375_v17  ;;  %v1368_v33 = vsub.f32 %v1364_v18, %v1366_v16  ;;  %vm1392_vm13 = vweird.f32 %v1375_v17 }
 0x6b5   :  { %v1370_v7 = vmax.f32 %v1368_v33, 0.0 }
 0x6b7   :  { %v1374_v19 = vadd.f32 1e-05, %v1370_v7 }
 0x6b9   :  { %v3456_v20 = vpop.eup %3455  ;;  %3457 = vrsqrt.f32 %v1374_v19  ;;  %vm1382_vm5 = vweird.f32 %v1374_v19 }
 0x6ba   :  { %v1387_v21 = vmul.f32 %v3456_v20, %v1375_v17  ;;  %vm1393_vm12 = vweird.f32 %v3456_v20 }
 0x6bb   :  { %vm1394_vm14 = vmor %vm1392_vm13, %vm1393_vm12 }
 0x6bc   :  { %v1388_v36 = vmul.f32 %v3456_v20, %v1387_v21 }
 0x6be   :  { %v1389_v22 = vmul.f32 0.5, %v1388_v36 }
 0x6bf   :  { %v3458_v23 = vpop.eup %3457 }
 0x6c0   :  { %v1390_v24 = vsub.f32 1.5, %v1389_v22  ;;  %v1377_v25 = vmul.f32 %v3458_v23, %v1374_v19  ;;  %vm1383_vm15 = vweird.f32 %v3458_v23 }
 0x6c1   :  { %vm1384_vm6 = vmor %vm1382_vm5, %vm1383_vm15 }
 0x6c2   :  { %v1391_v26 = vmul.f32 %v3456_v20, %v1390_v24  ;;  %v1378_v27 = vmul.f32 %v3458_v23, %v1377_v25 }
 0x6c4   :  { %v1395_v28 = vsel %vm1394_vm14, %v3456_v20, %v1391_v26  ;;  %v1379_v1 = vmul.f32 0.5, %v1378_v27  ;;  %vm2652_vm14 = vcmask 1041409  }
 0x6c5   :  { %v1397_v31 = vmul.f32 %v1395_v28, %v1373_v61 }
 0x6c6   :  { %v1380_v30 = vsub.f32 1.5, %v1379_v1 }
 0x6c7   :  { %v1400_v38 = vmul.f32 %v3408_v32, %v1397_v31 }
 0x6c8   :  { %v1381_v29 = vmul.f32 %v3458_v23, %v1380_v30 }
 0x6c9   :  { %v4111_v53 = vadd.f32 %v3409_v48, %v1400_v38 }
 0x6ca   :  { %v1385_v35 = vsel %vm1384_vm6, %v3458_v23, %v1381_v29 }
 0x6cb   :  { %v1396_v37 = vmul.f32 %v1385_v35, %v1372_v34 }
 0x6cd   :  { %v1399_v39 = vmul.f32 %v3408_v32, %v1396_v37 }
 0x6cf   :  { %v4109_v40 = vadd.f32 %v3409_v48, %v1399_v39 }
 0x6d1   :  { %v1404_v41 = vpack.c.bf16 %v4111_v53, %v4109_v40 }
 0x6d3   :  { %1583 = vmatmul.bf16.vlgmr.msra.gmra.mxu2 %v1404_v41  ;;  %1597 = vmatmul.bf16.vlgmr.msrb.gmra.mxu3 %v1404_v41 }
 0x6d4   :  { %1611 = vmatmul.bf16.vlgmr.msra.gmra.mxu0 %v1404_v41 }
 0x751   :  { %v1612_v3 = vpop.f32.mrf.mxu0 }
 0x752   :  { %v1613_v5 = vadd.f32 %v1612_v3, %v1443_v63 }
 0x754   :  { %v4129_v6 = vpack.c.bf16 %v1613_v5, %v1613_v5 }
 0x756   :  { %v1584_v44 = vpop.f32.mrf.mxu2  ;;  %v1598_v45 = vpop.f32.mrf.mxu3  ;;  %v1917_v11 = vsel %vm727_vm2, %v4129_v6, 0 }
 0x757   :  { %v1585_v47 = vadd.f32 %v1584_v44, %v1441_v42  ;;  %v1599_v49 = vadd.f32 %v1598_v45, %v1442_v43 }
 0x759   :  { %v1617_v50 = vpack.c.bf16 %v1599_v49, %v1585_v47  ;;  %v1614_v13 = vpop.f32.mrf.mxu0 }
 0x75a   :  { %v1615_v16 = vadd.f32 %v1614_v13, %v1443_v63 }
 0x75b   :  { %1623 = vrot.lane.b32.xlu0 %v1617_v50, %s3827_s19  ;;  %v1635_v51 = vrot.slane %v1617_v50, 4 }
 0x75c   :  { %v4137_v17 = vpack.c.bf16 %v1615_v16, %v1615_v16 }
 0x75d   :  { %v1661_v54 = vsel %vm466_vm0, %v1635_v51, 0 }
 0x75e   :  { %v1586_v55 = vpop.f32.mrf.mxu2  ;;  %v1600_v56 = vpop.f32.mrf.mxu3  ;;  %1670 = vmatpush.bf16.xpose.msrb.mxu1 %v1661_v54  ;;  %v1936_v36 = vsel %vm727_vm2, %v4137_v17, 0 }
 0x75f   :  { %v1587_v57 = vadd.f32 %v1586_v55, %v1441_v42  ;;  %v1601_v58 = vadd.f32 %v1600_v56, %v1442_v43 }
 0x761   :  { %v1619_v59 = vpack.c.bf16 %v1601_v58, %v1587_v57 }
 0x763   :  { %1629 = vrot.lane.b32.xlu1 %v1619_v59, %s3820_s4  ;;  %1625 = vrot.lane.b32.xlu2 %v1619_v59, %s3827_s19  ;;  %v1636_v60 = vrot.slane %v1619_v59, 4 }
 0x764   :  { %1631 = vrot.lane.b32.xlu0 %v1617_v50, %s3826_s1 }
 0x765   :  { %3047 = vmatmul.msk.bf16.vlgmr.msrb.gmra.mxu1 %vm466_vm0, %v1617_v50  ;;  %v1680_v62 = vsel %vm466_vm0, %v1636_v60, 0 }
 0x766   :  { %1689 = vmatpush.bf16.xpose.msrb.mxu2 %v1680_v62 }
 0x76b   :  { %1627 = vrot.lane.b32.xlu2 %v1617_v50, %s3820_s4 }
 0x76c   :  { %1633 = vrot.lane.b32.xlu0 %v1619_v59, %s3826_s1 }
 0x76d   :  { %3048 = vmatmul.msk.bf16.vlgmr.msrb.gmra.mxu2 %vm466_vm0, %v1619_v59 }
 0x7bd   :  { %v1626_v2 = vpop.permute.xlu2 %1625 }
 0x7be   :  { %v1638_v4 = vrot.slane %v1626_v2, 4 }
 0x7c0   :  { %v1718_v52 = vsel %vm466_vm0, %v1638_v4, 0 }
 0x7c1   :  { %1727 = vmatpush.bf16.xpose.msrb.mxu0 %v1718_v52 }
 0x7c5   :  { %v1628_v8 = vpop.permute.xlu2 %1627 }
 0x7c6   :  { %v1639_v9 = vrot.slane %v1628_v8, 4 }
 0x7c8   :  { %3050 = vmatmul.msk.bf16.vlgmr.msrb.gmra.mxu0 %vm466_vm0, %v1626_v2  ;;  %v1737_v10 = vsel %vm466_vm0, %v1639_v9, 0 }
 0x7c9   :  { %1746 = vmatpush.bf16.xpose.msra.mxu1 %v1737_v10 }
 0x7cd   :  { %v1624_v12 = vpop.permute.xlu0 %1623 }
 0x7ce   :  { %v1637_v14 = vrot.slane %v1624_v12, 4 }
 0x7d0   :  { %3051 = vmatmul.msk.bf16.vlgmr.msra.gmra.mxu1 %vm466_vm0, %v1628_v8  ;;  %v1699_v15 = vsel %vm466_vm0, %v1637_v14, 0 }
 0x7d1   :  { %1926 = vmatpush.bf16.msrb.mxu1 %v1917_v11  ;;  %1708 = vmatpush.bf16.xpose.msra.mxu3 %v1699_v15 }
 0x7d5   :  { %v1630_v18 = vpop.permute.xlu1 %1629 }
 0x7d6   :  { %v1640_v33 = vrot.slane %v1630_v18, 4  ;;  %v1632_v7 = vpop.permute.xlu0 %1631 }
 0x7d7   :  { %v1641_v19 = vrot.slane %v1632_v7, 4 }
 0x7d8   :  { %3049 = vmatmul.msk.bf16.vlgmr.msra.gmra.mxu3 %vm466_vm0, %v1624_v12  ;;  %v1756_v20 = vsel %vm466_vm0, %v1640_v33, 0 }
 0x7d9   :  { %1765 = vmatpush.bf16.xpose.msra.mxu2 %v1756_v20  ;;  %v1775_v21 = vsel %vm466_vm0, %v1641_v19, 0 }
 0x7da   :  { %1784 = vmatpush.bf16.xpose.msrb.mxu3 %v1775_v21 }
 0x7de   :  { %v1634_v22 = vpop.permute.xlu0 %1633 }
 0x7df   :  { %v1642_v23 = vrot.slane %v1634_v22, 4 }
 0x7e0   :  { %3052 = vmatmul.msk.bf16.vlgmr.msra.gmra.mxu2 %vm466_vm0, %v1630_v18 }
 0x7e1   :  { %1945 = vmatpush.bf16.msrb.mxu2 %v1936_v36  ;;  %v1794_v24 = vsel %vm466_vm0, %v1642_v23, 0 }
 0x7e2   :  { %1803 = vmatpush.bf16.xpose.msra.mxu0 %v1794_v24  ;;  %v1672_v25 = vpop.f32.mrf.mxu1 }
 0x7e3   :  { %v1809_v26 = vmul.f32 0.17677669, %v1672_v25 }
 0x7e5   :  { %v1817_v27 = vsel %vm627_vm1, %v1809_v26, -inf }
 0x7e6   :  { %1818 = vmax.xlane.f32.xlu0 %v1817_v27 }
 0x7e8   :  { %3053 = vmatmul.msk.bf16.vlgmr.msrb.gmra.mxu3 %vm466_vm0, %v1632_v7 }
 0x7e9   :  { %3054 = vmatmul.msk.bf16.vlgmr.msra.gmra.mxu0 %vm466_vm0, %v1634_v22 }
 0x7ea   :  { %v1674_v28 = vpop.f32.mrf.mxu1 }
 0x7f0   :  { %v1691_v1 = vpop.f32.mrf.mxu2 }
 0x7f1   :  { %v1810_v61 = vmul.f32 0.17677669, %v1691_v1 }
 0x7f3   :  { %v1820_v30 = vsel %vm627_vm1, %v1810_v61, -inf }
 0x7f4   :  { %1821 = vmax.xlane.f32.xlu1 %v1820_v30 }
 0x7f8   :  { %v1693_v31 = vpop.f32.mrf.mxu2 }
 0x845   :  { %v1729_v32 = vpop.f32.mrf.mxu0 }
 0x846   :  { %v1812_v38 = vmul.f32 0.17677669, %v1729_v32 }
 0x848   :  { %v1826_v39 = vsel %vm627_vm1, %v1812_v38, -inf }
 0x84d   :  { %v1731_v29 = vpop.f32.mrf.mxu0  ;;  %v1748_v34 = vpop.f32.mrf.mxu1 }
 0x84e   :  { %v1813_v35 = vmul.f32 0.17677669, %v1748_v34 }
 0x850   :  { %v1829_v37 = vsel %vm627_vm1, %v1813_v35, -inf }
 0x851   :  { %1830 = vmax.xlane.f32.xlu1 %v1829_v37 }
 0x855   :  { %v1750_v48 = vpop.f32.mrf.mxu1 }
 0x859   :  { %v1819_v41 = vpop.xlane.xlu0 %1818  ;;  %1827 = vmax.xlane.f32.xlu1 %v1826_v39 }
 0x85a   :  { %v1841_v46 = vsub.f32 %v1809_v26, %v1819_v41 }
 0x85b   :  { %v1710_v42 = vpop.f32.mrf.mxu3 }
 0x85c   :  { %v1849_v43 = vmul.f32 1.442695, %v1841_v46  ;;  %v1811_v44 = vmul.f32 0.17677669, %v1710_v42 }
 0x85e   :  { %3459 = vpow2.f32 %v1849_v43  ;;  %v1823_v45 = vsel %vm627_vm1, %v1811_v44, -inf }
 0x85f   :  { %1824 = vmax.xlane.f32.xlu2 %v1823_v45 }
 0x863   :  { %v1712_v47 = vpop.f32.mrf.mxu3  ;;  %v1767_v49 = vpop.f32.mrf.mxu2 }
 0x864   :  { %v3460_v50 = vpop.eup %3459  ;;  %v1814_v57 = vmul.f32 0.17677669, %v1767_v49 }
 0x865   :  { %v1865_v51 = vsel %vm627_vm1, %v3460_v50, 0.0 }
 0x866   :  { %v1805_v54 = vpop.f32.mrf.mxu0  ;;  %v1832_v3 = vsel %vm627_vm1, %v1814_v57, -inf }
 0x867   :  { %v1822_v55 = vpop.xlane.xlu1 %1821  ;;  %1866 = vadd.xlane.f32.xlu2 %v1865_v51  ;;  %v4156_v4 = vmul.f32 0.17677669, %v1805_v54 }
 0x868   :  { %v1842_v56 = vsub.f32 %v1810_v61, %v1822_v55 }
 0x869   :  { %v1838_v9 = vsel %vm627_vm1, %v4156_v4, -inf }
 0x86a   :  { %v1851_v58 = vmul.f32 1.442695, %v1842_v56 }
 0x86b   :  { %v1769_v59 = vpop.f32.mrf.mxu2  ;;  %v1786_v60 = vpop.f32.mrf.mxu3 }
 0x86c   :  { %v1815_v62 = vmul.f32 0.17677669, %v1786_v60  ;;  %3461 = vpow2.f32 %v1851_v58 }
 0x86e   :  { %v1807_v63 = vpop.f32.mrf.mxu0  ;;  %v1835_v2 = vsel %vm627_vm1, %v1815_v62, -inf }
 0x86f   :  { %1836 = vmax.xlane.f32.xlu0 %v1835_v2  ;;  %1833 = vmax.xlane.f32.xlu2 %v1832_v3 }
 0x872   :  { %v3462_v52 = vpop.eup %3461 }
 0x873   :  { %v1788_v5 = vpop.f32.mrf.mxu3  ;;  %v1868_v8 = vsel %vm627_vm1, %v3462_v52, 0.0 }
 0x877   :  { %1869 = vadd.xlane.f32.xlu0 %v1868_v8  ;;  %1839 = vmax.xlane.f32.xlu2 %v1838_v9 }
 0x88f   :  { %1647 = vrot.lane.b32.xlu2 %v4137_v17, %s3827_s19 }
 0x897   :  { %1651 = vrot.lane.b32.xlu2 %v4137_v17, %s3820_s4 }
 0x89f   :  { %1649 = vrot.lane.b32.xlu2 %v4129_v6, %s3820_s4 }
 0x8a7   :  { %1655 = vrot.lane.b32.xlu2 %v4137_v17, %s3826_s1 }
 0x8c4   :  { %v1831_v10 = vpop.xlane.xlu1 %1830 }
 0x8c5   :  { %v1845_v11 = vsub.f32 %v1813_v35, %v1831_v10 }
 0x8c7   :  { %v1857_v12 = vmul.f32 1.442695, %v1845_v11 }
 0x8c9   :  { %3463 = vpow2.f32 %v1857_v12 }
 0x8cc   :  { %v1828_v13 = vpop.xlane.xlu1 %1827 }
 0x8cd   :  { %v1844_v14 = vsub.f32 %v1812_v38, %v1828_v13 }
 0x8cf   :  { %v4169_v15 = vpop.eup %3463  ;;  %v1855_v16 = vmul.f32 1.442695, %v1844_v14 }
 0x8d0   :  { %v1877_v18 = vsel %vm627_vm1, %v4169_v15, 0.0 }
 0x8d1   :  { %3465 = vpow2.f32 %v1855_v16  ;;  %1878 = vadd.xlane.f32.xlu0 %v1877_v18 }
 0x8d2   :  { %v1825_v33 = vpop.xlane.xlu2 %1824 }
 0x8d3   :  { %v1843_v7 = vsub.f32 %v1811_v44, %v1825_v33 }
 0x8d5   :  { %v1853_v19 = vmul.f32 1.442695, %v1843_v7 }
 0x8d7   :  { %v4173_v20 = vpop.eup %3465  ;;  %3467 = vpow2.f32 %v1853_v19 }
 0x8d8   :  { %v1874_v17 = vsel %vm627_vm1, %v4173_v20, 0.0 }
 0x8d9   :  { %1875 = vadd.xlane.f32.xlu0 %v1874_v17 }
 0x8da   :  { %v1867_v21 = vpop.xlane.xlu2 %1866 }
 0x8db   :  { %3469 = vrcp.f32 %v1867_v21 }
 0x8dd   :  { %v4177_v36 = vpop.eup %3467 }
 0x8de   :  { %v1871_v22 = vsel %vm627_vm1, %v4177_v36, 0.0 }
 0x8df   :  { %1872 = vadd.xlane.f32.xlu1 %v1871_v22 }
 0x8e1   :  { %v3470_v23 = vpop.eup %3469 }
 0x8e2   :  { %v1897_v24 = vmul.f32 %v3470_v23, %v3460_v50  ;;  %v1834_v25 = vpop.xlane.xlu2 %1833  ;;  %v1837_v26 = vpop.xlane.xlu0 %1836 }
 0x8e3   :  { %v1846_v27 = vsub.f32 %v1814_v57, %v1834_v25  ;;  %v1847_v61 = vsub.f32 %v1815_v62, %v1837_v26 }
 0x8e4   :  { %v1905_v28 = vpack.c.bf16 %v1897_v24, %v1897_v24 }
 0x8e5   :  { %v1859_v1 = vmul.f32 1.442695, %v1846_v27  ;;  %v1861_v30 = vmul.f32 1.442695, %v1847_v61 }
 0x8e6   :  { %3055 = vmatmul.msk.bf16.vlgmr.msrb.gmra.mxu1 %vm627_vm1, %v1905_v28 }
 0x8e7   :  { %3471 = vpow2.f32 %v1859_v1 }
 0x8ea   :  { %v1840_v31 = vpop.xlane.xlu2 %1839  ;;  %v1870_v32 = vpop.xlane.xlu0 %1869 }
 0x8eb   :  { %3473 = vrcp.f32 %v1870_v32  ;;  %v1848_v50 = vsub.f32 %v4156_v4, %v1840_v31 }
 0x8ec   :  { %3475 = vpow2.f32 %v1861_v30 }
 0x8ed   :  { %v3472_v29 = vpop.eup %3471  ;;  %v1863_v51 = vmul.f32 1.442695, %v1848_v50 }
 0x8ee   :  { %v1880_v34 = vsel %vm627_vm1, %v3472_v29, 0.0 }
 0x8ef   :  { %1881 = vadd.xlane.f32.xlu0 %v1880_v34  ;;  %3477 = vpow2.f32 %v1863_v51 }
 0x8f1   :  { %v3474_v35 = vpop.eup %3473 }
 0x8f2   :  { %v1898_v37 = vmul.f32 %v3474_v35, %v3462_v52  ;;  %v1648_v38 = vpop.permute.xlu2 %1647  ;;  %v3476_v48 = vpop.eup %3475 }
 0x8f3   :  { %v1974_v39 = vsel %vm727_vm2, %v1648_v38, 0  ;;  %v1883_v46 = vsel %vm627_vm1, %v3476_v48, 0.0 }
 0x8f4   :  { %v1906_v41 = vpack.c.bf16 %v1898_v37, %v1898_v37  ;;  %1983 = vmatpush.bf16.msrb.mxu0 %v1974_v39  ;;  %v3317_v39 = vld [vmem:[#allocation8 + $0x70] sm:$0xff] }
 0x8f5   :  { %v3478_v54 = vpop.eup %3477 }
 0x8f6   :  { %3056 = vmatmul.msk.bf16.vlgmr.msrb.gmra.mxu2 %vm627_vm1, %v1906_v41  ;;  %v1886_v55 = vsel %vm627_vm1, %v3478_v54, 0.0  ;;  %v3316_v41 = vld [vmem:[#allocation8 + $0x68] sm:$0xff] }
 0x8f7   :  { %1884 = vadd.xlane.f32.xlu0 %v1883_v46  ;;  %v3315_v46 = vld [vmem:[#allocation8 + $0x60] sm:$0xff] }
 0x8f8   :  { %1645 = vrot.lane.b32.xlu1 %v4129_v6, %s3827_s19 }
 0x8fa   :  { %v1652_v42 = vpop.permute.xlu2 %1651 }
 0x8fb   :  { %v2012_v43 = vsel %vm727_vm2, %v1652_v42, 0  ;;  %v3314_v42 = vld [vmem:[#allocation8 + $0x58] sm:$0xff] }
 0x8fc   :  { %2021 = vmatpush.bf16.msra.mxu2 %v2012_v43  ;;  %v3313_v43 = vld [vmem:[#allocation8 + $0x50] sm:$0xff] }
 0x902   :  { %v1650_v44 = vpop.permute.xlu2 %1649 }
 0x903   :  { %v1993_v45 = vsel %vm727_vm2, %v1650_v44, 0  ;;  %v3312_v44 = vld [vmem:[#allocation8 + $0x48] sm:$0xff] }
 0x904   :  { %2002 = vmatpush.bf16.msra.mxu1 %v1993_v45  ;;  %v3311_v45 = vld [vmem:[#allocation8 + $0x40] sm:$0xff] }
 0x90a   :  { %v1656_v47 = vpop.permute.xlu2 %1655 }
 0x90b   :  { %v2050_v49 = vsel %vm727_vm2, %v1656_v47, 0  ;;  %1653 = vrot.lane.b32.xlu0 %v4129_v6, %s3826_s1 }
 0x90c   :  { %2059 = vmatpush.bf16.msra.mxu0 %v2050_v49 }
 0x922   :  { %1887 = vadd.xlane.f32.xlu1 %v1886_v55 }
 0x944   :  { %v1879_v56 = vpop.xlane.xlu0 %1878 }
 0x945   :  { %3479 = vrcp.f32 %v1879_v56 }
 0x94b   :  { %v3480_v57 = vpop.eup %3479 }
 0x94c   :  { %v1901_v58 = vmul.f32 %v3480_v57, %v4169_v15  ;;  %v1876_v59 = vpop.xlane.xlu0 %1875 }
 0x94d   :  { %3481 = vrcp.f32 %v1876_v59 }
 0x94e   :  { %v1909_v60 = vpack.c.bf16 %v1901_v58, %v1901_v58 }
 0x950   :  { %3059 = vmatmul.msk.bf16.vlgmr.msra.gmra.mxu1 %vm627_vm1, %v1909_v60 }
 0x952   :  { %v1873_v2 = vpop.xlane.xlu1 %1872 }
 0x953   :  { %v3482_v6 = vpop.eup %3481  ;;  %3483 = vrcp.f32 %v1873_v2 }
 0x954   :  { %v1900_v62 = vmul.f32 %v3482_v6, %v4173_v20 }
 0x956   :  { %v1908_v63 = vpack.c.bf16 %v1900_v62, %v1900_v62 }
 0x958   :  { %3058 = vmatmul.msk.bf16.vlgmr.msrb.gmra.mxu0 %vm627_vm1, %v1908_v63 }
 0x959   :  { %v3484_v52 = vpop.eup %3483 }
 0x95a   :  { %v1899_v8 = vmul.f32 %v3484_v52, %v4177_v36  ;;  %v3410_v52 = vld [vmem:[#allocation9 + $0x1] ss:$0 sm:$0xff] }
 0x95c   :  { %v1907_v14 = vpack.c.bf16 %v1899_v8, %v1899_v8 }
 0x962   :  { %v1882_v3 = vpop.xlane.xlu0 %1881 }
 0x963   :  { %3485 = vrcp.f32 %v1882_v3  ;;  %v4199_v4 = vpop.f32.mrf.mxu1 }
 0x969   :  { %v3486_v5 = vpop.eup %3485 }
 0x96a   :  { %v1902_v9 = vmul.f32 %v3486_v5, %v3472_v29  ;;  %v1646_v10 = vpop.permute.xlu1 %1645  ;;  %v1885_v15 = vpop.xlane.xlu0 %1884 }
 0x96b   :  { %v1955_v11 = vsel %vm727_vm2, %v1646_v10, 0  ;;  %v1930_v12 = vpop.f32.mrf.mxu1  ;;  %3487 = vrcp.f32 %v1885_v15  ;;  %v3333_v15 = vld [vmem:[#allocation11 + $0xf4] sm:$0xf] }
 0x96c   :  { %v1910_v13 = vpack.c.bf16 %v1902_v9, %v1902_v9  ;;  %1964 = vmatpush.bf16.msra.mxu3 %v1955_v11 }
 0x96e   :  { %3060 = vmatmul.msk.bf16.vlgmr.msra.gmra.mxu2 %vm627_vm1, %v1910_v13 }
 0x96f   :  { %3057 = vmatmul.msk.bf16.vlgmr.msra.gmra.mxu3 %vm627_vm1, %v1907_v14  ;;  %v3153_v14 = vld [vmem:[#allocation11 + $0xf0] sm:$0xf] }
 0x971   :  { %v3488_v16 = vpop.eup %3487 }
 0x972   :  { %v1903_v33 = vmul.f32 %v3488_v16, %v3476_v48  ;;  %v3318_v48 = vld [vmem:[#allocation8 + $0x78] sm:$0xff] }
 0x973   :  { %2163 = vmatpush.bf16.msrb.mxu1 %v3318_v48 }
 0x974   :  { %v1911_v20 = vpack.c.bf16 %v1903_v33, %v1903_v33 }
 0x977   :  { %2164 = vmatpush.bf16.msrb.mxu1 %v3317_v39 }
 0x979   :  { %v1947_v18 = vpop.f32.mrf.mxu2 }
 0x97b   :  { %2165 = vmatpush.bf16.msrb.mxu1 %v3316_v41  ;;  %v3113_v41 = vld [vmem:[#allocation11 + $0xa0] sm:$0xf] }
 0x97d   :  { %v1654_v7 = vpop.permute.xlu0 %1653 }
 0x97e   :  { %v2031_v19 = vsel %vm727_vm2, %v1654_v7, 0  ;;  %v3145_v7 = vld [vmem:[#allocation11 + $0xe0] sm:$0xf] }
 0x97f   :  { %2040 = vmatpush.bf16.msrb.mxu3 %v2031_v19  ;;  %2166 = vmatpush.bf16.msrb.mxu1 %v3315_v46  ;;  %v3332_v19 = vld [vmem:[#allocation11 + $0xe4] sm:$0xf0] }
 0x980   :  { %v3324_v46 = vld [vmem:[#allocation11 + $0xa4] sm:$0xf0] }
 0x981   :  { %v1949_v17 = vpop.f32.mrf.mxu2 }
 0x982   :  { %3061 = vmatmul.msk.bf16.vlgmr.msrb.gmra.mxu3 %vm627_vm1, %v1911_v20  ;;  %v3331_v20 = vld [vmem:[#allocation11 + $0xe4] sm:$0xf]  ;;  %v3146_v17 = vor.u32 %v3332_v19, %v3145_v7 }
 0x983   :  { %2167 = vmatpush.bf16.msrb.mxu1 %v3314_v42  ;;  %v3323_v42 = vld [vmem:[#allocation11 + $0xa4] sm:$0xf] }
 0x987   :  { %2168 = vmatpush.bf16.msrb.mxu1 %v3313_v43 }
 0x98b   :  { %2169 = vmatpush.bf16.msrb.mxu1 %v3312_v44  ;;  %v3114_v44 = vor.u32 %v3324_v46, %v3113_v41  ;;  %v3412_v41 = vld [vmem:[#allocation17 + $0x1] ss:$0 sm:$0xff] }
 0x98f   :  { %2170 = vmatpush.bf16.msrb.mxu1 %v3311_v45  ;;  %v3115_v45 = vld [vmem:[#allocation11 + $0xa8] sm:$0xf0] }
 0x995   :  { %v1888_v21 = vpop.xlane.xlu1 %1887 }
 0x996   :  { %3489 = vrcp.f32 %v1888_v21 }
 0x99c   :  { %v3490_v36 = vpop.eup %3489 }
 0x99d   :  { %v1904_v22 = vmul.f32 %v3490_v36, %v3478_v54  ;;  %v3137_v36 = vld [vmem:[#allocation11 + $0xd0] sm:$0xf] }
 0x99f   :  { %v1912_v23 = vpack.c.bf16 %v1904_v22, %v1904_v22  ;;  %v3330_v22 = vld [vmem:[#allocation11 + $0xd4] sm:$0xf0] }
 0x9a1   :  { %3062 = vmatmul.msk.bf16.vlgmr.msra.gmra.mxu0 %vm627_vm1, %v1912_v23  ;;  %v3329_v23 = vld [vmem:[#allocation11 + $0xd4] sm:$0xf] }
 0x9cd   :  { %v2004_v24 = vpop.f32.mrf.mxu1 }
 0x9d5   :  { %v1985_v25 = vpop.f32.mrf.mxu0  ;;  %v2006_v26 = vpop.f32.mrf.mxu1 }
 0x9dd   :  { %v1987_v27 = vpop.f32.mrf.mxu0 }
 0x9de   :  { %v3129_v27 = vld [vmem:[#allocation11 + $0xc0] sm:$0xf] }
 0x9f1   :  { %v2023_v28 = vpop.f32.mrf.mxu2 }
 0x9f2   :  { %v3394_v1 = vpack.i.bf16 %v2023_v28, %v2004_v24  ;;  %v1966_v61 = vpop.f32.mrf.mxu3  ;;  %v3138_v24 = vor.u32 %v3330_v22, %v3137_v36  ;;  %v3328_v28 = vld [vmem:[#allocation11 + $0xc4] sm:$0xf0] }
 0x9f3   :  { %v3389_v30 = vpack.i.bf16 %v1985_v25, %v1966_v61  ;;  %v3139_v25 = vld [vmem:[#allocation11 + $0xd8] sm:$0xf0]  ;;  %v3130_v61 = vor.u32 %v3328_v28, %v3129_v27 }
 0x9f4   :  { %3395 = vrot.lane.b32.xlu2 %v3394_v1, %s3820_s4  ;;  %v3142_v26 = vor.u32 %v3329_v23, %v3139_v25  ;;  %v3327_v1 = vld [vmem:[#allocation11 + $0xc4] sm:$0xf] }
 0x9f5   :  { %3390 = vrot.lane.b32.xlu0 %v3389_v30, %s3826_s1  ;;  %v3131_v30 = vld [vmem:[#allocation11 + $0xc8] sm:$0xf0]  ;;  %v3339_v23 = vld [vmem:[#allocation14 + $0xa0] sm:$0xff] }
 0x9f9   :  { %v2025_v31 = vpop.f32.mrf.mxu2 }
 0x9fa   :  { %v1968_v32 = vpop.f32.mrf.mxu3  ;;  %v3134_v31 = vor.u32 %v3327_v1, %v3131_v30 }
 0x9fb   :  { %v3121_v32 = vld [vmem:[#allocation11 + $0xb0] sm:$0xf] }
 0xa05   :  { %v2042_v29 = vpop.f32.mrf.mxu3 }
 0xa0d   :  { %v2044_v34 = vpop.f32.mrf.mxu3 }
 0xa0e   :  { %v3325_v34 = vld [vmem:[#allocation11 + $0xb4] sm:$0xf] }
 0xa1e   :  { %v2061_v35 = vpop.f32.mrf.mxu0 }
 0xa1f   :  { %v3399_v37 = vpack.i.bf16 %v2061_v35, %v2042_v29  ;;  %v3326_v29 = vld [vmem:[#allocation11 + $0xb4] sm:$0xf0] }
 0xa20   :  { %v3122_v35 = vor.u32 %v3326_v29, %v3121_v32  ;;  %v3411_v29 = vld [vmem:[%s4263_s9 + $0x1] ss:$0 sm:$0xff] }
 0xa21   :  { %3400 = vrot.lane.b32.xlu0 %v3399_v37, %s3827_s19  ;;  %v3123_v37 = vld [vmem:[#allocation11 + $0xb8] sm:$0xf0] }
 0xa26   :  { %v2063_v38 = vpop.f32.mrf.mxu0 }
 0xa27   :  { %v3126_v38 = vor.u32 %v3325_v34, %v3123_v37 }
 0xa4e   :  { %v3396_v51 = vpop.permute.xlu2 %3395 }
 0xa4f   :  { %v3398_v56 = vunpack.i.h.bf16 %v3396_v51  ;;  %v3397_v57 = vunpack.i.l.bf16 %v3396_v51 }
 0xa67   :  { %v3391_v47 = vpop.permute.xlu0 %3390 }
 0xa68   :  { %v3393_v49 = vunpack.i.h.bf16 %v3391_v47  ;;  %v3392_v50 = vunpack.i.l.bf16 %v3391_v47 }
 0xa6a   :  { %v2090_v54 = vsel %vm466_vm0, %v1947_v18, %v3393_v49  ;;  %v2089_v55 = vsel %vm466_vm0, %v4199_v4, %v3392_v50  ;;  %v3155_v18 = vld [vmem:[#allocation11 + $0xf8] sm:$0xf0]  ;;  %v3118_v50 = vor.u32 %v3323_v42, %v3115_v45  ;;  %v3337_v45 = vld [vmem:[#allocation14 + $0x90] sm:$0xff] }
 0xa6b   :  { %v2091_v6 = vsel %vm903_vm3, %v2089_v55, %v3397_v57  ;;  %v2092_v62 = vsel %vm903_vm3, %v2090_v54, %v3398_v56  ;;  %v3158_v33 = vor.u32 %v3333_v15, %v3155_v18  ;;  %v3105_v54 = vld [vmem:[#allocation11 + $0x90] sm:$0xf]  ;;  %v3322_v55 = vld [vmem:[#allocation11 + $0x94] sm:$0xf0]  ;;  %v3321_v56 = vld [vmem:[#allocation11 + $0x94] sm:$0xf] }
 0xa6c   :  { %v3106_v57 = vor.u32 %v3322_v55, %v3105_v54  ;;  %v3350_v15 = vld [vmem:[#allocation14 + $0xf8] sm:$0xff]  ;;  %v3341_v18 = vld [vmem:[#allocation14 + $0xb0] sm:$0xff] }
 0xa6d   :  { %2352 = vmatpush.bf16.msra.mxu3 %v3158_v33  ;;  %2517 = vmatpush.bf16.msra.mxu1 %v3350_v15  ;;  %v3349_v33 = vld [vmem:[#allocation14 + $0xf0] sm:$0xff]  ;;  %v2252_v54 = vld [vmem:[#allocation12 + $0x1] ss:$2 sm:$0x3] }
 0xa71   :  { %2518 = vmatpush.bf16.msra.mxu1 %v3349_v33 }
 0xa93   :  { %v3401_v58 = vpop.permute.xlu0 %3400 }
 0xa94   :  { %v3403_v59 = vunpack.i.h.bf16 %v3401_v58  ;;  %v3402_v60 = vunpack.i.l.bf16 %v3401_v58  ;;  %v3107_v58 = vld [vmem:[#allocation11 + $0x98] sm:$0xf0] }
 0xa96   :  { %v2093_v63 = vsel %vm906_vm4, %v2091_v6, %v3402_v60  ;;  %v2094_v2 = vsel %vm906_vm4, %v2092_v62, %v3403_v59  ;;  %v3097_v59 = vld [vmem:[#allocation11 + $0x80] sm:$0xf]  ;;  %v3320_v60 = vld [vmem:[#allocation11 + $0x84] sm:$0xf0]  ;;  %v3110_v62 = vor.u32 %v3321_v56, %v3107_v58  ;;  %v2255_v58 = vperm.slane %v2252_v54, 1 }
 0xa97   :  { %v2095_v3 = vpack.c.bf16 %v2094_v2, %v2093_v63  ;;  %v3319_v63 = vld [vmem:[#allocation11 + $0x84] sm:$0xf]  ;;  %v3099_v2 = vld [vmem:[#allocation11 + $0x88] sm:$0xf0] }
 0xa99   :  { %2171 = vmatmul.bf16.vlgmr.msrb.gmra.mxu1 %v2095_v3 }
 0xb16   :  { %v2172_v5 = vpop.f32.mrf.mxu1 }
 0xb17   :  { %v2173_v8 = vadd.f32 %v3410_v52, %v2172_v5 }
 0xb19   :  { %v4219_v4 = vadd.f32 %v2173_v8, %v4109_v40  ;;  %v3334_v40 = vld [vmem:[#allocation11 + $0xf4] sm:$0xf0] }
 0xb1a   :  { %v3154_v16 = vor.u32 %v3334_v40, %v3153_v14  ;;  %v3342_v40 = vld [vmem:[#allocation14 + $0xb8] sm:$0xff] }
 0xb1b   :  { %2181 = vadd.xlane.f32.xlu2 %v4219_v4  ;;  %v2187_v9 = vmul.f32 %v4219_v4, %v4219_v4  ;;  %2503 = vmatpush.bf16.msrb.mxu0 %v3342_v40 }
 0xb1c   :  { %2338 = vmatpush.bf16.msrb.mxu2 %v3154_v16 }
 0xb1d   :  { %2189 = vadd.xlane.f32.xlu1 %v2187_v9  ;;  %v3102_v9 = vor.u32 %v3319_v63, %v3099_v2 }
 0xb1e   :  { %v2174_v10 = vpop.f32.mrf.mxu1 }
 0xb1f   :  { %v2175_v11 = vadd.f32 %v3410_v52, %v2174_v10  ;;  %v3098_v52 = vor.u32 %v3320_v60, %v3097_v59  ;;  %2504 = vmatpush.bf16.msrb.mxu0 %v3341_v18 }
 0xb20   :  { %2339 = vmatpush.bf16.msrb.mxu2 %v3146_v17 }
 0xb21   :  { %v4225_v12 = vadd.f32 %v2175_v11, %v4111_v53  ;;  %v3147_v53 = vld [vmem:[#allocation11 + $0xe8] sm:$0xf0] }
 0xb22   :  { %v3150_v21 = vor.u32 %v3331_v20, %v3147_v53  ;;  %v3340_v53 = vld [vmem:[#allocation14 + $0xa8] sm:$0xff] }
 0xb23   :  { %2183 = vadd.xlane.f32.xlu0 %v4225_v12  ;;  %v2188_v13 = vmul.f32 %v4225_v12, %v4225_v12  ;;  %2505 = vmatpush.bf16.msrb.mxu0 %v3340_v53 }
 0xb24   :  { %2353 = vmatpush.bf16.msra.mxu3 %v3150_v21  ;;  %2340 = vmatpush.bf16.msrb.mxu2 %v3138_v24  ;;  %v3348_v21 = vld [vmem:[#allocation14 + $0xe8] sm:$0xff]  ;;  %v3347_v24 = vld [vmem:[#allocation14 + $0xe0] sm:$0xff] }
 0xb25   :  { %2191 = vadd.xlane.f32.xlu1 %v2188_v13  ;;  %2519 = vmatpush.bf16.msra.mxu1 %v3348_v21 }
 0xb27   :  { %2506 = vmatpush.bf16.msrb.mxu0 %v3339_v23 }
 0xb28   :  { %2354 = vmatpush.bf16.msra.mxu3 %v3142_v26  ;;  %2341 = vmatpush.bf16.msrb.mxu2 %v3130_v61 }
 0xb29   :  { %2520 = vmatpush.bf16.msra.mxu1 %v3347_v24 }
 0xb2c   :  { %2355 = vmatpush.bf16.msra.mxu3 %v3134_v31  ;;  %2342 = vmatpush.bf16.msrb.mxu2 %v3122_v35 }
 0xb30   :  { %2356 = vmatpush.bf16.msra.mxu3 %v3126_v38  ;;  %2343 = vmatpush.bf16.msrb.mxu2 %v3114_v44  ;;  %v3346_v44 = vld [vmem:[#allocation14 + $0xd8] sm:$0xff] }
 0xb31   :  { %2521 = vmatpush.bf16.msra.mxu1 %v3346_v44 }
 0xb34   :  { %2357 = vmatpush.bf16.msra.mxu3 %v3118_v50  ;;  %2344 = vmatpush.bf16.msrb.mxu2 %v3106_v57  ;;  %v3335_v50 = vld [vmem:[#allocation14 + $0x80] sm:$0xff]  ;;  %v2254_v57 = vperm.slane %v2252_v54, 0 }
 0xb35   :  { %v3416_v54 = vld [vmem:[#allocation20] ss:$0 sm:$0xff] }
 0xb38   :  { %2358 = vmatpush.bf16.msra.mxu3 %v3110_v62  ;;  %2345 = vmatpush.bf16.msrb.mxu2 %v3098_v52 }
 0xb3c   :  { %2359 = vmatpush.bf16.msra.mxu3 %v3102_v9 }
 0xb8e   :  { %v2182_v48 = vpop.xlane.xlu2 %2181 }
 0xb8f   :  { %v4231_v39 = vmul.f32 %v2182_v48, %v4069_v0 }
 0xb90   :  { %v2190_v43 = vpop.xlane.xlu1 %2189 }
 0xb91   :  { %v2195_v47 = vmul.f32 %v4231_v39, %v4231_v39  ;;  %v2193_v49 = vmul.f32 %v2190_v43, %v4069_v0  ;;  %v2201_v30 = vsub.f32 %v4219_v4, %v4231_v39  ;;  %v3338_v39 = vld [vmem:[#allocation14 + $0x98] sm:$0xff] }
 0xb92   :  { %2507 = vmatpush.bf16.msrb.mxu0 %v3338_v39 }
 0xb93   :  { %v2197_v51 = vsub.f32 %v2193_v49, %v2195_v47  ;;  %v3345_v47 = vld [vmem:[#allocation14 + $0xd0] sm:$0xff]  ;;  %v3344_v49 = vld [vmem:[#allocation14 + $0xc8] sm:$0xff] }
 0xb94   :  { %2522 = vmatpush.bf16.msra.mxu1 %v3345_v47 }
 0xb95   :  { %v2199_v6 = vmax.f32 %v2197_v51, 0.0  ;;  %v3343_v51 = vld [vmem:[#allocation14 + $0xc0] sm:$0xff] }
 0xb96   :  { %v2184_v3 = vpop.xlane.xlu0 %2183  ;;  %2508 = vmatpush.bf16.msrb.mxu0 %v3337_v45 }
 0xb97   :  { %v2203_v5 = vadd.f32 1e-05, %v2199_v6  ;;  %v2186_v8 = vmul.f32 %v2184_v3, %v4069_v0 }
 0xb98   :  { %v2192_v10 = vpop.xlane.xlu1 %2191  ;;  %2523 = vmatpush.bf16.msra.mxu1 %v3344_v49  ;;  %v3415_v49 = vld [vmem:[#allocation18 + $0x1] ss:$0 sm:$0xff] }
 0xb99   :  { %3491 = vrsqrt.f32 %v2203_v5  ;;  %v2196_v11 = vmul.f32 %v2186_v8, %v2186_v8  ;;  %v2194_v13 = vmul.f32 %v2192_v10, %v4069_v0  ;;  %vm2211_vm1 = vweird.f32 %v2203_v5 }
 0xb9a   :  { %v2202_v35 = vsub.f32 %v4225_v12, %v2186_v8  ;;  %v3336_v12 = vld [vmem:[#allocation14 + $0x88] sm:$0xff] }
 0xb9b   :  { %v2198_v14 = vsub.f32 %v2194_v13, %v2196_v11  ;;  %2509 = vmatpush.bf16.msrb.mxu0 %v3336_v12  ;;  %v3413_v11 = vld [vmem:[#allocation15 + $0x1] ss:$0 sm:$0xff] }
 0xb9c   :  { %2524 = vmatpush.bf16.msra.mxu1 %v3343_v51 }
 0xb9d   :  { %v2200_v16 = vmax.f32 %v2198_v14, 0.0 }
 0xb9f   :  { %v3492_v7 = vpop.eup %3491  ;;  %v2204_v20 = vadd.f32 1e-05, %v2200_v16  ;;  %2510 = vmatpush.bf16.msrb.mxu0 %v3335_v50 }
 0xba0   :  { %v2206_v19 = vmul.f32 %v3492_v7, %v2203_v5  ;;  %vm2212_vm0 = vweird.f32 %v3492_v7 }
 0xba1   :  { %3493 = vrsqrt.f32 %v2204_v20  ;;  %vm2213_vm2 = vmor %vm2211_vm1, %vm2212_vm0  ;;  %vm2221_vm4 = vweird.f32 %v2204_v20 }
 0xba2   :  { %v2207_v17 = vmul.f32 %v3492_v7, %v2206_v19 }
 0xba4   :  { %v2208_v36 = vmul.f32 0.5, %v2207_v17 }
 0xba6   :  { %v2209_v22 = vsub.f32 1.5, %v2208_v36 }
 0xba7   :  { %v3494_v25 = vpop.eup %3493 }
 0xba8   :  { %v2210_v26 = vmul.f32 %v3492_v7, %v2209_v22  ;;  %v2216_v27 = vmul.f32 %v3494_v25, %v2204_v20  ;;  %vm2222_vm3 = vweird.f32 %v3494_v25 }
 0xba9   :  { %vm2223_vm7 = vmor %vm2221_vm4, %vm2222_vm3 }
 0xbaa   :  { %v2217_v28 = vmul.f32 %v3494_v25, %v2216_v27  ;;  %v2214_v1 = vsel %vm2213_vm2, %v3492_v7, %v2210_v26 }
 0xbab   :  { %v2225_v32 = vmul.f32 %v2214_v1, %v2201_v30 }
 0xbac   :  { %v2218_v61 = vmul.f32 0.5, %v2217_v28 }
 0xbad   :  { %v2228_v48 = vmul.f32 %v3411_v29, %v2225_v32 }
 0xbae   :  { %v2219_v31 = vsub.f32 1.5, %v2218_v61 }
 0xbaf   :  { %v2231_v42 = vadd.f32 %v3412_v41, %v2228_v48 }
 0xbb0   :  { %v2220_v34 = vmul.f32 %v3494_v25, %v2219_v31 }
 0xbb2   :  { %v2224_v37 = vsel %vm2223_vm7, %v3494_v25, %v2220_v34 }
 0xbb3   :  { %v2226_v38 = vmul.f32 %v2224_v37, %v2202_v35 }
 0xbb5   :  { %v2229_v46 = vmul.f32 %v3411_v29, %v2226_v38  ;;  %v2597_v29 = vld [vmem:[#allocation2] sm:$0x1] }
 0xbb6   :  { %3351 = vpush %v2597_v29 }
 0xbb7   :  { %v2232_v43 = vadd.f32 %v3412_v41, %v2229_v46 }
 0xbb9   :  { %v2233_v4 = vpack.c.bf16 %v2232_v43, %v2231_v42 }
 0xbbb   :  { %2346 = vmatmul.bf16.vlgmr.msrb.gmra.mxu2 %v2233_v4  ;;  %2360 = vmatmul.bf16.vlgmr.msra.gmra.mxu3 %v2233_v4 }
 0xc3e   :  { %v2347_v55 = vpop.f32.mrf.mxu2  ;;  %v2361_v56 = vpop.f32.mrf.mxu3 }
 0xc3f   :  { %v2348_v59 = vadd.f32 %v2347_v55, %v2254_v57  ;;  %v2362_v60 = vadd.f32 %v2361_v56, %v2255_v58 }
 0xc41   :  { %v2366_v3 = vmax.f32 %v2348_v59, 0.0  ;;  %v2367_v52 = vmax.f32 %v2362_v60, 0.0 }
 0xc46   :  { %v2349_v6 = vpop.f32.mrf.mxu2  ;;  %v2363_v62 = vpop.f32.mrf.mxu3 }
 0xc47   :  { %v2350_v63 = vadd.f32 %v2349_v6, %v2254_v57  ;;  %v2364_v2 = vadd.f32 %v2363_v62, %v2255_v58 }
 0xc49   :  { %v2368_v5 = vmax.f32 %v2350_v63, 0.0  ;;  %v2369_v8 = vmax.f32 %v2364_v2, 0.0 }
 0xc4b   :  { %v2370_v9 = vpack.c.bf16 %v2368_v5, %v2366_v3  ;;  %v2371_v10 = vpack.c.bf16 %v2369_v8, %v2367_v52 }
 0xc4d   :  { %2511 = vmatmul.bf16.vlgmr.msrb.gmra.mxu0 %v2370_v9  ;;  %2525 = vmatmul.bf16.vlgmr.msra.gmra.mxu1 %v2371_v10 }
 0xcca   :  { %v2512_v13 = vpop.f32.mrf.mxu0  ;;  %v2526_v14 = vpop.f32.mrf.mxu1 }
 0xccb   :  { %v2513_v40 = vadd.f32 %v3413_v11, %v2512_v13 }
 0xccd   :  { %v2527_v15 = vadd.f32 %v2526_v14, %v2513_v40 }
 0xccf   :  { %v2531_v16 = vadd.f32 %v2527_v15, %v2231_v42 }
 0xcd1   :  { %2535 = vadd.xlane.f32.xlu1 %v2531_v16  ;;  %v2541_v53 = vmul.f32 %v2531_v16, %v2531_v16 }
 0xcd2   :  { %v2514_v18 = vpop.f32.mrf.mxu0  ;;  %v2528_v7 = vpop.f32.mrf.mxu1 }
 0xcd3   :  { %v2515_v33 = vadd.f32 %v3413_v11, %v2514_v18 }
 0xcd5   :  { %v2529_v19 = vadd.f32 %v2528_v7, %v2515_v33 }
 0xcd7   :  { %v2532_v20 = vadd.f32 %v2529_v19, %v2232_v43 }
 0xcd9   :  { %2537 = vadd.xlane.f32.xlu1 %v2532_v20  ;;  %v2542_v17 = vmul.f32 %v2532_v20, %v2532_v20 }
 0xcdb   :  { %2545 = vadd.xlane.f32.xlu2 %v2542_v17 }
 0xce1   :  { %2543 = vadd.xlane.f32.xlu1 %v2541_v53 }
 0xd44   :  { %v2536_v21 = vpop.xlane.xlu1 %2535 }
 0xd45   :  { %v2539_v26 = vmul.f32 %v2536_v21, %v4069_v0 }
 0xd47   :  { %v2549_v61 = vmul.f32 %v2539_v26, %v2539_v26  ;;  %v2555_v56 = vsub.f32 %v2531_v16, %v2539_v26 }
 0xd4c   :  { %v2538_v36 = vpop.xlane.xlu1 %2537 }
 0xd4d   :  { %v2540_v22 = vmul.f32 %v2538_v36, %v4069_v0 }
 0xd4e   :  { %v2546_v23 = vpop.xlane.xlu2 %2545 }
 0xd4f   :  { %v2550_v24 = vmul.f32 %v2540_v22, %v2540_v22  ;;  %v2548_v25 = vmul.f32 %v2546_v23, %v4069_v0  ;;  %v2556_v44 = vsub.f32 %v2532_v20, %v2540_v22 }
 0xd51   :  { %v2552_v27 = vsub.f32 %v2548_v25, %v2550_v24 }
 0xd53   :  { %v2554_v28 = vmax.f32 %v2552_v27, 0.0 }
 0xd54   :  { %v2544_v1 = vpop.xlane.xlu1 %2543 }
 0xd55   :  { %v2558_v30 = vadd.f32 1e-05, %v2554_v28  ;;  %v2547_v31 = vmul.f32 %v2544_v1, %v4069_v0  ;;  %v3414_v0 = vld [vmem:[%s4265_s11 + $0x1] ss:$0 sm:$0xff]  ;;  %s3352_s11 = spop %3351 }
 0xd56   :  { %v2599_v2 = vstv %s3352_s11 }
 0xd57   :  { %3495 = vrsqrt.f32 %v2558_v30  ;;  %v2551_v32 = vsub.f32 %v2547_v31, %v2549_v61  ;;  %vm2575_vm9 = vweird.f32 %v2558_v30 }
 0xd59   :  { %v2553_v34 = vmax.f32 %v2551_v32, 0.0 }
 0xd5b   :  { %v2557_v35 = vadd.f32 1e-05, %v2553_v34 }
 0xd5d   :  { %v3496_v37 = vpop.eup %3495  ;;  %3497 = vrsqrt.f32 %v2557_v35  ;;  %vm2565_vm12 = vweird.f32 %v2557_v35 }
 0xd5e   :  { %v2570_v38 = vmul.f32 %v3496_v37, %v2558_v30  ;;  %vm2576_vm8 = vweird.f32 %v3496_v37 }
 0xd5f   :  { %vm2577_vm10 = vmor %vm2575_vm9, %vm2576_vm8 }
 0xd60   :  { %v2571_v48 = vmul.f32 %v3496_v37, %v2570_v38 }
 0xd62   :  { %v2572_v41 = vmul.f32 0.5, %v2571_v48 }
 0xd63   :  { %v3498_v46 = vpop.eup %3497 }
 0xd64   :  { %v2573_v42 = vsub.f32 1.5, %v2572_v41  ;;  %v2560_v43 = vmul.f32 %v3498_v46, %v2557_v35  ;;  %vm2566_vm11 = vweird.f32 %v3498_v46 }
 0xd65   :  { %vm2567_vm13 = vmor %vm2565_vm12, %vm2566_vm11 }
 0xd66   :  { %v2561_v4 = vmul.f32 %v3498_v46, %v2560_v43  ;;  %v2574_v39 = vmul.f32 %v3496_v37, %v2573_v42 }
 0xd68   :  { %v2562_v45 = vmul.f32 0.5, %v2561_v4  ;;  %v2578_v47 = vsel %vm2577_vm10, %v3496_v37, %v2574_v39 }
 0xd69   :  { %v2580_v12 = vmul.f32 %v2578_v47, %v2556_v44 }
 0xd6a   :  { %v2563_v50 = vsub.f32 1.5, %v2562_v45 }
 0xd6b   :  { %v2583_v51 = vmul.f32 %v3414_v0, %v2580_v12 }
 0xd6c   :  { %v2564_v55 = vmul.f32 %v3498_v46, %v2563_v50 }
 0xd6d   :  { %v2586_v57 = vadd.f32 %v3415_v49, %v2583_v51 }
 0xd6e   :  { %v2568_v58 = vsel %vm2567_vm13, %v3498_v46, %v2564_v55 }
 0xd6f   :  { %v2592_v59 = vmul.f32 %v3416_v54, %v2586_v57  ;;  %v2579_v60 = vmul.f32 %v2568_v58, %v2555_v56 }
 0xd71   :  { %2595 = vadd.xlane.f32.xlu0 %v2592_v59  ;;  %v2582_v6 = vmul.f32 %v3414_v0, %v2579_v60 }
 0xd73   :  { %v2585_v62 = vadd.f32 %v3415_v49, %v2582_v6 }
 0xd75   :  { %v2591_v63 = vmul.f32 %v3416_v54, %v2585_v62 }
 0xd77   :  { %2593 = vadd.xlane.f32.xlu1 %v2591_v63 }
 0xde4   :  { %v2596_v3 = vpop.xlane.xlu0 %2595 }
 0xde5   :  { %v2601_v52 = vadd.f32 %v2599_v2, %v2596_v3 }
 0xde7   :  { %v2608_v5 = vrot.slane %v2601_v52, 4 }
 0xde9   :  { %v2609_v8 = vmax.f32 %v2601_v52, %v2608_v5 }
 0xdea   :  { %v2594_v9 = vpop.xlane.xlu1 %2593 }
 0xdeb   :  { %v2610_v10 = vrot.slane %v2609_v8, 2  ;;  %v2600_v11 = vadd.f32 %v2599_v2, %v2594_v9 }
 0xded   :  { %v2611_v13 = vmax.f32 %v2609_v8, %v2610_v10  ;;  %v2602_v14 = vrot.slane %v2600_v11, 4 }
 0xdef   :  { %v2612_v40 = vrot.slane %v2611_v13, 1  ;;  %v2603_v15 = vmax.f32 %v2600_v11, %v2602_v14 }
 0xdf1   :  { %v2613_v16 = vmax.f32 %v2611_v13, %v2612_v40  ;;  %v2604_v18 = vrot.slane %v2603_v15, 2 }
 0xdf3   :  { %v2615_v33 = vsub.f32 %v2601_v52, %v2613_v16  ;;  %v2605_v7 = vmax.f32 %v2603_v15, %v2604_v18 }
 0xdf5   :  { %v2618_v19 = vmul.f32 1.442695, %v2615_v33  ;;  %v2606_v20 = vrot.slane %v2605_v7, 1 }
 0xdf7   :  { %3499 = vpow2.f32 %v2618_v19  ;;  %v2607_v17 = vmax.f32 %v2605_v7, %v2606_v20 }
 0xdf9   :  { %v2614_v53 = vsub.f32 %v2600_v11, %v2607_v17 }
 0xdfb   :  { %v2616_v21 = vmul.f32 1.442695, %v2614_v53 }
 0xdfd   :  { %v3500_v36 = vpop.eup %3499  ;;  %3501 = vpow2.f32 %v2616_v21 }
 0xdfe   :  { %v2626_v22 = vrot.slane %v3500_v36, 4 }
 0xe00   :  { %v2627_v23 = vadd.f32 %v3500_v36, %v2626_v22 }
 0xe02   :  { %v2628_v24 = vrot.slane %v2627_v23, 2 }
 0xe03   :  { %v3502_v25 = vpop.eup %3501 }
 0xe04   :  { %v2629_v26 = vadd.f32 %v2628_v24, %v2627_v23  ;;  %v2620_v27 = vrot.slane %v3502_v25, 4 }
 0xe06   :  { %v2630_v28 = vrot.slane %v2629_v26, 1  ;;  %v2621_v1 = vadd.f32 %v3502_v25, %v2620_v27 }
 0xe08   :  { %v2622_v61 = vrot.slane %v2621_v1, 2  ;;  %v2631_v30 = vadd.f32 %v2630_v28, %v2629_v26 }
 0xe0a   :  { %v2623_v31 = vadd.f32 %v2622_v61, %v2621_v1  ;;  %3503 = vrcp.f32 %v2631_v30 }
 0xe0c   :  { %v2624_v32 = vrot.slane %v2623_v31, 1 }
 0xe0e   :  { %v2625_v29 = vadd.f32 %v2624_v32, %v2623_v31 }
 0xe10   :  { %v3504_v34 = vpop.eup %3503  ;;  %3505 = vrcp.f32 %v2625_v29 }
 0xe11   :  { %v2635_v35 = vmul.f32 %v3504_v34, %v3500_v36 }
 0xe13   :  { %v2637_v37 = vmul.f32 %v2635_v35, %v2586_v57 }
 0xe15   :  { %v2644_v38 = vrot.slane %v2637_v37, 4 }
 0xe16   :  { %v3506_v48 = vpop.eup %3505 }
 0xe17   :  { %v2634_v41 = vmul.f32 %v3506_v48, %v3502_v25  ;;  %v2645_v46 = vadd.f32 %v2644_v38, %v2637_v37 }
 0xe19   :  { %v2636_v42 = vmul.f32 %v2634_v41, %v2585_v62  ;;  %v2646_v43 = vrot.slane %v2645_v46, 2 }
 0xe1b   :  { %v2638_v4 = vrot.slane %v2636_v42, 4  ;;  %v2647_v44 = vadd.f32 %v2646_v43, %v2645_v46 }
 0xe1d   :  { %v2639_v39 = vadd.f32 %v2638_v4, %v2636_v42  ;;  %v2648_v47 = vrot.slane %v2647_v44, 1 }
 0xe1f   :  { %v2640_v0 = vrot.slane %v2639_v39, 2  ;;  %v2649_v50 = vadd.f32 %v2648_v47, %v2647_v44 }
 0xe21   :  { %v2641_v45 = vadd.f32 %v2640_v0, %v2639_v39 }
 0xe23   :  { %v2642_v12 = vrot.slane %v2641_v45, 1 }
 0xe25   :  { %v2643_v49 = vadd.f32 %v2642_v12, %v2641_v45 }
 0xe27   :  { %v2653_v51 = vsel %vm2652_vm14, %v2649_v50, %v2643_v49 }
 0xe28   :  { %2655 = vst [vmem:[#allocation21] sm:$0x3] %v2653_v51 }
 0xe29   :  { %2666 = dma.vmem_to_hbm [thread:$0]  %s2662_s6, 32, %s2664_s27, [#allocation5]  }
 0xe2a   :  { %3807 = dma.done.wait [#allocation5], 32  }
 0xe2b   :  { %3808 = vsyncadd [#allocation5], 4294967264 }
 0xe2c   :  { %2671 = vsyncpa [#allocation4], 1 }
 0xe2d   :  { %2672 = vsyncpa [#allocation7], 1 }
 0xe2e   :  { %2673 = vsyncpa [#allocation10], 1 }
 0xe2f   :  { %2674 = vsyncpa [#allocation13], 1 }
 0xe30   :  { %2675 = vsyncpa [#allocation16], 1 }
 0xe31   :  { %2676 = vsyncpa [#allocation19], 1 }
 0xe32   :  { %2677 = vsyncpa [#allocation5], 1 }

</bundles_post_ra>
